<compile_context>
chip_gen: v5e
topology: v5e:2x2
jax: 0.10.0
libtpu: 0.0.40
codegen_flags: <defaults>
</compile_context>

<pallas_src>
import math
import numpy as np
import jax
import jax.numpy as jnp
from jax import lax
from jax.experimental import pallas as pl
from jax.experimental.pallas import tpu as pltpu

VMEM = pltpu.MemorySpace.VMEM

BN_EPS = 1e-5


# ----------------------------------------------------------------------------
# bsm mask (verbatim translation of the reference helper)
# ----------------------------------------------------------------------------
def bsm(n, d):
    a = [[0] * n for _ in range(n)]
    p = 0
    q = n - 1
    w = (n + 1) / 2
    w = int(w)
    t = 0
    while p < d:
        for i in range(p, q):
            a[p][i] = t
        for i in range(p, q):
            a[i][q] = t
        for i in range(q, p, -1):
            a[q][i] = t
        for i in range(q, p, -1):
            a[i][p] = t
        p += 1
        q -= 1
    while p == d or (p > d and p < q):
        for i in range(p, q):
            a[p][i] = 1
        for i in range(p, q):
            a[i][q] = 1
        for i in range(q, p, -1):
            a[q][i] = 1
        for i in range(q, p, -1):
            a[i][p] = 1
        a[w - 1][w - 1] = 1
        p += 1
        q -= 1
    return np.array(a)


# ----------------------------------------------------------------------------
# Host-side parameter folding
# ----------------------------------------------------------------------------
def _band_matrix(taps, C):
    """Row-vector form: out[c] = sum_k taps[k] * in[c + k - 1] (zero padded)."""
    idx = np.arange(C)
    d = idx[:, None] - idx[None, :]
    out = np.zeros((C, C), np.float32)
    for k in range(3):
        out += np.where(d == k - 1, np.float32(taps[k]), np.float32(0.0))
    return out


def _ncam_matrices(w1, w2, C):
    """Fold channel reversal + the two (2,3) channel convs of NCAM into (C,C) mats."""
    idx = np.arange(C)
    J = (idx[:, None] + idx[None, :] == C - 1).astype(np.float32)   # channel reversal
    w1 = np.asarray(w1, np.float32)
    w2 = np.asarray(w2, np.float32)
    M1 = _band_matrix(w1[0], C) + J @ _band_matrix(w1[1], C)        # conv1d  (unmasked)
    M2 = _band_matrix(w2[0], C) + J @ _band_matrix(w2[1], C)        # conv1d1 (masked)
    return np.stack([M1, M2]).astype(np.float32)                    # (2, C, C)


def _shift_matrices(H, W, wc):
    """Right-multiplication shift / stencil matrices on the flattened h*W+w axis.

    y = x @ S gives y[:, (h,w)] = x[:, (h+dh, w+dw)] with zero padding built in."""
    HW = H * W

    def shift_mat(dh, dw):
        S = np.zeros((HW, HW), np.float32)
        for h in range(H):
            for w in range(W):
                hs, ws = h + dh, w + dw
                if 0 <= hs < H and 0 <= ws < W:
                    S[hs * W + ws, h * W + w] = 1.0
        return S

    s_wm = shift_mat(0, -1)          # reads (h, w-1)
    s_wp = shift_mat(0, +1)          # reads (h, w+1)
    s_hm = shift_mat(-1, 0)          # reads (h-1, w)
    s_hp = shift_mat(+1, 0)          # reads (h+1, w)
    s_c = np.zeros((HW, HW), np.float32)         # full (1,3,3) depthwise stencil
    for kh in range(3):
        for kw in range(3):
            s_c += np.float32(wc[kh, kw]) * shift_mat(kh - 1, kw - 1)
    return np.stack([s_wm, s_wp, s_hm, s_hp, s_c])


# ----------------------------------------------------------------------------
# Fused LE_HCL kernel (one invocation, per-batch 2-D (channels, H*W) slabs)
# ----------------------------------------------------------------------------
def _make_le_hcl_kernel(B, P, H, W, ax):
    aa = ax * P
    HW = H * W
    inv_hw = 1.0 / float(HW)
    inv_bhw = 1.0 / float(B * HW)

    def kernel(x_ref, smask_ref, shifts_ref, dw3A_ref, nMP_ref, nMA_ref,
               nbP_ref, nbA_ref, pw3K_ref, pw2K_ref, aacol_ref, dw2t_ref,
               pcol_ref, bn3G_ref, o_ref):
        f32 = jnp.float32
        smask = smask_ref[...]                         # (1, HW) ScaleMaskModule mask
        s_wm = shifts_ref[0]                           # (HW, HW) spatial shift matrices
        s_wp = shifts_ref[1]
        s_hm = shifts_ref[2]
        s_hp = shifts_ref[3]
        s_c = shifts_ref[4]                            # (1,3,3) depthwise stencil

        def mm(a, b):
            return jnp.dot(a, b, preferred_element_type=f32)

        def sigmoid(t):
            return 1.0 / (1.0 + jnp.exp(-t))

        def hswish(t):
            return t * jnp.clip(t + 3.0, 0.0, 6.0) * (1.0 / 6.0)

        def ncam(t, M_ref, b_ref, i0):
            """NCAM attention rescale of a (C, HW) slab (one batch element)."""
            pooled = jnp.sum(t, axis=1, keepdims=True) * inv_hw             # (C, 1)
            pooledm = jnp.sum(t * smask, axis=1, keepdims=True) * inv_hw    # (C, 1)
            y1 = mm(M_ref[i0], pooled) + b_ref[i0]          # conv1d   (unmasked pool)
            y2 = mm(M_ref[i0 + 1], pooledm) + b_ref[i0 + 1]  # conv1d1 (masked pool)
            at = sigmoid((sigmoid(y1) * sigmoid(y2) - 0.2) * 2.0)
            return t * at

        # ---- phase 1: LE_DSC3D per batch element --------------------------------
        z_list = []
        for b in range(B):
            xb = x_ref[b]                               # (P, HW); P = spectral depth
            xwm = mm(xb, s_wm)                          # shifted copies via MXU
            xwp = mm(xb, s_wp)
            xhm = mm(xb, s_hm)
            xhp = mm(xb, s_hp)
            # three depthwise Conv3d's: depth taps as (P,P) band matrices (MXU),
            # spatial taps folded into the shift/stencil matrices; summed + bias.
            y = (mm(dw3A_ref[0], xb) + mm(dw3A_ref[1], xwm) + mm(dw3A_ref[2], xwp)
                 + mm(dw3A_ref[3], xhm) + mm(dw3A_ref[4], xhp)
                 + mm(xb, s_c) + pcol_ref[0])
            y = ncam(y, nMP_ref, nbP_ref, 0)            # NCAM3D at1 (C = P)
            z = mm(pw3K_ref[...], y) + aacol_ref[0]     # pointwise Conv3d(1, ax, 1)
            z = ncam(z, nMA_ref, nbA_ref, 0)            # NCAM3D at2 (C = aa)
            z_list.append(z)                            # (aa, HW)

        # ---- BatchNorm3d(ax): grouped batch statistics over (B, depth, H, W) ----
        csum = jnp.sum(z_list[0], axis=1, keepdims=True)
        for b in range(1, B):
            csum = csum + jnp.sum(z_list[b], axis=1, keepdims=True)
        gmean = mm(bn3G_ref[...], csum) * inv_bhw       # (aa, 1) per-group mean
        ssum = None
        for b in range(B):
            dz = z_list[b] - gmean
            ps = jnp.sum(dz * dz, axis=1, keepdims=True)
            ssum = ps if ssum is None else ssum + ps
        gvar = mm(bn3G_ref[...], ssum) * inv_bhw        # (aa, 1) per-group variance
        scale3 = aacol_ref[2] * lax.rsqrt(gvar + BN_EPS)
        shift3 = aacol_ref[3]

        # ---- phase 2: hswish + LE_DSC2D per batch element ------------------------
        p_list = []
        for b in range(B):
            zb = hswish((z_list[b] - gmean) * scale3 + shift3)    # (aa, HW)
            zwm = mm(zb, s_wm)
            zwp = mm(zb, s_wp)
            zhm = mm(zb, s_hm)
            zhp = mm(zb, s_hp)
            # depthwise (3,1) + (1,3) Conv2d's: per-channel taps broadcast over lanes
            d2 = (dw2t_ref[0] * zhm + dw2t_ref[1] * zb + dw2t_ref[2] * zhp
                  + dw2t_ref[3] * zwm + dw2t_ref[4] * zwp + aacol_ref[1])
            d2 = ncam(d2, nMA_ref, nbA_ref, 2)          # NCAM2D at1 (C = aa)
            pw = mm(pw2K_ref[...], d2) + pcol_ref[1]    # pointwise Conv2d(aa, P, 1)
            pw = ncam(pw, nMP_ref, nbP_ref, 2)          # NCAM2D at2 (C = P)
            p_list.append(pw)                           # (P, HW)

        # ---- BatchNorm2d(P): per-channel batch statistics ------------------------
        csum2 = jnp.sum(p_list[0], axis=1, keepdims=True)
        for b in range(1, B):
            csum2 = csum2 + jnp.sum(p_list[b], axis=1, keepdims=True)
        mean2 = csum2 * inv_bhw
        ssum2 = None
        for b in range(B):
            dp = p_list[b] - mean2
            ps = jnp.sum(dp * dp, axis=1, keepdims=True)
            ssum2 = ps if ssum2 is None else ssum2 + ps
        var2 = ssum2 * inv_bhw
        scale2 = pcol_ref[2] * lax.rsqrt(var2 + BN_EPS)
        shift2 = pcol_ref[3]

        # ---- finalize: hswish + residual, lane-dense NCHW-ordered store ----------
        for b in range(B):
            o_ref[b] = hswish((p_list[b] - mean2) * scale2 + shift2) + x_ref[b]

    return kernel


# ----------------------------------------------------------------------------
# Full LE_HCL forward (single pallas_call; host side is reshape-only)
# ----------------------------------------------------------------------------
def le_hcl_forward(x, p):
    """x: (B, P, H, W) float32 NCHW.  Returns (B, P, H, W)."""
    B, P, H, W = x.shape
    ax = p['ax']
    HW = H * W
    vs = pl.BlockSpec(memory_space=VMEM)

    out = pl.pallas_call(
        _make_le_hcl_kernel(B, P, H, W, ax),
        out_shape=jax.ShapeDtypeStruct((B, P, HW), jnp.float32),
        in_specs=[vs] * 14,
        out_specs=vs,
    )(x.reshape(B, P, HW), p['smask'], p['shifts'], p['dw3A'],
      p['nMP'], p['nMA'], p['nbP'], p['nbA'],
      p['pw3K'], p['pw2K'], p['aacol'], p['dw2t'], p['pcol'], p['bn3G'])

    return out.reshape(B, P, H, W)


# ----------------------------------------------------------------------------
# Parameters (deterministic, synthetic, packed into kernel-ready layouts)
# ----------------------------------------------------------------------------
def init_params(key, P, H, W, ax, patch_size, c):
    assert c == 3, "kernel is specialized to 3-tap depthwise convolutions"
    assert H == W, "bsm mask (and the reference module) assume square patches"
    aa = ax * P
    HW = H * W
    keys = jax.random.split(key, 32)
    ki = iter(keys)

    def nrm(shape, s):
        return np.asarray(jax.random.normal(next(ki), shape, jnp.float32)) * np.float32(s)

    p = {'ax': ax}

    # ScaleMaskModule mask, shared by all four NCAM instances (flattened lane row).
    d = (patch_size - 1) // 2 - 1
    p['smask'] = jnp.asarray(np.asarray(bsm(W, d), np.float32).reshape(1, HW))

    # LE_DSC3D depthwise Conv3d taps (nin = nout = 1 -> scalar taps) + summed bias.
    wa = nrm((3, 3), 0.3)            # kernel (3,1,3): (kd, kw)
    wb = nrm((3, 3), 0.3)            # kernel (3,3,1): (kd, kh)
    wc = nrm((3, 3), 0.3)            # kernel (1,3,3): (kh, kw)
    dw3_bias = float(np.sum(nrm((3,), 0.05)))

    # Spatial shift / stencil matrices (right-multiplication on the flattened axis).
    p['shifts'] = jnp.asarray(_shift_matrices(H, W, wc))

    # Depth (spectral) band matrices (left-multiplication, channel-first orientation).
    def depth_band(taps):
        m = np.zeros((P, P), np.float32)
        for kd in range(3):
            for dd in range(P):
                sr = dd + kd - 1
                if 0 <= sr < P:
                    m[dd, sr] = np.float32(taps[kd])
        return m

    p['dw3A'] = jnp.asarray(np.stack([
        depth_band(wa[:, 1]) + depth_band(wb[:, 1]),   # unshifted (centre W & H taps)
        depth_band(wa[:, 0]),                          # pairs with (h, w-1)
        depth_band(wa[:, 2]),                          # pairs with (h, w+1)
        depth_band(wb[:, 0]),                          # pairs with (h-1, w)
        depth_band(wb[:, 2]),                          # pairs with (h+1, w)
    ]))

    # pointwise Conv3d(1, ax, 1): block-broadcast mixing on flattened channels c=a*P+d.
    w3 = nrm((ax,), 0.3)
    b3 = nrm((ax,), 0.05)
    Kt = np.zeros((aa, P), np.float32)
    for a in range(ax):
        Kt[a * P + np.arange(P), np.arange(P)] = w3[a]
    p['pw3K'] = jnp.asarray(Kt)
    pw3_bias = np.repeat(b3, P).reshape(aa, 1)

    # NCAM instances (channel counts P, aa, aa, P): folded matrices + bias columns.
    nM, nb = {}, {}
    for i, C in enumerate((P, aa, aa, P)):
        w1, w2, bb = nrm((2, 3), 0.4), nrm((2, 3), 0.4), nrm((2,), 0.05)
        M = _ncam_matrices(w1, w2, C)                    # row-vector form
        nM[i] = np.transpose(M, (0, 2, 1))               # column-vector (channel-first)
        col = np.zeros((2, C, 1), np.float32)
        col[0, :, 0] = bb[0]
        col[1, :, 0] = bb[1]
        nb[i] = col
    p['nMP'] = jnp.asarray(np.concatenate([nM[0], nM[3]], axis=0))   # (4, P, P)
    p['nMA'] = jnp.asarray(np.concatenate([nM[1], nM[2]], axis=0))   # (4, aa, aa)
    p['nbP'] = jnp.asarray(np.concatenate([nb[0], nb[3]], axis=0))   # (4, P, 1)
    p['nbA'] = jnp.asarray(np.concatenate([nb[1], nb[2]], axis=0))   # (4, aa, 1)

    # BatchNorm3d(ax): group-averaging matrix + affine (PyTorch defaults gamma=1,beta=0).
    gidx = np.arange(aa) // P
    p['bn3G'] = jnp.asarray((gidx[:, None] == gidx[None, :]).astype(np.float32) / P)
    bn3_gamma = np.ones((aa, 1), np.float32)
    bn3_beta = np.zeros((aa, 1), np.float32)

    # LE_DSC2D per-channel depthwise taps (centre taps summed) + summed bias.
    wh = nrm((3, aa), 0.3)
    wwt = nrm((3, aa), 0.3)
    dw2_bias = (nrm((aa,), 0.05) + nrm((aa,), 0.05)).reshape(aa, 1)
    p['dw2t'] = jnp.asarray(np.stack([wh[0], wh[1] + wwt[1], wh[2], wwt[0], wwt[2]])
                            .reshape(5, aa, 1))

    # pointwise Conv2d(aa, P, 1) and BatchNorm2d(P) affine (PyTorch defaults).
    p['pw2K'] = jnp.asarray(nrm((P, aa), 0.3))
    pw2_bias = nrm((P,), 0.05).reshape(P, 1)
    bn2_gamma = np.ones((P, 1), np.float32)
    bn2_beta = np.zeros((P, 1), np.float32)

    # Packed per-channel parameter columns.
    p['aacol'] = jnp.asarray(np.stack([pw3_bias, dw2_bias, bn3_gamma, bn3_beta]))
    p['pcol'] = jnp.asarray(np.stack([np.full((P, 1), dw3_bias, np.float32),
                                      pw2_bias, bn2_gamma, bn2_beta]))
    return p


# ----------------------------------------------------------------------------
if __name__ == "__main__":
    # LE_HCL(ax, aa, c, pca_components, patch_size) with aa = ax * pca_components
    B, ax, c, pca, patch = 2, 2, 3, 8, 9
    aa = ax * pca
    H = W = patch

    # NCAM's adaptive 1-D kernel size must be 3 for these channel counts
    def ncam_k(ch):
        k = int(abs((math.log(ch, 2) + 3) / 2))
        return k if k % 2 else k + 1
    assert ncam_k(pca) == 3 and ncam_k(aa) == 3, "kernel specialized to 3-tap NCAM conv"

    key = jax.random.PRNGKey(0)
    kx, kp = jax.random.split(key)
    x = jax.random.normal(kx, (B, pca, H, W), jnp.float32)   # NCHW, like PyTorch
    params = init_params(kp, pca, H, W, ax, patch, c)

    fwd = jax.jit(lambda xx: le_hcl_forward(xx, params))
    out = jax.block_until_ready(fwd(x))

    assert out.shape == (B, pca, H, W)
    assert bool(jnp.all(jnp.isfinite(out)))
    print("KERNEL_OK")
</pallas_src>

<mosaic_0001>
module attributes {stable_mosaic.version = 11 : i64} {
  func.func @kernel(%arg0: memref<2x8x81xf32, #tpu.memory_space<vmem>>, %arg1: memref<1x81xf32, #tpu.memory_space<vmem>>, %arg2: memref<5x81x81xf32, #tpu.memory_space<vmem>>, %arg3: memref<5x8x8xf32, #tpu.memory_space<vmem>>, %arg4: memref<4x8x8xf32, #tpu.memory_space<vmem>>, %arg5: memref<4x16x16xf32, #tpu.memory_space<vmem>>, %arg6: memref<4x8x1xf32, #tpu.memory_space<vmem>>, %arg7: memref<4x16x1xf32, #tpu.memory_space<vmem>>, %arg8: memref<16x8xf32, #tpu.memory_space<vmem>>, %arg9: memref<8x16xf32, #tpu.memory_space<vmem>>, %arg10: memref<4x16x1xf32, #tpu.memory_space<vmem>>, %arg11: memref<5x16x1xf32, #tpu.memory_space<vmem>>, %arg12: memref<4x8x1xf32, #tpu.memory_space<vmem>>, %arg13: memref<16x16xf32, #tpu.memory_space<vmem>>, %arg14: memref<2x8x81xf32, #tpu.memory_space<vmem>>) attributes {dimension_semantics = [], scalar_prefetch = 0 : i64, scratch_operands = 0 : i64, tpu.core_type = #tpu.core_type<tc>} {
    %c0 = arith.constant 0 : index
    %c0_0 = arith.constant 0 : index
    %0 = vector.load %arg1[%c0, %c0_0] : memref<1x81xf32, #tpu.memory_space<vmem>>, vector<1x81xf32>
    %c0_1 = arith.constant 0 : index
    %c0_2 = arith.constant 0 : index
    %c0_3 = arith.constant 0 : index
    %1 = vector.load %arg2[%c0_1, %c0_2, %c0_3] : memref<5x81x81xf32, #tpu.memory_space<vmem>>, vector<1x81x81xf32>
    %2 = vector.shape_cast %1 : vector<1x81x81xf32> to vector<81x81xf32>
    %c1 = arith.constant 1 : index
    %c0_4 = arith.constant 0 : index
    %c0_5 = arith.constant 0 : index
    %3 = vector.load %arg2[%c1, %c0_4, %c0_5] : memref<5x81x81xf32, #tpu.memory_space<vmem>>, vector<1x81x81xf32>
    %4 = vector.shape_cast %3 : vector<1x81x81xf32> to vector<81x81xf32>
    %c2 = arith.constant 2 : index
    %c0_6 = arith.constant 0 : index
    %c0_7 = arith.constant 0 : index
    %5 = vector.load %arg2[%c2, %c0_6, %c0_7] : memref<5x81x81xf32, #tpu.memory_space<vmem>>, vector<1x81x81xf32>
    %6 = vector.shape_cast %5 : vector<1x81x81xf32> to vector<81x81xf32>
    %c3 = arith.constant 3 : index
    %c0_8 = arith.constant 0 : index
    %c0_9 = arith.constant 0 : index
    %7 = vector.load %arg2[%c3, %c0_8, %c0_9] : memref<5x81x81xf32, #tpu.memory_space<vmem>>, vector<1x81x81xf32>
    %8 = vector.shape_cast %7 : vector<1x81x81xf32> to vector<81x81xf32>
    %c4 = arith.constant 4 : index
    %c0_10 = arith.constant 0 : index
    %c0_11 = arith.constant 0 : index
    %9 = vector.load %arg2[%c4, %c0_10, %c0_11] : memref<5x81x81xf32, #tpu.memory_space<vmem>>, vector<1x81x81xf32>
    %10 = vector.shape_cast %9 : vector<1x81x81xf32> to vector<81x81xf32>
    %c0_12 = arith.constant 0 : index
    %c0_13 = arith.constant 0 : index
    %c0_14 = arith.constant 0 : index
    %11 = vector.load %arg0[%c0_12, %c0_13, %c0_14] : memref<2x8x81xf32, #tpu.memory_space<vmem>>, vector<1x8x81xf32>
    %12 = vector.shape_cast %11 : vector<1x8x81xf32> to vector<8x81xf32>
    %cst = arith.constant dense<0.000000e+00> : vector<8x81xf32>
    %13 = tpu.matmul %12, %2, %cst {dimension_numbers = #tpu.dot_dimension_numbers<[1], [0], [0], [1], [0, 0, 1, 1], [], []>} : vector<8x81xf32>, vector<81x81xf32>, vector<8x81xf32> -> vector<8x81xf32>
    %cst_15 = arith.constant dense<0.000000e+00> : vector<8x81xf32>
    %14 = tpu.matmul %12, %4, %cst_15 {dimension_numbers = #tpu.dot_dimension_numbers<[1], [0], [0], [1], [0, 0, 1, 1], [], []>} : vector<8x81xf32>, vector<81x81xf32>, vector<8x81xf32> -> vector<8x81xf32>
    %cst_16 = arith.constant dense<0.000000e+00> : vector<8x81xf32>
    %15 = tpu.matmul %12, %6, %cst_16 {dimension_numbers = #tpu.dot_dimension_numbers<[1], [0], [0], [1], [0, 0, 1, 1], [], []>} : vector<8x81xf32>, vector<81x81xf32>, vector<8x81xf32> -> vector<8x81xf32>
    %cst_17 = arith.constant dense<0.000000e+00> : vector<8x81xf32>
    %16 = tpu.matmul %12, %8, %cst_17 {dimension_numbers = #tpu.dot_dimension_numbers<[1], [0], [0], [1], [0, 0, 1, 1], [], []>} : vector<8x81xf32>, vector<81x81xf32>, vector<8x81xf32> -> vector<8x81xf32>
    %c0_18 = arith.constant 0 : index
    %c0_19 = arith.constant 0 : index
    %c0_20 = arith.constant 0 : index
    %17 = vector.load %arg3[%c0_18, %c0_19, %c0_20] : memref<5x8x8xf32, #tpu.memory_space<vmem>>, vector<1x8x8xf32>
    %18 = vector.shape_cast %17 : vector<1x8x8xf32> to vector<8x8xf32>
    %cst_21 = arith.constant dense<0.000000e+00> : vector<8x81xf32>
    %19 = tpu.matmul %18, %12, %cst_21 {dimension_numbers = #tpu.dot_dimension_numbers<[1], [0], [0], [1], [0, 0, 1, 1], [], []>} : vector<8x8xf32>, vector<8x81xf32>, vector<8x81xf32> -> vector<8x81xf32>
    %c1_22 = arith.constant 1 : index
    %c0_23 = arith.constant 0 : index
    %c0_24 = arith.constant 0 : index
    %20 = vector.load %arg3[%c1_22, %c0_23, %c0_24] : memref<5x8x8xf32, #tpu.memory_space<vmem>>, vector<1x8x8xf32>
    %21 = vector.shape_cast %20 : vector<1x8x8xf32> to vector<8x8xf32>
    %cst_25 = arith.constant dense<0.000000e+00> : vector<8x81xf32>
    %22 = tpu.matmul %21, %13, %cst_25 {dimension_numbers = #tpu.dot_dimension_numbers<[1], [0], [0], [1], [0, 0, 1, 1], [], []>} : vector<8x8xf32>, vector<8x81xf32>, vector<8x81xf32> -> vector<8x81xf32>
    %23 = arith.addf %19, %22 : vector<8x81xf32>
    %c2_26 = arith.constant 2 : index
    %c0_27 = arith.constant 0 : index
    %c0_28 = arith.constant 0 : index
    %24 = vector.load %arg3[%c2_26, %c0_27, %c0_28] : memref<5x8x8xf32, #tpu.memory_space<vmem>>, vector<1x8x8xf32>
    %25 = vector.shape_cast %24 : vector<1x8x8xf32> to vector<8x8xf32>
    %cst_29 = arith.constant dense<0.000000e+00> : vector<8x81xf32>
    %26 = tpu.matmul %25, %14, %cst_29 {dimension_numbers = #tpu.dot_dimension_numbers<[1], [0], [0], [1], [0, 0, 1, 1], [], []>} : vector<8x8xf32>, vector<8x81xf32>, vector<8x81xf32> -> vector<8x81xf32>
    %27 = arith.addf %23, %26 : vector<8x81xf32>
    %c3_30 = arith.constant 3 : index
    %c0_31 = arith.constant 0 : index
    %c0_32 = arith.constant 0 : index
    %28 = vector.load %arg3[%c3_30, %c0_31, %c0_32] : memref<5x8x8xf32, #tpu.memory_space<vmem>>, vector<1x8x8xf32>
    %29 = vector.shape_cast %28 : vector<1x8x8xf32> to vector<8x8xf32>
    %cst_33 = arith.constant dense<0.000000e+00> : vector<8x81xf32>
    %30 = tpu.matmul %29, %15, %cst_33 {dimension_numbers = #tpu.dot_dimension_numbers<[1], [0], [0], [1], [0, 0, 1, 1], [], []>} : vector<8x8xf32>, vector<8x81xf32>, vector<8x81xf32> -> vector<8x81xf32>
    %31 = arith.addf %27, %30 : vector<8x81xf32>
    %c4_34 = arith.constant 4 : index
    %c0_35 = arith.constant 0 : index
    %c0_36 = arith.constant 0 : index
    %32 = vector.load %arg3[%c4_34, %c0_35, %c0_36] : memref<5x8x8xf32, #tpu.memory_space<vmem>>, vector<1x8x8xf32>
    %33 = vector.shape_cast %32 : vector<1x8x8xf32> to vector<8x8xf32>
    %cst_37 = arith.constant dense<0.000000e+00> : vector<8x81xf32>
    %34 = tpu.matmul %33, %16, %cst_37 {dimension_numbers = #tpu.dot_dimension_numbers<[1], [0], [0], [1], [0, 0, 1, 1], [], []>} : vector<8x8xf32>, vector<8x81xf32>, vector<8x81xf32> -> vector<8x81xf32>
    %35 = arith.addf %31, %34 : vector<8x81xf32>
    %cst_38 = arith.constant dense<0.000000e+00> : vector<8x81xf32>
    %36 = tpu.matmul %12, %10, %cst_38 {dimension_numbers = #tpu.dot_dimension_numbers<[1], [0], [0], [1], [0, 0, 1, 1], [], []>} : vector<8x81xf32>, vector<81x81xf32>, vector<8x81xf32> -> vector<8x81xf32>
    %37 = arith.addf %35, %36 : vector<8x81xf32>
    %c0_39 = arith.constant 0 : index
    %c0_40 = arith.constant 0 : index
    %c0_41 = arith.constant 0 : index
    %38 = vector.load %arg12[%c0_39, %c0_40, %c0_41] : memref<4x8x1xf32, #tpu.memory_space<vmem>>, vector<1x8x1xf32>
    %39 = vector.shape_cast %38 : vector<1x8x1xf32> to vector<8x1xf32>
    %40 = vector.broadcast %39 : vector<8x1xf32> to vector<8x81xf32>
    %41 = arith.addf %37, %40 : vector<8x81xf32>
    %cst_42 = arith.constant dense<0.000000e+00> : vector<8xf32>
    %42 = vector.multi_reduction <add>, %41, %cst_42 [1] : vector<8x81xf32> to vector<8xf32>
    %43 = vector.shape_cast %42 : vector<8xf32> to vector<8x1xf32>
    %cst_43 = arith.constant 0.0123456791 : f32
    %44 = vector.broadcast %cst_43 : f32 to vector<8x1xf32>
    %45 = arith.mulf %43, %44 : vector<8x1xf32>
    %46 = vector.broadcast %0 : vector<1x81xf32> to vector<8x81xf32>
    %47 = arith.mulf %41, %46 : vector<8x81xf32>
    %cst_44 = arith.constant dense<0.000000e+00> : vector<8xf32>
    %48 = vector.multi_reduction <add>, %47, %cst_44 [1] : vector<8x81xf32> to vector<8xf32>
    %49 = vector.shape_cast %48 : vector<8xf32> to vector<8x1xf32>
    %cst_45 = arith.constant 0.0123456791 : f32
    %50 = vector.broadcast %cst_45 : f32 to vector<8x1xf32>
    %51 = arith.mulf %49, %50 : vector<8x1xf32>
    %c0_46 = arith.constant 0 : index
    %c0_47 = arith.constant 0 : index
    %c0_48 = arith.constant 0 : index
    %52 = vector.load %arg4[%c0_46, %c0_47, %c0_48] : memref<4x8x8xf32, #tpu.memory_space<vmem>>, vector<1x8x8xf32>
    %53 = vector.shape_cast %52 : vector<1x8x8xf32> to vector<8x8xf32>
    %cst_49 = arith.constant dense<0.000000e+00> : vector<8x1xf32>
    %54 = tpu.matmul %53, %45, %cst_49 {dimension_numbers = #tpu.dot_dimension_numbers<[1], [0], [0], [1], [0, 0, 1, 1], [], []>} : vector<8x8xf32>, vector<8x1xf32>, vector<8x1xf32> -> vector<8x1xf32>
    %c0_50 = arith.constant 0 : index
    %c0_51 = arith.constant 0 : index
    %c0_52 = arith.constant 0 : index
    %55 = vector.load %arg6[%c0_50, %c0_51, %c0_52] : memref<4x8x1xf32, #tpu.memory_space<vmem>>, vector<1x8x1xf32>
    %56 = vector.shape_cast %55 : vector<1x8x1xf32> to vector<8x1xf32>
    %57 = arith.addf %54, %56 : vector<8x1xf32>
    %c1_53 = arith.constant 1 : index
    %c0_54 = arith.constant 0 : index
    %c0_55 = arith.constant 0 : index
    %58 = vector.load %arg4[%c1_53, %c0_54, %c0_55] : memref<4x8x8xf32, #tpu.memory_space<vmem>>, vector<1x8x8xf32>
    %59 = vector.shape_cast %58 : vector<1x8x8xf32> to vector<8x8xf32>
    %cst_56 = arith.constant dense<0.000000e+00> : vector<8x1xf32>
    %60 = tpu.matmul %59, %51, %cst_56 {dimension_numbers = #tpu.dot_dimension_numbers<[1], [0], [0], [1], [0, 0, 1, 1], [], []>} : vector<8x8xf32>, vector<8x1xf32>, vector<8x1xf32> -> vector<8x1xf32>
    %c1_57 = arith.constant 1 : index
    %c0_58 = arith.constant 0 : index
    %c0_59 = arith.constant 0 : index
    %61 = vector.load %arg6[%c1_57, %c0_58, %c0_59] : memref<4x8x1xf32, #tpu.memory_space<vmem>>, vector<1x8x1xf32>
    %62 = vector.shape_cast %61 : vector<1x8x1xf32> to vector<8x1xf32>
    %63 = arith.addf %60, %62 : vector<8x1xf32>
    %cst_60 = arith.constant 0.000000e+00 : f32
    %64 = vector.broadcast %cst_60 : f32 to vector<8x1xf32>
    %65 = arith.subf %64, %57 : vector<8x1xf32>
    %66 = math.exp %65 : vector<8x1xf32>
    %cst_61 = arith.constant 1.000000e+00 : f32
    %67 = vector.broadcast %cst_61 : f32 to vector<8x1xf32>
    %68 = arith.addf %67, %66 : vector<8x1xf32>
    %cst_62 = arith.constant 1.000000e+00 : f32
    %69 = vector.broadcast %cst_62 : f32 to vector<8x1xf32>
    %70 = arith.divf %69, %68 : vector<8x1xf32>
    %cst_63 = arith.constant 0.000000e+00 : f32
    %71 = vector.broadcast %cst_63 : f32 to vector<8x1xf32>
    %72 = arith.subf %71, %63 : vector<8x1xf32>
    %73 = math.exp %72 : vector<8x1xf32>
    %cst_64 = arith.constant 1.000000e+00 : f32
    %74 = vector.broadcast %cst_64 : f32 to vector<8x1xf32>
    %75 = arith.addf %74, %73 : vector<8x1xf32>
    %cst_65 = arith.constant 1.000000e+00 : f32
    %76 = vector.broadcast %cst_65 : f32 to vector<8x1xf32>
    %77 = arith.divf %76, %75 : vector<8x1xf32>
    %78 = arith.mulf %70, %77 : vector<8x1xf32>
    %cst_66 = arith.constant 2.000000e-01 : f32
    %79 = vector.broadcast %cst_66 : f32 to vector<8x1xf32>
    %80 = arith.subf %78, %79 : vector<8x1xf32>
    %cst_67 = arith.constant 2.000000e+00 : f32
    %81 = vector.broadcast %cst_67 : f32 to vector<8x1xf32>
    %82 = arith.mulf %80, %81 : vector<8x1xf32>
    %cst_68 = arith.constant 0.000000e+00 : f32
    %83 = vector.broadcast %cst_68 : f32 to vector<8x1xf32>
    %84 = arith.subf %83, %82 : vector<8x1xf32>
    %85 = math.exp %84 : vector<8x1xf32>
    %cst_69 = arith.constant 1.000000e+00 : f32
    %86 = vector.broadcast %cst_69 : f32 to vector<8x1xf32>
    %87 = arith.addf %86, %85 : vector<8x1xf32>
    %cst_70 = arith.constant 1.000000e+00 : f32
    %88 = vector.broadcast %cst_70 : f32 to vector<8x1xf32>
    %89 = arith.divf %88, %87 : vector<8x1xf32>
    %90 = vector.broadcast %89 : vector<8x1xf32> to vector<8x81xf32>
    %91 = arith.mulf %41, %90 : vector<8x81xf32>
    %c0_71 = arith.constant 0 : index
    %c0_72 = arith.constant 0 : index
    %92 = vector.load %arg8[%c0_71, %c0_72] : memref<16x8xf32, #tpu.memory_space<vmem>>, vector<16x8xf32>
    %cst_73 = arith.constant dense<0.000000e+00> : vector<16x81xf32>
    %93 = tpu.matmul %92, %91, %cst_73 {dimension_numbers = #tpu.dot_dimension_numbers<[1], [0], [0], [1], [0, 0, 1, 1], [], []>} : vector<16x8xf32>, vector<8x81xf32>, vector<16x81xf32> -> vector<16x81xf32>
    %c0_74 = arith.constant 0 : index
    %c0_75 = arith.constant 0 : index
    %c0_76 = arith.constant 0 : index
    %94 = vector.load %arg10[%c0_74, %c0_75, %c0_76] : memref<4x16x1xf32, #tpu.memory_space<vmem>>, vector<1x16x1xf32>
    %95 = vector.shape_cast %94 : vector<1x16x1xf32> to vector<16x1xf32>
    %96 = vector.broadcast %95 : vector<16x1xf32> to vector<16x81xf32>
    %97 = arith.addf %93, %96 : vector<16x81xf32>
    %cst_77 = arith.constant dense<0.000000e+00> : vector<16xf32>
    %98 = vector.multi_reduction <add>, %97, %cst_77 [1] : vector<16x81xf32> to vector<16xf32>
    %99 = vector.shape_cast %98 : vector<16xf32> to vector<16x1xf32>
    %cst_78 = arith.constant 0.0123456791 : f32
    %100 = vector.broadcast %cst_78 : f32 to vector<16x1xf32>
    %101 = arith.mulf %99, %100 : vector<16x1xf32>
    %102 = vector.broadcast %0 : vector<1x81xf32> to vector<16x81xf32>
    %103 = arith.mulf %97, %102 : vector<16x81xf32>
    %cst_79 = arith.constant dense<0.000000e+00> : vector<16xf32>
    %104 = vector.multi_reduction <add>, %103, %cst_79 [1] : vector<16x81xf32> to vector<16xf32>
    %105 = vector.shape_cast %104 : vector<16xf32> to vector<16x1xf32>
    %cst_80 = arith.constant 0.0123456791 : f32
    %106 = vector.broadcast %cst_80 : f32 to vector<16x1xf32>
    %107 = arith.mulf %105, %106 : vector<16x1xf32>
    %c0_81 = arith.constant 0 : index
    %c0_82 = arith.constant 0 : index
    %c0_83 = arith.constant 0 : index
    %108 = vector.load %arg5[%c0_81, %c0_82, %c0_83] : memref<4x16x16xf32, #tpu.memory_space<vmem>>, vector<1x16x16xf32>
    %109 = vector.shape_cast %108 : vector<1x16x16xf32> to vector<16x16xf32>
    %cst_84 = arith.constant dense<0.000000e+00> : vector<16x1xf32>
    %110 = tpu.matmul %109, %101, %cst_84 {dimension_numbers = #tpu.dot_dimension_numbers<[1], [0], [0], [1], [0, 0, 1, 1], [], []>} : vector<16x16xf32>, vector<16x1xf32>, vector<16x1xf32> -> vector<16x1xf32>
    %c0_85 = arith.constant 0 : index
    %c0_86 = arith.constant 0 : index
    %c0_87 = arith.constant 0 : index
    %111 = vector.load %arg7[%c0_85, %c0_86, %c0_87] : memref<4x16x1xf32, #tpu.memory_space<vmem>>, vector<1x16x1xf32>
    %112 = vector.shape_cast %111 : vector<1x16x1xf32> to vector<16x1xf32>
    %113 = arith.addf %110, %112 : vector<16x1xf32>
    %c1_88 = arith.constant 1 : index
    %c0_89 = arith.constant 0 : index
    %c0_90 = arith.constant 0 : index
    %114 = vector.load %arg5[%c1_88, %c0_89, %c0_90] : memref<4x16x16xf32, #tpu.memory_space<vmem>>, vector<1x16x16xf32>
    %115 = vector.shape_cast %114 : vector<1x16x16xf32> to vector<16x16xf32>
    %cst_91 = arith.constant dense<0.000000e+00> : vector<16x1xf32>
    %116 = tpu.matmul %115, %107, %cst_91 {dimension_numbers = #tpu.dot_dimension_numbers<[1], [0], [0], [1], [0, 0, 1, 1], [], []>} : vector<16x16xf32>, vector<16x1xf32>, vector<16x1xf32> -> vector<16x1xf32>
    %c1_92 = arith.constant 1 : index
    %c0_93 = arith.constant 0 : index
    %c0_94 = arith.constant 0 : index
    %117 = vector.load %arg7[%c1_92, %c0_93, %c0_94] : memref<4x16x1xf32, #tpu.memory_space<vmem>>, vector<1x16x1xf32>
    %118 = vector.shape_cast %117 : vector<1x16x1xf32> to vector<16x1xf32>
    %119 = arith.addf %116, %118 : vector<16x1xf32>
    %cst_95 = arith.constant 0.000000e+00 : f32
    %120 = vector.broadcast %cst_95 : f32 to vector<16x1xf32>
    %121 = arith.subf %120, %113 : vector<16x1xf32>
    %122 = math.exp %121 : vector<16x1xf32>
    %cst_96 = arith.constant 1.000000e+00 : f32
    %123 = vector.broadcast %cst_96 : f32 to vector<16x1xf32>
    %124 = arith.addf %123, %122 : vector<16x1xf32>
    %cst_97 = arith.constant 1.000000e+00 : f32
    %125 = vector.broadcast %cst_97 : f32 to vector<16x1xf32>
    %126 = arith.divf %125, %124 : vector<16x1xf32>
    %cst_98 = arith.constant 0.000000e+00 : f32
    %127 = vector.broadcast %cst_98 : f32 to vector<16x1xf32>
    %128 = arith.subf %127, %119 : vector<16x1xf32>
    %129 = math.exp %128 : vector<16x1xf32>
    %cst_99 = arith.constant 1.000000e+00 : f32
    %130 = vector.broadcast %cst_99 : f32 to vector<16x1xf32>
    %131 = arith.addf %130, %129 : vector<16x1xf32>
    %cst_100 = arith.constant 1.000000e+00 : f32
    %132 = vector.broadcast %cst_100 : f32 to vector<16x1xf32>
    %133 = arith.divf %132, %131 : vector<16x1xf32>
    %134 = arith.mulf %126, %133 : vector<16x1xf32>
    %cst_101 = arith.constant 2.000000e-01 : f32
    %135 = vector.broadcast %cst_101 : f32 to vector<16x1xf32>
    %136 = arith.subf %134, %135 : vector<16x1xf32>
    %cst_102 = arith.constant 2.000000e+00 : f32
    %137 = vector.broadcast %cst_102 : f32 to vector<16x1xf32>
    %138 = arith.mulf %136, %137 : vector<16x1xf32>
    %cst_103 = arith.constant 0.000000e+00 : f32
    %139 = vector.broadcast %cst_103 : f32 to vector<16x1xf32>
    %140 = arith.subf %139, %138 : vector<16x1xf32>
    %141 = math.exp %140 : vector<16x1xf32>
    %cst_104 = arith.constant 1.000000e+00 : f32
    %142 = vector.broadcast %cst_104 : f32 to vector<16x1xf32>
    %143 = arith.addf %142, %141 : vector<16x1xf32>
    %cst_105 = arith.constant 1.000000e+00 : f32
    %144 = vector.broadcast %cst_105 : f32 to vector<16x1xf32>
    %145 = arith.divf %144, %143 : vector<16x1xf32>
    %146 = vector.broadcast %145 : vector<16x1xf32> to vector<16x81xf32>
    %147 = arith.mulf %97, %146 : vector<16x81xf32>
    %c1_106 = arith.constant 1 : index
    %c0_107 = arith.constant 0 : index
    %c0_108 = arith.constant 0 : index
    %148 = vector.load %arg0[%c1_106, %c0_107, %c0_108] : memref<2x8x81xf32, #tpu.memory_space<vmem>>, vector<1x8x81xf32>
    %149 = vector.shape_cast %148 : vector<1x8x81xf32> to vector<8x81xf32>
    %cst_109 = arith.constant dense<0.000000e+00> : vector<8x81xf32>
    %150 = tpu.matmul %149, %2, %cst_109 {dimension_numbers = #tpu.dot_dimension_numbers<[1], [0], [0], [1], [0, 0, 1, 1], [], []>} : vector<8x81xf32>, vector<81x81xf32>, vector<8x81xf32> -> vector<8x81xf32>
    %cst_110 = arith.constant dense<0.000000e+00> : vector<8x81xf32>
    %151 = tpu.matmul %149, %4, %cst_110 {dimension_numbers = #tpu.dot_dimension_numbers<[1], [0], [0], [1], [0, 0, 1, 1], [], []>} : vector<8x81xf32>, vector<81x81xf32>, vector<8x81xf32> -> vector<8x81xf32>
    %cst_111 = arith.constant dense<0.000000e+00> : vector<8x81xf32>
    %152 = tpu.matmul %149, %6, %cst_111 {dimension_numbers = #tpu.dot_dimension_numbers<[1], [0], [0], [1], [0, 0, 1, 1], [], []>} : vector<8x81xf32>, vector<81x81xf32>, vector<8x81xf32> -> vector<8x81xf32>
    %cst_112 = arith.constant dense<0.000000e+00> : vector<8x81xf32>
    %153 = tpu.matmul %149, %8, %cst_112 {dimension_numbers = #tpu.dot_dimension_numbers<[1], [0], [0], [1], [0, 0, 1, 1], [], []>} : vector<8x81xf32>, vector<81x81xf32>, vector<8x81xf32> -> vector<8x81xf32>
    %c0_113 = arith.constant 0 : index
    %c0_114 = arith.constant 0 : index
    %c0_115 = arith.constant 0 : index
    %154 = vector.load %arg3[%c0_113, %c0_114, %c0_115] : memref<5x8x8xf32, #tpu.memory_space<vmem>>, vector<1x8x8xf32>
    %155 = vector.shape_cast %154 : vector<1x8x8xf32> to vector<8x8xf32>
    %cst_116 = arith.constant dense<0.000000e+00> : vector<8x81xf32>
    %156 = tpu.matmul %155, %149, %cst_116 {dimension_numbers = #tpu.dot_dimension_numbers<[1], [0], [0], [1], [0, 0, 1, 1], [], []>} : vector<8x8xf32>, vector<8x81xf32>, vector<8x81xf32> -> vector<8x81xf32>
    %c1_117 = arith.constant 1 : index
    %c0_118 = arith.constant 0 : index
    %c0_119 = arith.constant 0 : index
    %157 = vector.load %arg3[%c1_117, %c0_118, %c0_119] : memref<5x8x8xf32, #tpu.memory_space<vmem>>, vector<1x8x8xf32>
    %158 = vector.shape_cast %157 : vector<1x8x8xf32> to vector<8x8xf32>
    %cst_120 = arith.constant dense<0.000000e+00> : vector<8x81xf32>
    %159 = tpu.matmul %158, %150, %cst_120 {dimension_numbers = #tpu.dot_dimension_numbers<[1], [0], [0], [1], [0, 0, 1, 1], [], []>} : vector<8x8xf32>, vector<8x81xf32>, vector<8x81xf32> -> vector<8x81xf32>
    %160 = arith.addf %156, %159 : vector<8x81xf32>
    %c2_121 = arith.constant 2 : index
    %c0_122 = arith.constant 0 : index
    %c0_123 = arith.constant 0 : index
    %161 = vector.load %arg3[%c2_121, %c0_122, %c0_123] : memref<5x8x8xf32, #tpu.memory_space<vmem>>, vector<1x8x8xf32>
    %162 = vector.shape_cast %161 : vector<1x8x8xf32> to vector<8x8xf32>
    %cst_124 = arith.constant dense<0.000000e+00> : vector<8x81xf32>
    %163 = tpu.matmul %162, %151, %cst_124 {dimension_numbers = #tpu.dot_dimension_numbers<[1], [0], [0], [1], [0, 0, 1, 1], [], []>} : vector<8x8xf32>, vector<8x81xf32>, vector<8x81xf32> -> vector<8x81xf32>
    %164 = arith.addf %160, %163 : vector<8x81xf32>
    %c3_125 = arith.constant 3 : index
    %c0_126 = arith.constant 0 : index
    %c0_127 = arith.constant 0 : index
    %165 = vector.load %arg3[%c3_125, %c0_126, %c0_127] : memref<5x8x8xf32, #tpu.memory_space<vmem>>, vector<1x8x8xf32>
    %166 = vector.shape_cast %165 : vector<1x8x8xf32> to vector<8x8xf32>
    %cst_128 = arith.constant dense<0.000000e+00> : vector<8x81xf32>
    %167 = tpu.matmul %166, %152, %cst_128 {dimension_numbers = #tpu.dot_dimension_numbers<[1], [0], [0], [1], [0, 0, 1, 1], [], []>} : vector<8x8xf32>, vector<8x81xf32>, vector<8x81xf32> -> vector<8x81xf32>
    %168 = arith.addf %164, %167 : vector<8x81xf32>
    %c4_129 = arith.constant 4 : index
    %c0_130 = arith.constant 0 : index
    %c0_131 = arith.constant 0 : index
    %169 = vector.load %arg3[%c4_129, %c0_130, %c0_131] : memref<5x8x8xf32, #tpu.memory_space<vmem>>, vector<1x8x8xf32>
    %170 = vector.shape_cast %169 : vector<1x8x8xf32> to vector<8x8xf32>
    %cst_132 = arith.constant dense<0.000000e+00> : vector<8x81xf32>
    %171 = tpu.matmul %170, %153, %cst_132 {dimension_numbers = #tpu.dot_dimension_numbers<[1], [0], [0], [1], [0, 0, 1, 1], [], []>} : vector<8x8xf32>, vector<8x81xf32>, vector<8x81xf32> -> vector<8x81xf32>
    %172 = arith.addf %168, %171 : vector<8x81xf32>
    %cst_133 = arith.constant dense<0.000000e+00> : vector<8x81xf32>
    %173 = tpu.matmul %149, %10, %cst_133 {dimension_numbers = #tpu.dot_dimension_numbers<[1], [0], [0], [1], [0, 0, 1, 1], [], []>} : vector<8x81xf32>, vector<81x81xf32>, vector<8x81xf32> -> vector<8x81xf32>
    %174 = arith.addf %172, %173 : vector<8x81xf32>
    %c0_134 = arith.constant 0 : index
    %c0_135 = arith.constant 0 : index
    %c0_136 = arith.constant 0 : index
    %175 = vector.load %arg12[%c0_134, %c0_135, %c0_136] : memref<4x8x1xf32, #tpu.memory_space<vmem>>, vector<1x8x1xf32>
    %176 = vector.shape_cast %175 : vector<1x8x1xf32> to vector<8x1xf32>
    %177 = vector.broadcast %176 : vector<8x1xf32> to vector<8x81xf32>
    %178 = arith.addf %174, %177 : vector<8x81xf32>
    %cst_137 = arith.constant dense<0.000000e+00> : vector<8xf32>
    %179 = vector.multi_reduction <add>, %178, %cst_137 [1] : vector<8x81xf32> to vector<8xf32>
    %180 = vector.shape_cast %179 : vector<8xf32> to vector<8x1xf32>
    %cst_138 = arith.constant 0.0123456791 : f32
    %181 = vector.broadcast %cst_138 : f32 to vector<8x1xf32>
    %182 = arith.mulf %180, %181 : vector<8x1xf32>
    %183 = vector.broadcast %0 : vector<1x81xf32> to vector<8x81xf32>
    %184 = arith.mulf %178, %183 : vector<8x81xf32>
    %cst_139 = arith.constant dense<0.000000e+00> : vector<8xf32>
    %185 = vector.multi_reduction <add>, %184, %cst_139 [1] : vector<8x81xf32> to vector<8xf32>
    %186 = vector.shape_cast %185 : vector<8xf32> to vector<8x1xf32>
    %cst_140 = arith.constant 0.0123456791 : f32
    %187 = vector.broadcast %cst_140 : f32 to vector<8x1xf32>
    %188 = arith.mulf %186, %187 : vector<8x1xf32>
    %c0_141 = arith.constant 0 : index
    %c0_142 = arith.constant 0 : index
    %c0_143 = arith.constant 0 : index
    %189 = vector.load %arg4[%c0_141, %c0_142, %c0_143] : memref<4x8x8xf32, #tpu.memory_space<vmem>>, vector<1x8x8xf32>
    %190 = vector.shape_cast %189 : vector<1x8x8xf32> to vector<8x8xf32>
    %cst_144 = arith.constant dense<0.000000e+00> : vector<8x1xf32>
    %191 = tpu.matmul %190, %182, %cst_144 {dimension_numbers = #tpu.dot_dimension_numbers<[1], [0], [0], [1], [0, 0, 1, 1], [], []>} : vector<8x8xf32>, vector<8x1xf32>, vector<8x1xf32> -> vector<8x1xf32>
    %c0_145 = arith.constant 0 : index
    %c0_146 = arith.constant 0 : index
    %c0_147 = arith.constant 0 : index
    %192 = vector.load %arg6[%c0_145, %c0_146, %c0_147] : memref<4x8x1xf32, #tpu.memory_space<vmem>>, vector<1x8x1xf32>
    %193 = vector.shape_cast %192 : vector<1x8x1xf32> to vector<8x1xf32>
    %194 = arith.addf %191, %193 : vector<8x1xf32>
    %c1_148 = arith.constant 1 : index
    %c0_149 = arith.constant 0 : index
    %c0_150 = arith.constant 0 : index
    %195 = vector.load %arg4[%c1_148, %c0_149, %c0_150] : memref<4x8x8xf32, #tpu.memory_space<vmem>>, vector<1x8x8xf32>
    %196 = vector.shape_cast %195 : vector<1x8x8xf32> to vector<8x8xf32>
    %cst_151 = arith.constant dense<0.000000e+00> : vector<8x1xf32>
    %197 = tpu.matmul %196, %188, %cst_151 {dimension_numbers = #tpu.dot_dimension_numbers<[1], [0], [0], [1], [0, 0, 1, 1], [], []>} : vector<8x8xf32>, vector<8x1xf32>, vector<8x1xf32> -> vector<8x1xf32>
    %c1_152 = arith.constant 1 : index
    %c0_153 = arith.constant 0 : index
    %c0_154 = arith.constant 0 : index
    %198 = vector.load %arg6[%c1_152, %c0_153, %c0_154] : memref<4x8x1xf32, #tpu.memory_space<vmem>>, vector<1x8x1xf32>
    %199 = vector.shape_cast %198 : vector<1x8x1xf32> to vector<8x1xf32>
    %200 = arith.addf %197, %199 : vector<8x1xf32>
    %cst_155 = arith.constant 0.000000e+00 : f32
    %201 = vector.broadcast %cst_155 : f32 to vector<8x1xf32>
    %202 = arith.subf %201, %194 : vector<8x1xf32>
    %203 = math.exp %202 : vector<8x1xf32>
    %cst_156 = arith.constant 1.000000e+00 : f32
    %204 = vector.broadcast %cst_156 : f32 to vector<8x1xf32>
    %205 = arith.addf %204, %203 : vector<8x1xf32>
    %cst_157 = arith.constant 1.000000e+00 : f32
    %206 = vector.broadcast %cst_157 : f32 to vector<8x1xf32>
    %207 = arith.divf %206, %205 : vector<8x1xf32>
    %cst_158 = arith.constant 0.000000e+00 : f32
    %208 = vector.broadcast %cst_158 : f32 to vector<8x1xf32>
    %209 = arith.subf %208, %200 : vector<8x1xf32>
    %210 = math.exp %209 : vector<8x1xf32>
    %cst_159 = arith.constant 1.000000e+00 : f32
    %211 = vector.broadcast %cst_159 : f32 to vector<8x1xf32>
    %212 = arith.addf %211, %210 : vector<8x1xf32>
    %cst_160 = arith.constant 1.000000e+00 : f32
    %213 = vector.broadcast %cst_160 : f32 to vector<8x1xf32>
    %214 = arith.divf %213, %212 : vector<8x1xf32>
    %215 = arith.mulf %207, %214 : vector<8x1xf32>
    %cst_161 = arith.constant 2.000000e-01 : f32
    %216 = vector.broadcast %cst_161 : f32 to vector<8x1xf32>
    %217 = arith.subf %215, %216 : vector<8x1xf32>
    %cst_162 = arith.constant 2.000000e+00 : f32
    %218 = vector.broadcast %cst_162 : f32 to vector<8x1xf32>
    %219 = arith.mulf %217, %218 : vector<8x1xf32>
    %cst_163 = arith.constant 0.000000e+00 : f32
    %220 = vector.broadcast %cst_163 : f32 to vector<8x1xf32>
    %221 = arith.subf %220, %219 : vector<8x1xf32>
    %222 = math.exp %221 : vector<8x1xf32>
    %cst_164 = arith.constant 1.000000e+00 : f32
    %223 = vector.broadcast %cst_164 : f32 to vector<8x1xf32>
    %224 = arith.addf %223, %222 : vector<8x1xf32>
    %cst_165 = arith.constant 1.000000e+00 : f32
    %225 = vector.broadcast %cst_165 : f32 to vector<8x1xf32>
    %226 = arith.divf %225, %224 : vector<8x1xf32>
    %227 = vector.broadcast %226 : vector<8x1xf32> to vector<8x81xf32>
    %228 = arith.mulf %178, %227 : vector<8x81xf32>
    %c0_166 = arith.constant 0 : index
    %c0_167 = arith.constant 0 : index
    %229 = vector.load %arg8[%c0_166, %c0_167] : memref<16x8xf32, #tpu.memory_space<vmem>>, vector<16x8xf32>
    %cst_168 = arith.constant dense<0.000000e+00> : vector<16x81xf32>
    %230 = tpu.matmul %229, %228, %cst_168 {dimension_numbers = #tpu.dot_dimension_numbers<[1], [0], [0], [1], [0, 0, 1, 1], [], []>} : vector<16x8xf32>, vector<8x81xf32>, vector<16x81xf32> -> vector<16x81xf32>
    %c0_169 = arith.constant 0 : index
    %c0_170 = arith.constant 0 : index
    %c0_171 = arith.constant 0 : index
    %231 = vector.load %arg10[%c0_169, %c0_170, %c0_171] : memref<4x16x1xf32, #tpu.memory_space<vmem>>, vector<1x16x1xf32>
    %232 = vector.shape_cast %231 : vector<1x16x1xf32> to vector<16x1xf32>
    %233 = vector.broadcast %232 : vector<16x1xf32> to vector<16x81xf32>
    %234 = arith.addf %230, %233 : vector<16x81xf32>
    %cst_172 = arith.constant dense<0.000000e+00> : vector<16xf32>
    %235 = vector.multi_reduction <add>, %234, %cst_172 [1] : vector<16x81xf32> to vector<16xf32>
    %236 = vector.shape_cast %235 : vector<16xf32> to vector<16x1xf32>
    %cst_173 = arith.constant 0.0123456791 : f32
    %237 = vector.broadcast %cst_173 : f32 to vector<16x1xf32>
    %238 = arith.mulf %236, %237 : vector<16x1xf32>
    %239 = vector.broadcast %0 : vector<1x81xf32> to vector<16x81xf32>
    %240 = arith.mulf %234, %239 : vector<16x81xf32>
    %cst_174 = arith.constant dense<0.000000e+00> : vector<16xf32>
    %241 = vector.multi_reduction <add>, %240, %cst_174 [1] : vector<16x81xf32> to vector<16xf32>
    %242 = vector.shape_cast %241 : vector<16xf32> to vector<16x1xf32>
    %cst_175 = arith.constant 0.0123456791 : f32
    %243 = vector.broadcast %cst_175 : f32 to vector<16x1xf32>
    %244 = arith.mulf %242, %243 : vector<16x1xf32>
    %c0_176 = arith.constant 0 : index
    %c0_177 = arith.constant 0 : index
    %c0_178 = arith.constant 0 : index
    %245 = vector.load %arg5[%c0_176, %c0_177, %c0_178] : memref<4x16x16xf32, #tpu.memory_space<vmem>>, vector<1x16x16xf32>
    %246 = vector.shape_cast %245 : vector<1x16x16xf32> to vector<16x16xf32>
    %cst_179 = arith.constant dense<0.000000e+00> : vector<16x1xf32>
    %247 = tpu.matmul %246, %238, %cst_179 {dimension_numbers = #tpu.dot_dimension_numbers<[1], [0], [0], [1], [0, 0, 1, 1], [], []>} : vector<16x16xf32>, vector<16x1xf32>, vector<16x1xf32> -> vector<16x1xf32>
    %c0_180 = arith.constant 0 : index
    %c0_181 = arith.constant 0 : index
    %c0_182 = arith.constant 0 : index
    %248 = vector.load %arg7[%c0_180, %c0_181, %c0_182] : memref<4x16x1xf32, #tpu.memory_space<vmem>>, vector<1x16x1xf32>
    %249 = vector.shape_cast %248 : vector<1x16x1xf32> to vector<16x1xf32>
    %250 = arith.addf %247, %249 : vector<16x1xf32>
    %c1_183 = arith.constant 1 : index
    %c0_184 = arith.constant 0 : index
    %c0_185 = arith.constant 0 : index
    %251 = vector.load %arg5[%c1_183, %c0_184, %c0_185] : memref<4x16x16xf32, #tpu.memory_space<vmem>>, vector<1x16x16xf32>
    %252 = vector.shape_cast %251 : vector<1x16x16xf32> to vector<16x16xf32>
    %cst_186 = arith.constant dense<0.000000e+00> : vector<16x1xf32>
    %253 = tpu.matmul %252, %244, %cst_186 {dimension_numbers = #tpu.dot_dimension_numbers<[1], [0], [0], [1], [0, 0, 1, 1], [], []>} : vector<16x16xf32>, vector<16x1xf32>, vector<16x1xf32> -> vector<16x1xf32>
    %c1_187 = arith.constant 1 : index
    %c0_188 = arith.constant 0 : index
    %c0_189 = arith.constant 0 : index
    %254 = vector.load %arg7[%c1_187, %c0_188, %c0_189] : memref<4x16x1xf32, #tpu.memory_space<vmem>>, vector<1x16x1xf32>
    %255 = vector.shape_cast %254 : vector<1x16x1xf32> to vector<16x1xf32>
    %256 = arith.addf %253, %255 : vector<16x1xf32>
    %cst_190 = arith.constant 0.000000e+00 : f32
    %257 = vector.broadcast %cst_190 : f32 to vector<16x1xf32>
    %258 = arith.subf %257, %250 : vector<16x1xf32>
    %259 = math.exp %258 : vector<16x1xf32>
    %cst_191 = arith.constant 1.000000e+00 : f32
    %260 = vector.broadcast %cst_191 : f32 to vector<16x1xf32>
    %261 = arith.addf %260, %259 : vector<16x1xf32>
    %cst_192 = arith.constant 1.000000e+00 : f32
    %262 = vector.broadcast %cst_192 : f32 to vector<16x1xf32>
    %263 = arith.divf %262, %261 : vector<16x1xf32>
    %cst_193 = arith.constant 0.000000e+00 : f32
    %264 = vector.broadcast %cst_193 : f32 to vector<16x1xf32>
    %265 = arith.subf %264, %256 : vector<16x1xf32>
    %266 = math.exp %265 : vector<16x1xf32>
    %cst_194 = arith.constant 1.000000e+00 : f32
    %267 = vector.broadcast %cst_194 : f32 to vector<16x1xf32>
    %268 = arith.addf %267, %266 : vector<16x1xf32>
    %cst_195 = arith.constant 1.000000e+00 : f32
    %269 = vector.broadcast %cst_195 : f32 to vector<16x1xf32>
    %270 = arith.divf %269, %268 : vector<16x1xf32>
    %271 = arith.mulf %263, %270 : vector<16x1xf32>
    %cst_196 = arith.constant 2.000000e-01 : f32
    %272 = vector.broadcast %cst_196 : f32 to vector<16x1xf32>
    %273 = arith.subf %271, %272 : vector<16x1xf32>
    %cst_197 = arith.constant 2.000000e+00 : f32
    %274 = vector.broadcast %cst_197 : f32 to vector<16x1xf32>
    %275 = arith.mulf %273, %274 : vector<16x1xf32>
    %cst_198 = arith.constant 0.000000e+00 : f32
    %276 = vector.broadcast %cst_198 : f32 to vector<16x1xf32>
    %277 = arith.subf %276, %275 : vector<16x1xf32>
    %278 = math.exp %277 : vector<16x1xf32>
    %cst_199 = arith.constant 1.000000e+00 : f32
    %279 = vector.broadcast %cst_199 : f32 to vector<16x1xf32>
    %280 = arith.addf %279, %278 : vector<16x1xf32>
    %cst_200 = arith.constant 1.000000e+00 : f32
    %281 = vector.broadcast %cst_200 : f32 to vector<16x1xf32>
    %282 = arith.divf %281, %280 : vector<16x1xf32>
    %283 = vector.broadcast %282 : vector<16x1xf32> to vector<16x81xf32>
    %284 = arith.mulf %234, %283 : vector<16x81xf32>
    %cst_201 = arith.constant dense<0.000000e+00> : vector<16xf32>
    %285 = vector.multi_reduction <add>, %147, %cst_201 [1] : vector<16x81xf32> to vector<16xf32>
    %286 = vector.shape_cast %285 : vector<16xf32> to vector<16x1xf32>
    %cst_202 = arith.constant dense<0.000000e+00> : vector<16xf32>
    %287 = vector.multi_reduction <add>, %284, %cst_202 [1] : vector<16x81xf32> to vector<16xf32>
    %288 = vector.shape_cast %287 : vector<16xf32> to vector<16x1xf32>
    %289 = arith.addf %286, %288 : vector<16x1xf32>
    %c0_203 = arith.constant 0 : index
    %c0_204 = arith.constant 0 : index
    %290 = vector.load %arg13[%c0_203, %c0_204] : memref<16x16xf32, #tpu.memory_space<vmem>>, vector<16x16xf32>
    %cst_205 = arith.constant dense<0.000000e+00> : vector<16x1xf32>
    %291 = tpu.matmul %290, %289, %cst_205 {dimension_numbers = #tpu.dot_dimension_numbers<[1], [0], [0], [1], [0, 0, 1, 1], [], []>} : vector<16x16xf32>, vector<16x1xf32>, vector<16x1xf32> -> vector<16x1xf32>
    %cst_206 = arith.constant 0.00617283955 : f32
    %292 = vector.broadcast %cst_206 : f32 to vector<16x1xf32>
    %293 = arith.mulf %291, %292 : vector<16x1xf32>
    %294 = vector.broadcast %293 : vector<16x1xf32> to vector<16x81xf32>
    %295 = arith.subf %147, %294 : vector<16x81xf32>
    %296 = arith.mulf %295, %295 : vector<16x81xf32>
    %cst_207 = arith.constant dense<0.000000e+00> : vector<16xf32>
    %297 = vector.multi_reduction <add>, %296, %cst_207 [1] : vector<16x81xf32> to vector<16xf32>
    %298 = vector.shape_cast %297 : vector<16xf32> to vector<16x1xf32>
    %299 = vector.broadcast %293 : vector<16x1xf32> to vector<16x81xf32>
    %300 = arith.subf %284, %299 : vector<16x81xf32>
    %301 = arith.mulf %300, %300 : vector<16x81xf32>
    %cst_208 = arith.constant dense<0.000000e+00> : vector<16xf32>
    %302 = vector.multi_reduction <add>, %301, %cst_208 [1] : vector<16x81xf32> to vector<16xf32>
    %303 = vector.shape_cast %302 : vector<16xf32> to vector<16x1xf32>
    %304 = arith.addf %298, %303 : vector<16x1xf32>
    %c0_209 = arith.constant 0 : index
    %c0_210 = arith.constant 0 : index
    %305 = vector.load %arg13[%c0_209, %c0_210] : memref<16x16xf32, #tpu.memory_space<vmem>>, vector<16x16xf32>
    %cst_211 = arith.constant dense<0.000000e+00> : vector<16x1xf32>
    %306 = tpu.matmul %305, %304, %cst_211 {dimension_numbers = #tpu.dot_dimension_numbers<[1], [0], [0], [1], [0, 0, 1, 1], [], []>} : vector<16x16xf32>, vector<16x1xf32>, vector<16x1xf32> -> vector<16x1xf32>
    %cst_212 = arith.constant 0.00617283955 : f32
    %307 = vector.broadcast %cst_212 : f32 to vector<16x1xf32>
    %308 = arith.mulf %306, %307 : vector<16x1xf32>
    %c2_213 = arith.constant 2 : index
    %c0_214 = arith.constant 0 : index
    %c0_215 = arith.constant 0 : index
    %309 = vector.load %arg10[%c2_213, %c0_214, %c0_215] : memref<4x16x1xf32, #tpu.memory_space<vmem>>, vector<1x16x1xf32>
    %310 = vector.shape_cast %309 : vector<1x16x1xf32> to vector<16x1xf32>
    %cst_216 = arith.constant 9.99999974E-6 : f32
    %311 = vector.broadcast %cst_216 : f32 to vector<16x1xf32>
    %312 = arith.addf %308, %311 : vector<16x1xf32>
    %313 = math.rsqrt %312 : vector<16x1xf32>
    %314 = arith.mulf %310, %313 : vector<16x1xf32>
    %c3_217 = arith.constant 3 : index
    %c0_218 = arith.constant 0 : index
    %c0_219 = arith.constant 0 : index
    %315 = vector.load %arg10[%c3_217, %c0_218, %c0_219] : memref<4x16x1xf32, #tpu.memory_space<vmem>>, vector<1x16x1xf32>
    %316 = vector.shape_cast %315 : vector<1x16x1xf32> to vector<16x1xf32>
    %317 = vector.broadcast %293 : vector<16x1xf32> to vector<16x81xf32>
    %318 = arith.subf %147, %317 : vector<16x81xf32>
    %319 = vector.broadcast %314 : vector<16x1xf32> to vector<16x81xf32>
    %320 = arith.mulf %318, %319 : vector<16x81xf32>
    %321 = vector.broadcast %316 : vector<16x1xf32> to vector<16x81xf32>
    %322 = arith.addf %320, %321 : vector<16x81xf32>
    %cst_220 = arith.constant 3.000000e+00 : f32
    %323 = vector.broadcast %cst_220 : f32 to vector<16x81xf32>
    %324 = arith.addf %322, %323 : vector<16x81xf32>
    %cst_221 = arith.constant 0.000000e+00 : f32
    %cst_222 = arith.constant 6.000000e+00 : f32
    %325 = vector.broadcast %cst_221 : f32 to vector<16x81xf32>
    %326 = arith.maximumf %325, %324 : vector<16x81xf32>
    %327 = vector.broadcast %cst_222 : f32 to vector<16x81xf32>
    %328 = arith.minimumf %327, %326 : vector<16x81xf32>
    %329 = arith.mulf %322, %328 : vector<16x81xf32>
    %cst_223 = arith.constant 0.166666672 : f32
    %330 = vector.broadcast %cst_223 : f32 to vector<16x81xf32>
    %331 = arith.mulf %329, %330 : vector<16x81xf32>
    %cst_224 = arith.constant dense<0.000000e+00> : vector<16x81xf32>
    %332 = tpu.matmul %331, %2, %cst_224 {dimension_numbers = #tpu.dot_dimension_numbers<[1], [0], [0], [1], [0, 0, 1, 1], [], []>} : vector<16x81xf32>, vector<81x81xf32>, vector<16x81xf32> -> vector<16x81xf32>
    %cst_225 = arith.constant dense<0.000000e+00> : vector<16x81xf32>
    %333 = tpu.matmul %331, %4, %cst_225 {dimension_numbers = #tpu.dot_dimension_numbers<[1], [0], [0], [1], [0, 0, 1, 1], [], []>} : vector<16x81xf32>, vector<81x81xf32>, vector<16x81xf32> -> vector<16x81xf32>
    %cst_226 = arith.constant dense<0.000000e+00> : vector<16x81xf32>
    %334 = tpu.matmul %331, %6, %cst_226 {dimension_numbers = #tpu.dot_dimension_numbers<[1], [0], [0], [1], [0, 0, 1, 1], [], []>} : vector<16x81xf32>, vector<81x81xf32>, vector<16x81xf32> -> vector<16x81xf32>
    %cst_227 = arith.constant dense<0.000000e+00> : vector<16x81xf32>
    %335 = tpu.matmul %331, %8, %cst_227 {dimension_numbers = #tpu.dot_dimension_numbers<[1], [0], [0], [1], [0, 0, 1, 1], [], []>} : vector<16x81xf32>, vector<81x81xf32>, vector<16x81xf32> -> vector<16x81xf32>
    %c0_228 = arith.constant 0 : index
    %c0_229 = arith.constant 0 : index
    %c0_230 = arith.constant 0 : index
    %336 = vector.load %arg11[%c0_228, %c0_229, %c0_230] : memref<5x16x1xf32, #tpu.memory_space<vmem>>, vector<1x16x1xf32>
    %337 = vector.shape_cast %336 : vector<1x16x1xf32> to vector<16x1xf32>
    %338 = vector.broadcast %337 : vector<16x1xf32> to vector<16x81xf32>
    %339 = arith.mulf %338, %334 : vector<16x81xf32>
    %c1_231 = arith.constant 1 : index
    %c0_232 = arith.constant 0 : index
    %c0_233 = arith.constant 0 : index
    %340 = vector.load %arg11[%c1_231, %c0_232, %c0_233] : memref<5x16x1xf32, #tpu.memory_space<vmem>>, vector<1x16x1xf32>
    %341 = vector.shape_cast %340 : vector<1x16x1xf32> to vector<16x1xf32>
    %342 = vector.broadcast %341 : vector<16x1xf32> to vector<16x81xf32>
    %343 = arith.mulf %342, %331 : vector<16x81xf32>
    %344 = arith.addf %339, %343 : vector<16x81xf32>
    %c2_234 = arith.constant 2 : index
    %c0_235 = arith.constant 0 : index
    %c0_236 = arith.constant 0 : index
    %345 = vector.load %arg11[%c2_234, %c0_235, %c0_236] : memref<5x16x1xf32, #tpu.memory_space<vmem>>, vector<1x16x1xf32>
    %346 = vector.shape_cast %345 : vector<1x16x1xf32> to vector<16x1xf32>
    %347 = vector.broadcast %346 : vector<16x1xf32> to vector<16x81xf32>
    %348 = arith.mulf %347, %335 : vector<16x81xf32>
    %349 = arith.addf %344, %348 : vector<16x81xf32>
    %c3_237 = arith.constant 3 : index
    %c0_238 = arith.constant 0 : index
    %c0_239 = arith.constant 0 : index
    %350 = vector.load %arg11[%c3_237, %c0_238, %c0_239] : memref<5x16x1xf32, #tpu.memory_space<vmem>>, vector<1x16x1xf32>
    %351 = vector.shape_cast %350 : vector<1x16x1xf32> to vector<16x1xf32>
    %352 = vector.broadcast %351 : vector<16x1xf32> to vector<16x81xf32>
    %353 = arith.mulf %352, %332 : vector<16x81xf32>
    %354 = arith.addf %349, %353 : vector<16x81xf32>
    %c4_240 = arith.constant 4 : index
    %c0_241 = arith.constant 0 : index
    %c0_242 = arith.constant 0 : index
    %355 = vector.load %arg11[%c4_240, %c0_241, %c0_242] : memref<5x16x1xf32, #tpu.memory_space<vmem>>, vector<1x16x1xf32>
    %356 = vector.shape_cast %355 : vector<1x16x1xf32> to vector<16x1xf32>
    %357 = vector.broadcast %356 : vector<16x1xf32> to vector<16x81xf32>
    %358 = arith.mulf %357, %333 : vector<16x81xf32>
    %359 = arith.addf %354, %358 : vector<16x81xf32>
    %c1_243 = arith.constant 1 : index
    %c0_244 = arith.constant 0 : index
    %c0_245 = arith.constant 0 : index
    %360 = vector.load %arg10[%c1_243, %c0_244, %c0_245] : memref<4x16x1xf32, #tpu.memory_space<vmem>>, vector<1x16x1xf32>
    %361 = vector.shape_cast %360 : vector<1x16x1xf32> to vector<16x1xf32>
    %362 = vector.broadcast %361 : vector<16x1xf32> to vector<16x81xf32>
    %363 = arith.addf %359, %362 : vector<16x81xf32>
    %cst_246 = arith.constant dense<0.000000e+00> : vector<16xf32>
    %364 = vector.multi_reduction <add>, %363, %cst_246 [1] : vector<16x81xf32> to vector<16xf32>
    %365 = vector.shape_cast %364 : vector<16xf32> to vector<16x1xf32>
    %cst_247 = arith.constant 0.0123456791 : f32
    %366 = vector.broadcast %cst_247 : f32 to vector<16x1xf32>
    %367 = arith.mulf %365, %366 : vector<16x1xf32>
    %368 = vector.broadcast %0 : vector<1x81xf32> to vector<16x81xf32>
    %369 = arith.mulf %363, %368 : vector<16x81xf32>
    %cst_248 = arith.constant dense<0.000000e+00> : vector<16xf32>
    %370 = vector.multi_reduction <add>, %369, %cst_248 [1] : vector<16x81xf32> to vector<16xf32>
    %371 = vector.shape_cast %370 : vector<16xf32> to vector<16x1xf32>
    %cst_249 = arith.constant 0.0123456791 : f32
    %372 = vector.broadcast %cst_249 : f32 to vector<16x1xf32>
    %373 = arith.mulf %371, %372 : vector<16x1xf32>
    %c2_250 = arith.constant 2 : index
    %c0_251 = arith.constant 0 : index
    %c0_252 = arith.constant 0 : index
    %374 = vector.load %arg5[%c2_250, %c0_251, %c0_252] : memref<4x16x16xf32, #tpu.memory_space<vmem>>, vector<1x16x16xf32>
    %375 = vector.shape_cast %374 : vector<1x16x16xf32> to vector<16x16xf32>
    %cst_253 = arith.constant dense<0.000000e+00> : vector<16x1xf32>
    %376 = tpu.matmul %375, %367, %cst_253 {dimension_numbers = #tpu.dot_dimension_numbers<[1], [0], [0], [1], [0, 0, 1, 1], [], []>} : vector<16x16xf32>, vector<16x1xf32>, vector<16x1xf32> -> vector<16x1xf32>
    %c2_254 = arith.constant 2 : index
    %c0_255 = arith.constant 0 : index
    %c0_256 = arith.constant 0 : index
    %377 = vector.load %arg7[%c2_254, %c0_255, %c0_256] : memref<4x16x1xf32, #tpu.memory_space<vmem>>, vector<1x16x1xf32>
    %378 = vector.shape_cast %377 : vector<1x16x1xf32> to vector<16x1xf32>
    %379 = arith.addf %376, %378 : vector<16x1xf32>
    %c3_257 = arith.constant 3 : index
    %c0_258 = arith.constant 0 : index
    %c0_259 = arith.constant 0 : index
    %380 = vector.load %arg5[%c3_257, %c0_258, %c0_259] : memref<4x16x16xf32, #tpu.memory_space<vmem>>, vector<1x16x16xf32>
    %381 = vector.shape_cast %380 : vector<1x16x16xf32> to vector<16x16xf32>
    %cst_260 = arith.constant dense<0.000000e+00> : vector<16x1xf32>
    %382 = tpu.matmul %381, %373, %cst_260 {dimension_numbers = #tpu.dot_dimension_numbers<[1], [0], [0], [1], [0, 0, 1, 1], [], []>} : vector<16x16xf32>, vector<16x1xf32>, vector<16x1xf32> -> vector<16x1xf32>
    %c3_261 = arith.constant 3 : index
    %c0_262 = arith.constant 0 : index
    %c0_263 = arith.constant 0 : index
    %383 = vector.load %arg7[%c3_261, %c0_262, %c0_263] : memref<4x16x1xf32, #tpu.memory_space<vmem>>, vector<1x16x1xf32>
    %384 = vector.shape_cast %383 : vector<1x16x1xf32> to vector<16x1xf32>
    %385 = arith.addf %382, %384 : vector<16x1xf32>
    %cst_264 = arith.constant 0.000000e+00 : f32
    %386 = vector.broadcast %cst_264 : f32 to vector<16x1xf32>
    %387 = arith.subf %386, %379 : vector<16x1xf32>
    %388 = math.exp %387 : vector<16x1xf32>
    %cst_265 = arith.constant 1.000000e+00 : f32
    %389 = vector.broadcast %cst_265 : f32 to vector<16x1xf32>
    %390 = arith.addf %389, %388 : vector<16x1xf32>
    %cst_266 = arith.constant 1.000000e+00 : f32
    %391 = vector.broadcast %cst_266 : f32 to vector<16x1xf32>
    %392 = arith.divf %391, %390 : vector<16x1xf32>
    %cst_267 = arith.constant 0.000000e+00 : f32
    %393 = vector.broadcast %cst_267 : f32 to vector<16x1xf32>
    %394 = arith.subf %393, %385 : vector<16x1xf32>
    %395 = math.exp %394 : vector<16x1xf32>
    %cst_268 = arith.constant 1.000000e+00 : f32
    %396 = vector.broadcast %cst_268 : f32 to vector<16x1xf32>
    %397 = arith.addf %396, %395 : vector<16x1xf32>
    %cst_269 = arith.constant 1.000000e+00 : f32
    %398 = vector.broadcast %cst_269 : f32 to vector<16x1xf32>
    %399 = arith.divf %398, %397 : vector<16x1xf32>
    %400 = arith.mulf %392, %399 : vector<16x1xf32>
    %cst_270 = arith.constant 2.000000e-01 : f32
    %401 = vector.broadcast %cst_270 : f32 to vector<16x1xf32>
    %402 = arith.subf %400, %401 : vector<16x1xf32>
    %cst_271 = arith.constant 2.000000e+00 : f32
    %403 = vector.broadcast %cst_271 : f32 to vector<16x1xf32>
    %404 = arith.mulf %402, %403 : vector<16x1xf32>
    %cst_272 = arith.constant 0.000000e+00 : f32
    %405 = vector.broadcast %cst_272 : f32 to vector<16x1xf32>
    %406 = arith.subf %405, %404 : vector<16x1xf32>
    %407 = math.exp %406 : vector<16x1xf32>
    %cst_273 = arith.constant 1.000000e+00 : f32
    %408 = vector.broadcast %cst_273 : f32 to vector<16x1xf32>
    %409 = arith.addf %408, %407 : vector<16x1xf32>
    %cst_274 = arith.constant 1.000000e+00 : f32
    %410 = vector.broadcast %cst_274 : f32 to vector<16x1xf32>
    %411 = arith.divf %410, %409 : vector<16x1xf32>
    %412 = vector.broadcast %411 : vector<16x1xf32> to vector<16x81xf32>
    %413 = arith.mulf %363, %412 : vector<16x81xf32>
    %c0_275 = arith.constant 0 : index
    %c0_276 = arith.constant 0 : index
    %414 = vector.load %arg9[%c0_275, %c0_276] : memref<8x16xf32, #tpu.memory_space<vmem>>, vector<8x16xf32>
    %cst_277 = arith.constant dense<0.000000e+00> : vector<8x81xf32>
    %415 = tpu.matmul %414, %413, %cst_277 {dimension_numbers = #tpu.dot_dimension_numbers<[1], [0], [0], [1], [0, 0, 1, 1], [], []>} : vector<8x16xf32>, vector<16x81xf32>, vector<8x81xf32> -> vector<8x81xf32>
    %c1_278 = arith.constant 1 : index
    %c0_279 = arith.constant 0 : index
    %c0_280 = arith.constant 0 : index
    %416 = vector.load %arg12[%c1_278, %c0_279, %c0_280] : memref<4x8x1xf32, #tpu.memory_space<vmem>>, vector<1x8x1xf32>
    %417 = vector.shape_cast %416 : vector<1x8x1xf32> to vector<8x1xf32>
    %418 = vector.broadcast %417 : vector<8x1xf32> to vector<8x81xf32>
    %419 = arith.addf %415, %418 : vector<8x81xf32>
    %cst_281 = arith.constant dense<0.000000e+00> : vector<8xf32>
    %420 = vector.multi_reduction <add>, %419, %cst_281 [1] : vector<8x81xf32> to vector<8xf32>
    %421 = vector.shape_cast %420 : vector<8xf32> to vector<8x1xf32>
    %cst_282 = arith.constant 0.0123456791 : f32
    %422 = vector.broadcast %cst_282 : f32 to vector<8x1xf32>
    %423 = arith.mulf %421, %422 : vector<8x1xf32>
    %424 = vector.broadcast %0 : vector<1x81xf32> to vector<8x81xf32>
    %425 = arith.mulf %419, %424 : vector<8x81xf32>
    %cst_283 = arith.constant dense<0.000000e+00> : vector<8xf32>
    %426 = vector.multi_reduction <add>, %425, %cst_283 [1] : vector<8x81xf32> to vector<8xf32>
    %427 = vector.shape_cast %426 : vector<8xf32> to vector<8x1xf32>
    %cst_284 = arith.constant 0.0123456791 : f32
    %428 = vector.broadcast %cst_284 : f32 to vector<8x1xf32>
    %429 = arith.mulf %427, %428 : vector<8x1xf32>
    %c2_285 = arith.constant 2 : index
    %c0_286 = arith.constant 0 : index
    %c0_287 = arith.constant 0 : index
    %430 = vector.load %arg4[%c2_285, %c0_286, %c0_287] : memref<4x8x8xf32, #tpu.memory_space<vmem>>, vector<1x8x8xf32>
    %431 = vector.shape_cast %430 : vector<1x8x8xf32> to vector<8x8xf32>
    %cst_288 = arith.constant dense<0.000000e+00> : vector<8x1xf32>
    %432 = tpu.matmul %431, %423, %cst_288 {dimension_numbers = #tpu.dot_dimension_numbers<[1], [0], [0], [1], [0, 0, 1, 1], [], []>} : vector<8x8xf32>, vector<8x1xf32>, vector<8x1xf32> -> vector<8x1xf32>
    %c2_289 = arith.constant 2 : index
    %c0_290 = arith.constant 0 : index
    %c0_291 = arith.constant 0 : index
    %433 = vector.load %arg6[%c2_289, %c0_290, %c0_291] : memref<4x8x1xf32, #tpu.memory_space<vmem>>, vector<1x8x1xf32>
    %434 = vector.shape_cast %433 : vector<1x8x1xf32> to vector<8x1xf32>
    %435 = arith.addf %432, %434 : vector<8x1xf32>
    %c3_292 = arith.constant 3 : index
    %c0_293 = arith.constant 0 : index
    %c0_294 = arith.constant 0 : index
    %436 = vector.load %arg4[%c3_292, %c0_293, %c0_294] : memref<4x8x8xf32, #tpu.memory_space<vmem>>, vector<1x8x8xf32>
    %437 = vector.shape_cast %436 : vector<1x8x8xf32> to vector<8x8xf32>
    %cst_295 = arith.constant dense<0.000000e+00> : vector<8x1xf32>
    %438 = tpu.matmul %437, %429, %cst_295 {dimension_numbers = #tpu.dot_dimension_numbers<[1], [0], [0], [1], [0, 0, 1, 1], [], []>} : vector<8x8xf32>, vector<8x1xf32>, vector<8x1xf32> -> vector<8x1xf32>
    %c3_296 = arith.constant 3 : index
    %c0_297 = arith.constant 0 : index
    %c0_298 = arith.constant 0 : index
    %439 = vector.load %arg6[%c3_296, %c0_297, %c0_298] : memref<4x8x1xf32, #tpu.memory_space<vmem>>, vector<1x8x1xf32>
    %440 = vector.shape_cast %439 : vector<1x8x1xf32> to vector<8x1xf32>
    %441 = arith.addf %438, %440 : vector<8x1xf32>
    %cst_299 = arith.constant 0.000000e+00 : f32
    %442 = vector.broadcast %cst_299 : f32 to vector<8x1xf32>
    %443 = arith.subf %442, %435 : vector<8x1xf32>
    %444 = math.exp %443 : vector<8x1xf32>
    %cst_300 = arith.constant 1.000000e+00 : f32
    %445 = vector.broadcast %cst_300 : f32 to vector<8x1xf32>
    %446 = arith.addf %445, %444 : vector<8x1xf32>
    %cst_301 = arith.constant 1.000000e+00 : f32
    %447 = vector.broadcast %cst_301 : f32 to vector<8x1xf32>
    %448 = arith.divf %447, %446 : vector<8x1xf32>
    %cst_302 = arith.constant 0.000000e+00 : f32
    %449 = vector.broadcast %cst_302 : f32 to vector<8x1xf32>
    %450 = arith.subf %449, %441 : vector<8x1xf32>
    %451 = math.exp %450 : vector<8x1xf32>
    %cst_303 = arith.constant 1.000000e+00 : f32
    %452 = vector.broadcast %cst_303 : f32 to vector<8x1xf32>
    %453 = arith.addf %452, %451 : vector<8x1xf32>
    %cst_304 = arith.constant 1.000000e+00 : f32
    %454 = vector.broadcast %cst_304 : f32 to vector<8x1xf32>
    %455 = arith.divf %454, %453 : vector<8x1xf32>
    %456 = arith.mulf %448, %455 : vector<8x1xf32>
    %cst_305 = arith.constant 2.000000e-01 : f32
    %457 = vector.broadcast %cst_305 : f32 to vector<8x1xf32>
    %458 = arith.subf %456, %457 : vector<8x1xf32>
    %cst_306 = arith.constant 2.000000e+00 : f32
    %459 = vector.broadcast %cst_306 : f32 to vector<8x1xf32>
    %460 = arith.mulf %458, %459 : vector<8x1xf32>
    %cst_307 = arith.constant 0.000000e+00 : f32
    %461 = vector.broadcast %cst_307 : f32 to vector<8x1xf32>
    %462 = arith.subf %461, %460 : vector<8x1xf32>
    %463 = math.exp %462 : vector<8x1xf32>
    %cst_308 = arith.constant 1.000000e+00 : f32
    %464 = vector.broadcast %cst_308 : f32 to vector<8x1xf32>
    %465 = arith.addf %464, %463 : vector<8x1xf32>
    %cst_309 = arith.constant 1.000000e+00 : f32
    %466 = vector.broadcast %cst_309 : f32 to vector<8x1xf32>
    %467 = arith.divf %466, %465 : vector<8x1xf32>
    %468 = vector.broadcast %467 : vector<8x1xf32> to vector<8x81xf32>
    %469 = arith.mulf %419, %468 : vector<8x81xf32>
    %470 = vector.broadcast %293 : vector<16x1xf32> to vector<16x81xf32>
    %471 = arith.subf %284, %470 : vector<16x81xf32>
    %472 = vector.broadcast %314 : vector<16x1xf32> to vector<16x81xf32>
    %473 = arith.mulf %471, %472 : vector<16x81xf32>
    %474 = vector.broadcast %316 : vector<16x1xf32> to vector<16x81xf32>
    %475 = arith.addf %473, %474 : vector<16x81xf32>
    %cst_310 = arith.constant 3.000000e+00 : f32
    %476 = vector.broadcast %cst_310 : f32 to vector<16x81xf32>
    %477 = arith.addf %475, %476 : vector<16x81xf32>
    %cst_311 = arith.constant 0.000000e+00 : f32
    %cst_312 = arith.constant 6.000000e+00 : f32
    %478 = vector.broadcast %cst_311 : f32 to vector<16x81xf32>
    %479 = arith.maximumf %478, %477 : vector<16x81xf32>
    %480 = vector.broadcast %cst_312 : f32 to vector<16x81xf32>
    %481 = arith.minimumf %480, %479 : vector<16x81xf32>
    %482 = arith.mulf %475, %481 : vector<16x81xf32>
    %cst_313 = arith.constant 0.166666672 : f32
    %483 = vector.broadcast %cst_313 : f32 to vector<16x81xf32>
    %484 = arith.mulf %482, %483 : vector<16x81xf32>
    %cst_314 = arith.constant dense<0.000000e+00> : vector<16x81xf32>
    %485 = tpu.matmul %484, %2, %cst_314 {dimension_numbers = #tpu.dot_dimension_numbers<[1], [0], [0], [1], [0, 0, 1, 1], [], []>} : vector<16x81xf32>, vector<81x81xf32>, vector<16x81xf32> -> vector<16x81xf32>
    %cst_315 = arith.constant dense<0.000000e+00> : vector<16x81xf32>
    %486 = tpu.matmul %484, %4, %cst_315 {dimension_numbers = #tpu.dot_dimension_numbers<[1], [0], [0], [1], [0, 0, 1, 1], [], []>} : vector<16x81xf32>, vector<81x81xf32>, vector<16x81xf32> -> vector<16x81xf32>
    %cst_316 = arith.constant dense<0.000000e+00> : vector<16x81xf32>
    %487 = tpu.matmul %484, %6, %cst_316 {dimension_numbers = #tpu.dot_dimension_numbers<[1], [0], [0], [1], [0, 0, 1, 1], [], []>} : vector<16x81xf32>, vector<81x81xf32>, vector<16x81xf32> -> vector<16x81xf32>
    %cst_317 = arith.constant dense<0.000000e+00> : vector<16x81xf32>
    %488 = tpu.matmul %484, %8, %cst_317 {dimension_numbers = #tpu.dot_dimension_numbers<[1], [0], [0], [1], [0, 0, 1, 1], [], []>} : vector<16x81xf32>, vector<81x81xf32>, vector<16x81xf32> -> vector<16x81xf32>
    %c0_318 = arith.constant 0 : index
    %c0_319 = arith.constant 0 : index
    %c0_320 = arith.constant 0 : index
    %489 = vector.load %arg11[%c0_318, %c0_319, %c0_320] : memref<5x16x1xf32, #tpu.memory_space<vmem>>, vector<1x16x1xf32>
    %490 = vector.shape_cast %489 : vector<1x16x1xf32> to vector<16x1xf32>
    %491 = vector.broadcast %490 : vector<16x1xf32> to vector<16x81xf32>
    %492 = arith.mulf %491, %487 : vector<16x81xf32>
    %c1_321 = arith.constant 1 : index
    %c0_322 = arith.constant 0 : index
    %c0_323 = arith.constant 0 : index
    %493 = vector.load %arg11[%c1_321, %c0_322, %c0_323] : memref<5x16x1xf32, #tpu.memory_space<vmem>>, vector<1x16x1xf32>
    %494 = vector.shape_cast %493 : vector<1x16x1xf32> to vector<16x1xf32>
    %495 = vector.broadcast %494 : vector<16x1xf32> to vector<16x81xf32>
    %496 = arith.mulf %495, %484 : vector<16x81xf32>
    %497 = arith.addf %492, %496 : vector<16x81xf32>
    %c2_324 = arith.constant 2 : index
    %c0_325 = arith.constant 0 : index
    %c0_326 = arith.constant 0 : index
    %498 = vector.load %arg11[%c2_324, %c0_325, %c0_326] : memref<5x16x1xf32, #tpu.memory_space<vmem>>, vector<1x16x1xf32>
    %499 = vector.shape_cast %498 : vector<1x16x1xf32> to vector<16x1xf32>
    %500 = vector.broadcast %499 : vector<16x1xf32> to vector<16x81xf32>
    %501 = arith.mulf %500, %488 : vector<16x81xf32>
    %502 = arith.addf %497, %501 : vector<16x81xf32>
    %c3_327 = arith.constant 3 : index
    %c0_328 = arith.constant 0 : index
    %c0_329 = arith.constant 0 : index
    %503 = vector.load %arg11[%c3_327, %c0_328, %c0_329] : memref<5x16x1xf32, #tpu.memory_space<vmem>>, vector<1x16x1xf32>
    %504 = vector.shape_cast %503 : vector<1x16x1xf32> to vector<16x1xf32>
    %505 = vector.broadcast %504 : vector<16x1xf32> to vector<16x81xf32>
    %506 = arith.mulf %505, %485 : vector<16x81xf32>
    %507 = arith.addf %502, %506 : vector<16x81xf32>
    %c4_330 = arith.constant 4 : index
    %c0_331 = arith.constant 0 : index
    %c0_332 = arith.constant 0 : index
    %508 = vector.load %arg11[%c4_330, %c0_331, %c0_332] : memref<5x16x1xf32, #tpu.memory_space<vmem>>, vector<1x16x1xf32>
    %509 = vector.shape_cast %508 : vector<1x16x1xf32> to vector<16x1xf32>
    %510 = vector.broadcast %509 : vector<16x1xf32> to vector<16x81xf32>
    %511 = arith.mulf %510, %486 : vector<16x81xf32>
    %512 = arith.addf %507, %511 : vector<16x81xf32>
    %c1_333 = arith.constant 1 : index
    %c0_334 = arith.constant 0 : index
    %c0_335 = arith.constant 0 : index
    %513 = vector.load %arg10[%c1_333, %c0_334, %c0_335] : memref<4x16x1xf32, #tpu.memory_space<vmem>>, vector<1x16x1xf32>
    %514 = vector.shape_cast %513 : vector<1x16x1xf32> to vector<16x1xf32>
    %515 = vector.broadcast %514 : vector<16x1xf32> to vector<16x81xf32>
    %516 = arith.addf %512, %515 : vector<16x81xf32>
    %cst_336 = arith.constant dense<0.000000e+00> : vector<16xf32>
    %517 = vector.multi_reduction <add>, %516, %cst_336 [1] : vector<16x81xf32> to vector<16xf32>
    %518 = vector.shape_cast %517 : vector<16xf32> to vector<16x1xf32>
    %cst_337 = arith.constant 0.0123456791 : f32
    %519 = vector.broadcast %cst_337 : f32 to vector<16x1xf32>
    %520 = arith.mulf %518, %519 : vector<16x1xf32>
    %521 = vector.broadcast %0 : vector<1x81xf32> to vector<16x81xf32>
    %522 = arith.mulf %516, %521 : vector<16x81xf32>
    %cst_338 = arith.constant dense<0.000000e+00> : vector<16xf32>
    %523 = vector.multi_reduction <add>, %522, %cst_338 [1] : vector<16x81xf32> to vector<16xf32>
    %524 = vector.shape_cast %523 : vector<16xf32> to vector<16x1xf32>
    %cst_339 = arith.constant 0.0123456791 : f32
    %525 = vector.broadcast %cst_339 : f32 to vector<16x1xf32>
    %526 = arith.mulf %524, %525 : vector<16x1xf32>
    %c2_340 = arith.constant 2 : index
    %c0_341 = arith.constant 0 : index
    %c0_342 = arith.constant 0 : index
    %527 = vector.load %arg5[%c2_340, %c0_341, %c0_342] : memref<4x16x16xf32, #tpu.memory_space<vmem>>, vector<1x16x16xf32>
    %528 = vector.shape_cast %527 : vector<1x16x16xf32> to vector<16x16xf32>
    %cst_343 = arith.constant dense<0.000000e+00> : vector<16x1xf32>
    %529 = tpu.matmul %528, %520, %cst_343 {dimension_numbers = #tpu.dot_dimension_numbers<[1], [0], [0], [1], [0, 0, 1, 1], [], []>} : vector<16x16xf32>, vector<16x1xf32>, vector<16x1xf32> -> vector<16x1xf32>
    %c2_344 = arith.constant 2 : index
    %c0_345 = arith.constant 0 : index
    %c0_346 = arith.constant 0 : index
    %530 = vector.load %arg7[%c2_344, %c0_345, %c0_346] : memref<4x16x1xf32, #tpu.memory_space<vmem>>, vector<1x16x1xf32>
    %531 = vector.shape_cast %530 : vector<1x16x1xf32> to vector<16x1xf32>
    %532 = arith.addf %529, %531 : vector<16x1xf32>
    %c3_347 = arith.constant 3 : index
    %c0_348 = arith.constant 0 : index
    %c0_349 = arith.constant 0 : index
    %533 = vector.load %arg5[%c3_347, %c0_348, %c0_349] : memref<4x16x16xf32, #tpu.memory_space<vmem>>, vector<1x16x16xf32>
    %534 = vector.shape_cast %533 : vector<1x16x16xf32> to vector<16x16xf32>
    %cst_350 = arith.constant dense<0.000000e+00> : vector<16x1xf32>
    %535 = tpu.matmul %534, %526, %cst_350 {dimension_numbers = #tpu.dot_dimension_numbers<[1], [0], [0], [1], [0, 0, 1, 1], [], []>} : vector<16x16xf32>, vector<16x1xf32>, vector<16x1xf32> -> vector<16x1xf32>
    %c3_351 = arith.constant 3 : index
    %c0_352 = arith.constant 0 : index
    %c0_353 = arith.constant 0 : index
    %536 = vector.load %arg7[%c3_351, %c0_352, %c0_353] : memref<4x16x1xf32, #tpu.memory_space<vmem>>, vector<1x16x1xf32>
    %537 = vector.shape_cast %536 : vector<1x16x1xf32> to vector<16x1xf32>
    %538 = arith.addf %535, %537 : vector<16x1xf32>
    %cst_354 = arith.constant 0.000000e+00 : f32
    %539 = vector.broadcast %cst_354 : f32 to vector<16x1xf32>
    %540 = arith.subf %539, %532 : vector<16x1xf32>
    %541 = math.exp %540 : vector<16x1xf32>
    %cst_355 = arith.constant 1.000000e+00 : f32
    %542 = vector.broadcast %cst_355 : f32 to vector<16x1xf32>
    %543 = arith.addf %542, %541 : vector<16x1xf32>
    %cst_356 = arith.constant 1.000000e+00 : f32
    %544 = vector.broadcast %cst_356 : f32 to vector<16x1xf32>
    %545 = arith.divf %544, %543 : vector<16x1xf32>
    %cst_357 = arith.constant 0.000000e+00 : f32
    %546 = vector.broadcast %cst_357 : f32 to vector<16x1xf32>
    %547 = arith.subf %546, %538 : vector<16x1xf32>
    %548 = math.exp %547 : vector<16x1xf32>
    %cst_358 = arith.constant 1.000000e+00 : f32
    %549 = vector.broadcast %cst_358 : f32 to vector<16x1xf32>
    %550 = arith.addf %549, %548 : vector<16x1xf32>
    %cst_359 = arith.constant 1.000000e+00 : f32
    %551 = vector.broadcast %cst_359 : f32 to vector<16x1xf32>
    %552 = arith.divf %551, %550 : vector<16x1xf32>
    %553 = arith.mulf %545, %552 : vector<16x1xf32>
    %cst_360 = arith.constant 2.000000e-01 : f32
    %554 = vector.broadcast %cst_360 : f32 to vector<16x1xf32>
    %555 = arith.subf %553, %554 : vector<16x1xf32>
    %cst_361 = arith.constant 2.000000e+00 : f32
    %556 = vector.broadcast %cst_361 : f32 to vector<16x1xf32>
    %557 = arith.mulf %555, %556 : vector<16x1xf32>
    %cst_362 = arith.constant 0.000000e+00 : f32
    %558 = vector.broadcast %cst_362 : f32 to vector<16x1xf32>
    %559 = arith.subf %558, %557 : vector<16x1xf32>
    %560 = math.exp %559 : vector<16x1xf32>
    %cst_363 = arith.constant 1.000000e+00 : f32
    %561 = vector.broadcast %cst_363 : f32 to vector<16x1xf32>
    %562 = arith.addf %561, %560 : vector<16x1xf32>
    %cst_364 = arith.constant 1.000000e+00 : f32
    %563 = vector.broadcast %cst_364 : f32 to vector<16x1xf32>
    %564 = arith.divf %563, %562 : vector<16x1xf32>
    %565 = vector.broadcast %564 : vector<16x1xf32> to vector<16x81xf32>
    %566 = arith.mulf %516, %565 : vector<16x81xf32>
    %c0_365 = arith.constant 0 : index
    %c0_366 = arith.constant 0 : index
    %567 = vector.load %arg9[%c0_365, %c0_366] : memref<8x16xf32, #tpu.memory_space<vmem>>, vector<8x16xf32>
    %cst_367 = arith.constant dense<0.000000e+00> : vector<8x81xf32>
    %568 = tpu.matmul %567, %566, %cst_367 {dimension_numbers = #tpu.dot_dimension_numbers<[1], [0], [0], [1], [0, 0, 1, 1], [], []>} : vector<8x16xf32>, vector<16x81xf32>, vector<8x81xf32> -> vector<8x81xf32>
    %c1_368 = arith.constant 1 : index
    %c0_369 = arith.constant 0 : index
    %c0_370 = arith.constant 0 : index
    %569 = vector.load %arg12[%c1_368, %c0_369, %c0_370] : memref<4x8x1xf32, #tpu.memory_space<vmem>>, vector<1x8x1xf32>
    %570 = vector.shape_cast %569 : vector<1x8x1xf32> to vector<8x1xf32>
    %571 = vector.broadcast %570 : vector<8x1xf32> to vector<8x81xf32>
    %572 = arith.addf %568, %571 : vector<8x81xf32>
    %cst_371 = arith.constant dense<0.000000e+00> : vector<8xf32>
    %573 = vector.multi_reduction <add>, %572, %cst_371 [1] : vector<8x81xf32> to vector<8xf32>
    %574 = vector.shape_cast %573 : vector<8xf32> to vector<8x1xf32>
    %cst_372 = arith.constant 0.0123456791 : f32
    %575 = vector.broadcast %cst_372 : f32 to vector<8x1xf32>
    %576 = arith.mulf %574, %575 : vector<8x1xf32>
    %577 = vector.broadcast %0 : vector<1x81xf32> to vector<8x81xf32>
    %578 = arith.mulf %572, %577 : vector<8x81xf32>
    %cst_373 = arith.constant dense<0.000000e+00> : vector<8xf32>
    %579 = vector.multi_reduction <add>, %578, %cst_373 [1] : vector<8x81xf32> to vector<8xf32>
    %580 = vector.shape_cast %579 : vector<8xf32> to vector<8x1xf32>
    %cst_374 = arith.constant 0.0123456791 : f32
    %581 = vector.broadcast %cst_374 : f32 to vector<8x1xf32>
    %582 = arith.mulf %580, %581 : vector<8x1xf32>
    %c2_375 = arith.constant 2 : index
    %c0_376 = arith.constant 0 : index
    %c0_377 = arith.constant 0 : index
    %583 = vector.load %arg4[%c2_375, %c0_376, %c0_377] : memref<4x8x8xf32, #tpu.memory_space<vmem>>, vector<1x8x8xf32>
    %584 = vector.shape_cast %583 : vector<1x8x8xf32> to vector<8x8xf32>
    %cst_378 = arith.constant dense<0.000000e+00> : vector<8x1xf32>
    %585 = tpu.matmul %584, %576, %cst_378 {dimension_numbers = #tpu.dot_dimension_numbers<[1], [0], [0], [1], [0, 0, 1, 1], [], []>} : vector<8x8xf32>, vector<8x1xf32>, vector<8x1xf32> -> vector<8x1xf32>
    %c2_379 = arith.constant 2 : index
    %c0_380 = arith.constant 0 : index
    %c0_381 = arith.constant 0 : index
    %586 = vector.load %arg6[%c2_379, %c0_380, %c0_381] : memref<4x8x1xf32, #tpu.memory_space<vmem>>, vector<1x8x1xf32>
    %587 = vector.shape_cast %586 : vector<1x8x1xf32> to vector<8x1xf32>
    %588 = arith.addf %585, %587 : vector<8x1xf32>
    %c3_382 = arith.constant 3 : index
    %c0_383 = arith.constant 0 : index
    %c0_384 = arith.constant 0 : index
    %589 = vector.load %arg4[%c3_382, %c0_383, %c0_384] : memref<4x8x8xf32, #tpu.memory_space<vmem>>, vector<1x8x8xf32>
    %590 = vector.shape_cast %589 : vector<1x8x8xf32> to vector<8x8xf32>
    %cst_385 = arith.constant dense<0.000000e+00> : vector<8x1xf32>
    %591 = tpu.matmul %590, %582, %cst_385 {dimension_numbers = #tpu.dot_dimension_numbers<[1], [0], [0], [1], [0, 0, 1, 1], [], []>} : vector<8x8xf32>, vector<8x1xf32>, vector<8x1xf32> -> vector<8x1xf32>
    %c3_386 = arith.constant 3 : index
    %c0_387 = arith.constant 0 : index
    %c0_388 = arith.constant 0 : index
    %592 = vector.load %arg6[%c3_386, %c0_387, %c0_388] : memref<4x8x1xf32, #tpu.memory_space<vmem>>, vector<1x8x1xf32>
    %593 = vector.shape_cast %592 : vector<1x8x1xf32> to vector<8x1xf32>
    %594 = arith.addf %591, %593 : vector<8x1xf32>
    %cst_389 = arith.constant 0.000000e+00 : f32
    %595 = vector.broadcast %cst_389 : f32 to vector<8x1xf32>
    %596 = arith.subf %595, %588 : vector<8x1xf32>
    %597 = math.exp %596 : vector<8x1xf32>
    %cst_390 = arith.constant 1.000000e+00 : f32
    %598 = vector.broadcast %cst_390 : f32 to vector<8x1xf32>
    %599 = arith.addf %598, %597 : vector<8x1xf32>
    %cst_391 = arith.constant 1.000000e+00 : f32
    %600 = vector.broadcast %cst_391 : f32 to vector<8x1xf32>
    %601 = arith.divf %600, %599 : vector<8x1xf32>
    %cst_392 = arith.constant 0.000000e+00 : f32
    %602 = vector.broadcast %cst_392 : f32 to vector<8x1xf32>
    %603 = arith.subf %602, %594 : vector<8x1xf32>
    %604 = math.exp %603 : vector<8x1xf32>
    %cst_393 = arith.constant 1.000000e+00 : f32
    %605 = vector.broadcast %cst_393 : f32 to vector<8x1xf32>
    %606 = arith.addf %605, %604 : vector<8x1xf32>
    %cst_394 = arith.constant 1.000000e+00 : f32
    %607 = vector.broadcast %cst_394 : f32 to vector<8x1xf32>
    %608 = arith.divf %607, %606 : vector<8x1xf32>
    %609 = arith.mulf %601, %608 : vector<8x1xf32>
    %cst_395 = arith.constant 2.000000e-01 : f32
    %610 = vector.broadcast %cst_395 : f32 to vector<8x1xf32>
    %611 = arith.subf %609, %610 : vector<8x1xf32>
    %cst_396 = arith.constant 2.000000e+00 : f32
    %612 = vector.broadcast %cst_396 : f32 to vector<8x1xf32>
    %613 = arith.mulf %611, %612 : vector<8x1xf32>
    %cst_397 = arith.constant 0.000000e+00 : f32
    %614 = vector.broadcast %cst_397 : f32 to vector<8x1xf32>
    %615 = arith.subf %614, %613 : vector<8x1xf32>
    %616 = math.exp %615 : vector<8x1xf32>
    %cst_398 = arith.constant 1.000000e+00 : f32
    %617 = vector.broadcast %cst_398 : f32 to vector<8x1xf32>
    %618 = arith.addf %617, %616 : vector<8x1xf32>
    %cst_399 = arith.constant 1.000000e+00 : f32
    %619 = vector.broadcast %cst_399 : f32 to vector<8x1xf32>
    %620 = arith.divf %619, %618 : vector<8x1xf32>
    %621 = vector.broadcast %620 : vector<8x1xf32> to vector<8x81xf32>
    %622 = arith.mulf %572, %621 : vector<8x81xf32>
    %cst_400 = arith.constant dense<0.000000e+00> : vector<8xf32>
    %623 = vector.multi_reduction <add>, %469, %cst_400 [1] : vector<8x81xf32> to vector<8xf32>
    %624 = vector.shape_cast %623 : vector<8xf32> to vector<8x1xf32>
    %cst_401 = arith.constant dense<0.000000e+00> : vector<8xf32>
    %625 = vector.multi_reduction <add>, %622, %cst_401 [1] : vector<8x81xf32> to vector<8xf32>
    %626 = vector.shape_cast %625 : vector<8xf32> to vector<8x1xf32>
    %627 = arith.addf %624, %626 : vector<8x1xf32>
    %cst_402 = arith.constant 0.00617283955 : f32
    %628 = vector.broadcast %cst_402 : f32 to vector<8x1xf32>
    %629 = arith.mulf %627, %628 : vector<8x1xf32>
    %630 = vector.broadcast %629 : vector<8x1xf32> to vector<8x81xf32>
    %631 = arith.subf %469, %630 : vector<8x81xf32>
    %632 = arith.mulf %631, %631 : vector<8x81xf32>
    %cst_403 = arith.constant dense<0.000000e+00> : vector<8xf32>
    %633 = vector.multi_reduction <add>, %632, %cst_403 [1] : vector<8x81xf32> to vector<8xf32>
    %634 = vector.shape_cast %633 : vector<8xf32> to vector<8x1xf32>
    %635 = vector.broadcast %629 : vector<8x1xf32> to vector<8x81xf32>
    %636 = arith.subf %622, %635 : vector<8x81xf32>
    %637 = arith.mulf %636, %636 : vector<8x81xf32>
    %cst_404 = arith.constant dense<0.000000e+00> : vector<8xf32>
    %638 = vector.multi_reduction <add>, %637, %cst_404 [1] : vector<8x81xf32> to vector<8xf32>
    %639 = vector.shape_cast %638 : vector<8xf32> to vector<8x1xf32>
    %640 = arith.addf %634, %639 : vector<8x1xf32>
    %cst_405 = arith.constant 0.00617283955 : f32
    %641 = vector.broadcast %cst_405 : f32 to vector<8x1xf32>
    %642 = arith.mulf %640, %641 : vector<8x1xf32>
    %c2_406 = arith.constant 2 : index
    %c0_407 = arith.constant 0 : index
    %c0_408 = arith.constant 0 : index
    %643 = vector.load %arg12[%c2_406, %c0_407, %c0_408] : memref<4x8x1xf32, #tpu.memory_space<vmem>>, vector<1x8x1xf32>
    %644 = vector.shape_cast %643 : vector<1x8x1xf32> to vector<8x1xf32>
    %cst_409 = arith.constant 9.99999974E-6 : f32
    %645 = vector.broadcast %cst_409 : f32 to vector<8x1xf32>
    %646 = arith.addf %642, %645 : vector<8x1xf32>
    %647 = math.rsqrt %646 : vector<8x1xf32>
    %648 = arith.mulf %644, %647 : vector<8x1xf32>
    %c3_410 = arith.constant 3 : index
    %c0_411 = arith.constant 0 : index
    %c0_412 = arith.constant 0 : index
    %649 = vector.load %arg12[%c3_410, %c0_411, %c0_412] : memref<4x8x1xf32, #tpu.memory_space<vmem>>, vector<1x8x1xf32>
    %650 = vector.shape_cast %649 : vector<1x8x1xf32> to vector<8x1xf32>
    %651 = vector.broadcast %629 : vector<8x1xf32> to vector<8x81xf32>
    %652 = arith.subf %469, %651 : vector<8x81xf32>
    %653 = vector.broadcast %648 : vector<8x1xf32> to vector<8x81xf32>
    %654 = arith.mulf %652, %653 : vector<8x81xf32>
    %655 = vector.broadcast %650 : vector<8x1xf32> to vector<8x81xf32>
    %656 = arith.addf %654, %655 : vector<8x81xf32>
    %cst_413 = arith.constant 3.000000e+00 : f32
    %657 = vector.broadcast %cst_413 : f32 to vector<8x81xf32>
    %658 = arith.addf %656, %657 : vector<8x81xf32>
    %cst_414 = arith.constant 0.000000e+00 : f32
    %cst_415 = arith.constant 6.000000e+00 : f32
    %659 = vector.broadcast %cst_414 : f32 to vector<8x81xf32>
    %660 = arith.maximumf %659, %658 : vector<8x81xf32>
    %661 = vector.broadcast %cst_415 : f32 to vector<8x81xf32>
    %662 = arith.minimumf %661, %660 : vector<8x81xf32>
    %663 = arith.mulf %656, %662 : vector<8x81xf32>
    %cst_416 = arith.constant 0.166666672 : f32
    %664 = vector.broadcast %cst_416 : f32 to vector<8x81xf32>
    %665 = arith.mulf %663, %664 : vector<8x81xf32>
    %c0_417 = arith.constant 0 : index
    %c0_418 = arith.constant 0 : index
    %c0_419 = arith.constant 0 : index
    %666 = vector.load %arg0[%c0_417, %c0_418, %c0_419] : memref<2x8x81xf32, #tpu.memory_space<vmem>>, vector<1x8x81xf32>
    %667 = vector.shape_cast %666 : vector<1x8x81xf32> to vector<8x81xf32>
    %668 = arith.addf %665, %667 : vector<8x81xf32>
    %c0_420 = arith.constant 0 : index
    %c0_421 = arith.constant 0 : index
    %c0_422 = arith.constant 0 : index
    %669 = vector.load %arg14[%c0_420, %c0_421, %c0_422] : memref<2x8x81xf32, #tpu.memory_space<vmem>>, vector<1x8x81xf32>
    %670 = vector.shape_cast %669 : vector<1x8x81xf32> to vector<8x81xf32>
    %671 = vector.shape_cast %668 : vector<8x81xf32> to vector<1x8x81xf32>
    tpu.vector_store %arg14[%c0_420, %c0_421, %c0_422], %671 {strides = array<i32>} : memref<2x8x81xf32, #tpu.memory_space<vmem>>, vector<1x8x81xf32>,
    %672 = vector.broadcast %629 : vector<8x1xf32> to vector<8x81xf32>
    %673 = arith.subf %622, %672 : vector<8x81xf32>
    %674 = vector.broadcast %648 : vector<8x1xf32> to vector<8x81xf32>
    %675 = arith.mulf %673, %674 : vector<8x81xf32>
    %676 = vector.broadcast %650 : vector<8x1xf32> to vector<8x81xf32>
    %677 = arith.addf %675, %676 : vector<8x81xf32>
    %cst_423 = arith.constant 3.000000e+00 : f32
    %678 = vector.broadcast %cst_423 : f32 to vector<8x81xf32>
    %679 = arith.addf %677, %678 : vector<8x81xf32>
    %cst_424 = arith.constant 0.000000e+00 : f32
    %cst_425 = arith.constant 6.000000e+00 : f32
    %680 = vector.broadcast %cst_424 : f32 to vector<8x81xf32>
    %681 = arith.maximumf %680, %679 : vector<8x81xf32>
    %682 = vector.broadcast %cst_425 : f32 to vector<8x81xf32>
    %683 = arith.minimumf %682, %681 : vector<8x81xf32>
    %684 = arith.mulf %677, %683 : vector<8x81xf32>
    %cst_426 = arith.constant 0.166666672 : f32
    %685 = vector.broadcast %cst_426 : f32 to vector<8x81xf32>
    %686 = arith.mulf %684, %685 : vector<8x81xf32>
    %c1_427 = arith.constant 1 : index
    %c0_428 = arith.constant 0 : index
    %c0_429 = arith.constant 0 : index
    %687 = vector.load %arg0[%c1_427, %c0_428, %c0_429] : memref<2x8x81xf32, #tpu.memory_space<vmem>>, vector<1x8x81xf32>
    %688 = vector.shape_cast %687 : vector<1x8x81xf32> to vector<8x81xf32>
    %689 = arith.addf %686, %688 : vector<8x81xf32>
    %c1_430 = arith.constant 1 : index
    %c0_431 = arith.constant 0 : index
    %c0_432 = arith.constant 0 : index
    %690 = vector.load %arg14[%c1_430, %c0_431, %c0_432] : memref<2x8x81xf32, #tpu.memory_space<vmem>>, vector<1x8x81xf32>
    %691 = vector.shape_cast %690 : vector<1x8x81xf32> to vector<8x81xf32>
    %692 = vector.shape_cast %689 : vector<8x81xf32> to vector<1x8x81xf32>
    tpu.vector_store %arg14[%c1_430, %c0_431, %c0_432], %692 {strides = array<i32>} : memref<2x8x81xf32, #tpu.memory_space<vmem>>, vector<1x8x81xf32>,
    return
  }
}

</mosaic_0001>

<bundles_post_ra>
// kernel: _lambda_.1
= control target key start
LH: loop header
LB: loop body
LE: loop exit
PB: predicated region body
PF: predicated region fallthrough
CT: control target
= control target key end

     0   :  { %19 = vsyncpa [#allocation3], 0  ;;  %s4642_s0 = inlined_call_operand.vmem [shape: f32[2,8,81], index: 0, kind: input, shape index: {}]   ;;  %s4643_s1 = inlined_call_operand.vmem [shape: f32[1,81], index: 1, kind: input, shape index: {}]   ;;  %s4644_s2 = inlined_call_operand.vmem [shape: f32[5,81,81], index: 2, kind: input, shape index: {}]   ;;  %s4645_s3 = inlined_call_operand.hbm [shape: f32[5,8,8], index: 3, kind: input, shape index: {}]   ;;  %s4646_s4 = inlined_call_operand.hbm [shape: f32[4,8,8], index: 4, kind: input, shape index: {}]   ;;  %s4647_s5 = inlined_call_operand.hbm [shape: f32[4,16,16], index: 5, kind: input, shape index: {}]   ;;  %s4648_s6 = inlined_call_operand.hbm [shape: f32[4,8,1], index: 6, kind: input, shape index: {}]   ;;  %s4649_s7 = inlined_call_operand.vmem [shape: f32[4,16,1], index: 7, kind: input, shape index: {}]   ;;  %s4650_s8 = inlined_call_operand.hbm [shape: f32[16,8], index: 8, kind: input, shape index: {}]   ;;  %s4651_s9 = inlined_call_operand.vmem [shape: f32[8,16], index: 9, kind: input, shape index: {}]   ;;  %s4652_s10 = inlined_call_operand.vmem [shape: f32[4,16,1], index: 10, kind: input, shape index: {}]   ;;  %s4653_s11 = inlined_call_operand.vmem [shape: f32[5,16,1], index: 11, kind: input, shape index: {}]   ;;  %s4654_s12 = inlined_call_operand.hbm [shape: f32[4,8,1], index: 12, kind: input, shape index: {}]   ;;  %s4655_s13 = inlined_call_operand.vmem [shape: f32[16,16], index: 13, kind: input, shape index: {}]   ;;  %s4656_s14 = inlined_call_operand.vmem [shape: f32[2,8,81], index: 14, kind: output, shape index: {}]  }
   0x1   :  { %20 = vsyncpa [#allocation5], 0 }
   0x2   :  { %21 = vsyncpa [#allocation8], 0 }
   0x3   :  { %22 = vsyncpa [#allocation11], 0  ;;  %s46_s15 = sshll.u32 %s4646_s4, 4  ;;  %s3214_s16 = smov [#allocation4]   ;;  %s47_s15 = int_to_ptr.hbm [resolvable:$true] %s46_s15 }
   0x4   :  { %s48_s17 = sshll.u32 %s3214_s16, 4  ;;  %s72_s20 = sshll.u32 %s4648_s6, 4  ;;  %s49_s17 = int_to_ptr.vmem [resolvable:$true] %s48_s17  ;;  %s73_s20 = int_to_ptr.hbm [resolvable:$true] %s72_s20 }
   0x5   :  { %s3215_s21 = smov 128   ;;  %s3216_s22 = smov 8  }
   0x6   :  { %54 = dma.hbm_to_vmem [thread:$0]  %s47_s15, 512, %s49_s17, [#allocation5], %s3215_s21, %s3215_s21, %s3216_s22  }
   0x7   :  { %s3217_s23 = smov [#allocation7]   ;;  %s33_s4 = sshll.u32 %s4645_s3, 4  ;;  %s34_s4 = int_to_ptr.hbm [resolvable:$true] %s33_s4 }
   0x8   :  { %s74_s24 = sshll.u32 %s3217_s23, 4  ;;  %s59_s28 = sshll.u32 %s4647_s5, 4  ;;  %s75_s24 = int_to_ptr.vmem [resolvable:$true] %s74_s24  ;;  %s60_s28 = int_to_ptr.hbm [resolvable:$true] %s59_s28 }
   0x9   :  { %80 = dma.hbm_to_vmem [thread:$0]  %s73_s20, 512, %s75_s24, [#allocation8], %s3215_s21, %s3215_s21, %s3216_s22  }
   0xa   :  { %s3218_s29 = smov [#allocation2]   ;;  %s3219_s15 = smov [#allocation6]  }
   0xb   :  { %s35_s30 = sshll.u32 %s3218_s29, 4  ;;  %s61_s3 = sshll.u32 %s3219_s15, 4  ;;  %s36_s30 = int_to_ptr.vmem [resolvable:$true] %s35_s30  ;;  %s62_s3 = int_to_ptr.vmem [resolvable:$true] %s61_s3 }
   0xc   :  { %41 = dma.hbm_to_vmem [thread:$0]  %s34_s4, 640, %s36_s30, [#allocation3], %s3215_s21, %s3215_s21, %s3216_s22  }
   0xd   :  { %s87_s18 = sshll.u32 %s4650_s8, 4  ;;  %s106_s20 = sshll.u32 %s4654_s12, 4  ;;  %s88_s18 = int_to_ptr.hbm [resolvable:$true] %s87_s18  ;;  %s107_s20 = int_to_ptr.hbm [resolvable:$true] %s106_s20 }
   0xe   :  { %67 = dma.hbm_to_vmem [thread:$0]  %s60_s28, 1024, %s62_s3, [#allocation5], %s3215_s21, %s3215_s21, %s3216_s22  }
   0xf   :  { %s3220_s23 = smov [#allocation9]   ;;  %s3221_s25 = smov [#allocation10]  }
  0x10   :  { %s89_s24 = sshll.u32 %s3220_s23, 4  ;;  %s108_s8 = sshll.u32 %s3221_s25, 4  ;;  %s90_s24 = int_to_ptr.vmem [resolvable:$true] %s89_s24  ;;  %s109_s8 = int_to_ptr.vmem [resolvable:$true] %s108_s8 }
  0x11   :  { %95 = dma.hbm_to_vmem [thread:$0]  %s88_s18, 256, %s90_s24, [#allocation8], %s3215_s21, %s3215_s21, %s3216_s22  }
  0x12   :  { %114 = dma.hbm_to_vmem [thread:$0]  %s107_s20, 512, %s109_s8, [#allocation11], %s3215_s21, %s3215_s21, %s3216_s22  }
  0x13   :  { %3206 = dma.done.wait [#allocation3], 640  }
  0x14   :  { %3207 = vsyncadd [#allocation3], 4294966656 }
  0x15   :  { %3208 = dma.done.wait [#allocation5], 1536  }
  0x16   :  { %3209 = vsyncadd [#allocation5], 4294965760 }
  0x17   :  { %3210 = dma.done.wait [#allocation8], 768  }
  0x18   :  { %3211 = vsyncadd [#allocation8], 4294966528 }
  0x19   :  { %3212 = dma.done.wait [#allocation11], 512  }
  0x1a   :  { %3213 = vsyncadd [#allocation11], 4294966784  ;;  %vm206_vm0 = vcmask 1040384   ;;  %v3337_v0 = vld [vmem:[%s4644_s2 + $0x100] sm:$0x1]  ;;  %v3347_v2 = vld [vmem:[%s4644_s2 + $0xf8] sm:$0xff] }
  0x1b   :  { %v3342_v1 = vld [vmem:[%s4644_s2 + $0xa8] sm:$0x1]  ;;  %2722 = vmatpush.msk.msra.mxu2 %vm206_vm0, %v3337_v0  ;;  %v3356_v3 = vld [vmem:[%s4644_s2 + $0xa0] sm:$0xff]  ;;  %v3361_v4 = vld [vmem:[%s4644_s2 + $0x50] sm:$0x1]  ;;  %vm202_vm1 = vcmask 662528  }
  0x1c   :  { %2720 = vmatpush.msk.msra.mxu1 %vm206_vm0, %v3342_v1  ;;  %v3366_v5 = vld [vmem:[%s4644_s2 + $0xf0] sm:$0xff]  ;;  %2718 = vmatpush.msk.msra.mxu0 %vm206_vm0, %v3361_v4  ;;  %v3373_v6 = vld [vmem:[%s4644_s2 + $0x98] sm:$0xff]  ;;  %v3378_v7 = vld [vmem:[%s4644_s2 + $0x48] sm:$0xff]  ;;  %vm302_vm2 = vcmask 64512   ;;  %v3222_v57 = vmov 0   ;;  %vm653_vm15 = vcmask 130048  }
  0x1d   :  { %262 = vmatpush.msra.mxu2 %v3347_v2  ;;  %v3385_v8 = vld [vmem:[%s4644_s2 + $0x158] sm:$0x1]  ;;  %v3390_v9 = vld [vmem:[%s4644_s2 + $0xe8] sm:$0xff]  ;;  %v3396_v10 = vld [vmem:[%s4644_s2 + $0x90] sm:$0xff]  ;;  %2850 = vset.pattern.permute.xlu0 %v3222_v57 }
  0x1e   :  { %239 = vmatpush.msra.mxu1 %v3356_v3  ;;  %216 = vmatpush.msra.mxu0 %v3378_v7  ;;  %v3403_v11 = vld [vmem:[%s4644_s2 + $0x40] sm:$0xff]  ;;  %v3410_v12 = vld [vmem:[%s4644_s2 + $0x150] sm:$0xff]  ;;  %v3415_v13 = vld [vmem:[%s4644_s2 + $0x38] sm:$0xff] }
  0x1f   :  { %2724 = vmatpush.msk.msra.mxu3 %vm206_vm0, %v3385_v8  ;;  %263 = vmatpush.msra.mxu2 %v3366_v5  ;;  %v3420_v14 = vld [vmem:[%s4644_s2 + $0xe0] sm:$0xff]  ;;  %v3426_v15 = vld [vmem:[%s4644_s2 + $0x88] sm:$0xff]  ;;  %v3439_v17 = vld [vmem:[%s4644_s2 + $0x30] sm:$0xff] }
  0x20   :  { %240 = vmatpush.msra.mxu1 %v3373_v6  ;;  %217 = vmatpush.msra.mxu0 %v3403_v11  ;;  %v3432_v16 = vld [vmem:[%s4644_s2 + $0x148] sm:$0xff]  ;;  %v3444_v18 = vld [vmem:[%s4644_s2 + $0x140] sm:$0xff]  ;;  %v3449_v19 = vld [vmem:[%s4644_s2 + $0xd8] sm:$0xff] }
  0x21   :  { %285 = vmatpush.msra.mxu3 %v3410_v12  ;;  %264 = vmatpush.msra.mxu2 %v3390_v9  ;;  %v3455_v20 = vld [vmem:[%s4644_s2 + $0x80] sm:$0xff]  ;;  %v3463_v21 = vld [vmem:[%s4644_s2 + $0x28] sm:$0xff]  ;;  %v3468_v22 = vld [vmem:[%s4644_s2 + $0x138] sm:$0xff] }
  0x22   :  { %241 = vmatpush.msra.mxu1 %v3396_v10  ;;  %218 = vmatpush.msra.mxu0 %v3415_v13  ;;  %v3473_v23 = vld [vmem:[%s4644_s2 + $0xd0] sm:$0xff]  ;;  %v3479_v24 = vld [vmem:[%s4644_s2 + $0x78] sm:$0xff]  ;;  %v3487_v25 = vld [vmem:[%s4644_s2 + $0x20] sm:$0xff] }
  0x23   :  { %286 = vmatpush.msra.mxu3 %v3432_v16  ;;  %265 = vmatpush.msra.mxu2 %v3420_v14  ;;  %v3492_v26 = vld [vmem:[%s4644_s2 + $0x130] sm:$0xff]  ;;  %v3497_v27 = vld [vmem:[%s4644_s2 + $0xc8] sm:$0xff]  ;;  %v3511_v29 = vld [vmem:[%s4644_s2 + $0x18] sm:$0xff] }
  0x24   :  { %242 = vmatpush.msra.mxu1 %v3426_v15  ;;  %219 = vmatpush.msra.mxu0 %v3439_v17  ;;  %v3503_v28 = vld [vmem:[%s4644_s2 + $0x70] sm:$0xff]  ;;  %v3516_v30 = vld [vmem:[%s4644_s2 + $0x128] sm:$0xff]  ;;  %v3521_v31 = vld [vmem:[%s4644_s2 + $0xc0] sm:$0xff] }
  0x25   :  { %287 = vmatpush.msra.mxu3 %v3444_v18  ;;  %266 = vmatpush.msra.mxu2 %v3449_v19  ;;  %v3527_v32 = vld [vmem:[%s4644_s2 + $0x68] sm:$0xff]  ;;  %v3535_v33 = vld [vmem:[%s4644_s2 + $0x10] sm:$0xff]  ;;  %v3540_v34 = vld [vmem:[%s4644_s2 + $0x120] sm:$0xff] }
  0x26   :  { %243 = vmatpush.msra.mxu1 %v3455_v20  ;;  %220 = vmatpush.msra.mxu0 %v3463_v21  ;;  %v3545_v35 = vld [vmem:[%s4644_s2 + $0xb8] sm:$0xff]  ;;  %v3551_v36 = vld [vmem:[%s4644_s2 + $0x60] sm:$0xff]  ;;  %v3559_v37 = vld [vmem:[%s4644_s2 + $0x8] sm:$0xff] }
  0x27   :  { %288 = vmatpush.msra.mxu3 %v3468_v22  ;;  %267 = vmatpush.msra.mxu2 %v3473_v23  ;;  %v3564_v38 = vld [vmem:[%s4644_s2 + $0x118] sm:$0xff]  ;;  %v3569_v39 = vld [vmem:[%s4644_s2 + $0xb0] sm:$0xff]  ;;  %v201_v41 = vld [vmem:[%s4642_s0] sm:$0xff] }
  0x28   :  { %244 = vmatpush.msra.mxu1 %v3479_v24  ;;  %221 = vmatpush.msra.mxu0 %v3487_v25  ;;  %v3575_v40 = vld [vmem:[%s4644_s2 + $0x58] sm:$0xff]  ;;  %v3588_v42 = vld [vmem:[%s4644_s2] sm:$0xff]  ;;  %v2697_v43 = vld [vmem:[%s4644_s2 + $0x110] sm:$0xff] }
  0x29   :  { %289 = vmatpush.msra.mxu3 %v3492_v26  ;;  %268 = vmatpush.msra.mxu2 %v3497_v27  ;;  %v2696_v44 = vld [vmem:[%s4644_s2 + $0x108] sm:$0xff]  ;;  %v3603_v45 = vld [vmem:[%s4644_s2 + $0x1b0] sm:$0x1]  ;;  %v3618_v47 = vld [vmem:[%s4644_s2 + $0x1a0] sm:$0xff] }
  0x2a   :  { %245 = vmatpush.msra.mxu1 %v3503_v28  ;;  %222 = vmatpush.msra.mxu0 %v3511_v29  ;;  %v3610_v46 = vld [vmem:[%s4644_s2 + $0x1a8] sm:$0xff]  ;;  %v3625_v48 = vld [vmem:[%s4644_s2 + $0x198] sm:$0xff]  ;;  %v3631_v49 = vld [vmem:[%s4644_s2 + $0x190] sm:$0xff] }
  0x2b   :  { %290 = vmatpush.msra.mxu3 %v3516_v30  ;;  %269 = vmatpush.msra.mxu2 %v3521_v31  ;;  %v3637_v50 = vld [vmem:[%s4644_s2 + $0x188] sm:$0xff]  ;;  %v3640_v51 = vld [vmem:[#allocation2] sm:$0xff]  ;;  %v3652_v53 = vld [vmem:[%s4644_s2 + $0x178] sm:$0xff] }
  0x2c   :  { %246 = vmatpush.msra.mxu1 %v3527_v32  ;;  %223 = vmatpush.msra.mxu0 %v3535_v33  ;;  %4682 = vst [vmem:[#allocation16_spill] sm:$0xff] %v3637_v50  ;;  %v3647_v52 = vld [vmem:[%s4644_s2 + $0x180] sm:$0xff]  ;;  %v3658_v54 = vld [vmem:[%s4644_s2 + $0x170] sm:$0xff]  ;;  %v3664_v55 = vld [vmem:[%s4644_s2 + $0x168] sm:$0xff] }
  0x2d   :  { %291 = vmatpush.msra.mxu3 %v3540_v34  ;;  %270 = vmatpush.msra.mxu2 %v3545_v35  ;;  %4683 = vst [vmem:[#allocation17_spill] sm:$0xff] %v3647_v52  ;;  %v451_v56 = vld [vmem:[#allocation10] sm:$0xff]  ;;  %v3670_v58 = vld [vmem:[%s4644_s2 + $0x160] sm:$0xff]  ;;  %v3682_v59 = vld [vmem:[#allocation2 + $0x10] sm:$0xff] }
  0x2e   :  { %247 = vmatpush.msra.mxu1 %v3551_v36  ;;  %224 = vmatpush.msra.mxu0 %v3559_v37  ;;  %4684 = vst [vmem:[#allocation18_spill] sm:$0xff] %v3652_v53  ;;  %v3685_v61 = vld [vmem:[#allocation2 + $0x8] sm:$0xff]  ;;  %v3693_v63 = vld [vmem:[#allocation2 + $0x18] sm:$0xff] }
  0x2f   :  { %292 = vmatpush.msra.mxu3 %v3564_v38  ;;  %271 = vmatpush.msra.mxu2 %v3569_v39  ;;  %4685 = vst [vmem:[#allocation19_spill] sm:$0xff] %v3658_v54 }
  0x30   :  { %248 = vmatpush.msra.mxu1 %v3575_v40  ;;  %2723 = vmatmul.msk.f32.vlgmr.msra.gmra.mxu2 %vm202_vm1, %v201_v41  ;;  %4686 = vst [vmem:[#allocation20_spill] sm:$0xff] %v3664_v55 }
  0x31   :  { %2721 = vmatmul.msk.f32.vlgmr.msra.gmra.mxu1 %vm202_vm1, %v201_v41  ;;  %225 = vmatpush.msra.mxu0 %v3588_v42  ;;  %4687 = vst [vmem:[#allocation21_spill] sm:$0xff] %v3670_v58 }
  0x32   :  { %293 = vmatpush.msra.mxu3 %v2697_v43  ;;  %2719 = vmatmul.msk.f32.vlgmr.msra.gmra.mxu0 %vm202_vm1, %v201_v41  ;;  %4688 = vst [vmem:[#allocation22_spill] sm:$0xff] %v3682_v59 }
  0x33   :  { %344 = vmatpush.msrb.mxu1 %v201_v41  ;;  %454 = vperm.xlu0 %2850, %v451_v56   ;;  %4689 = vst [vmem:[#allocation23_spill] sm:$0xff] %v3685_v61 }
  0x34   :  { %294 = vmatpush.msra.mxu3 %v2696_v44  ;;  %2851 = vset.pattern.permute.xlu1 %v3222_v57  ;;  %4690 = vst [vmem:[#allocation24_spill] sm:$0xff] %v3693_v63 }
  0x35   :  { %2731 = vmatpush.msk.msra.mxu1 %vm206_vm0, %v3603_v45  ;;  %2725 = vmatmul.msk.f32.vlgmr.msra.gmra.mxu3 %vm202_vm1, %v201_v41 }
  0x36   :  { %2852 = vset.pattern.permute.xlu2 %v3222_v57 }
  0x37   :  { %436 = vmatpush.msra.mxu1 %v3610_v46 }
  0x39   :  { %437 = vmatpush.msra.mxu1 %v3618_v47 }
  0x3a   :  { %2727 = vmatmul.msk.f32.vlgmr.msrb.gmra.mxu1 %vm302_vm2, %v3640_v51 }
  0x3b   :  { %438 = vmatpush.msra.mxu1 %v3625_v48 }
  0x3d   :  { %439 = vmatpush.msra.mxu1 %v3631_v49 }
  0x3f   :  { %440 = vmatpush.msra.mxu1 %v3637_v50 }
  0x41   :  { %441 = vmatpush.msra.mxu1 %v3647_v52 }
  0x43   :  { %442 = vmatpush.msra.mxu1 %v3652_v53 }
  0x45   :  { %443 = vmatpush.msra.mxu1 %v3658_v54 }
  0x47   :  { %444 = vmatpush.msra.mxu1 %v3664_v55 }
  0x49   :  { %445 = vmatpush.msra.mxu1 %v3670_v58 }
  0x4a   :  { %2732 = vmatmul.msk.f32.vlgmr.msra.gmra.mxu1 %vm202_vm1, %v201_v41 }
  0x4b   :  { %2753 = vmatpush.msk.msrb.mxu1 %vm206_vm0, %v3385_v8 }
  0x4d   :  { %921 = vmatpush.msrb.mxu1 %v3410_v12  ;;  %v3697_v12 = vld [vmem:[#allocation2 + $0x20] sm:$0xff] }
  0x4e   :  { %4691 = vst [vmem:[#allocation25_spill] sm:$0xff] %v3697_v12 }
  0x4f   :  { %922 = vmatpush.msrb.mxu1 %v3432_v16 }
  0x51   :  { %923 = vmatpush.msrb.mxu1 %v3444_v18 }
  0x53   :  { %924 = vmatpush.msrb.mxu1 %v3468_v22 }
  0x55   :  { %925 = vmatpush.msrb.mxu1 %v3492_v26 }
  0x57   :  { %926 = vmatpush.msrb.mxu1 %v3516_v30 }
  0x59   :  { %927 = vmatpush.msrb.mxu1 %v3540_v34 }
  0x5b   :  { %928 = vmatpush.msrb.mxu1 %v3564_v38 }
  0x5d   :  { %929 = vmatpush.msrb.mxu1 %v2697_v43 }
  0x5f   :  { %930 = vmatpush.msrb.mxu1 %v2696_v44 }
  0xa5   :  { %v3701_v57 = vpop.permute.xlu0 %454 }
  0xa6   :  { %4692 = vst [vmem:[#allocation26_spill] sm:$0xff] %v3701_v57 }
  0xae   :  { %v250_v60 = vpop.f32.mrf.mxu1 }
  0xaf   :  { %369 = vmatpush.msrb.mxu2 %v250_v60  ;;  %v227_v62 = vpop.f32.mrf.mxu0 }
  0xb0   :  { %2728 = vmatmul.msk.f32.vlgmr.msrb.gmra.mxu2 %vm302_vm2, %v3682_v59  ;;  %321 = vmatpush.msrb.mxu0 %v227_v62  ;;  %v3706_v62 = vld [vmem:[%s4643_s1] ss:$0 sm:$0xff] }
  0xb1   :  { %2726 = vmatmul.msk.f32.vlgmr.msrb.gmra.mxu0 %vm302_vm2, %v3685_v61 }
  0xb3   :  { %v273_v8 = vpop.f32.mrf.mxu2 }
  0xb4   :  { %395 = vmatpush.msrb.mxu3 %v273_v8 }
  0xb5   :  { %2729 = vmatmul.msk.f32.vlgmr.msrb.gmra.mxu3 %vm302_vm2, %v3693_v63 }
  0xb7   :  { %v346_v22 = vpop.f32.mrf.mxu1 }
  0xb8   :  { %v296_v16 = vpop.f32.mrf.mxu3 }
  0xb9   :  { %421 = vmatpush.msra.mxu0 %v296_v16 }
  0xba   :  { %2730 = vmatmul.msk.f32.vlgmr.msra.gmra.mxu0 %vm302_vm2, %v3697_v12 }
  0xc7   :  { %v447_v56 = vpop.f32.mrf.mxu1 }
 0x12e   :  { %v323_v18 = vpop.f32.mrf.mxu0 }
 0x12f   :  { %v347_v26 = vadd.f32 %v346_v22, %v323_v18 }
 0x133   :  { %v371_v30 = vpop.f32.mrf.mxu2 }
 0x134   :  { %v374_v34 = vadd.f32 %v371_v30, %v347_v26 }
 0x137   :  { %v423_v41 = vpop.f32.mrf.mxu0 }
 0x138   :  { %v397_v38 = vpop.f32.mrf.mxu3 }
 0x139   :  { %v400_v43 = vadd.f32 %v397_v38, %v374_v34  ;;  %v3716_v34 = vld [vmem:[#allocation4] sm:$0xff] }
 0x13a   :  { %4693 = vst [vmem:[#allocation27_spill] sm:$0xff] %v3716_v34 }
 0x13b   :  { %v426_v44 = vadd.f32 %v423_v41, %v400_v43  ;;  %v3718_v43 = vld [vmem:[#allocation4 + $0x8] sm:$0xff] }
 0x13c   :  { %4694 = vst [vmem:[#allocation28_spill] sm:$0xff] %v3718_v43 }
 0x13d   :  { %v450_v60 = vadd.f32 %v447_v56, %v426_v44  ;;  %v3724_v56 = vld [vmem:[#allocation7] sm:$0xff] }
 0x13e   :  { %4695 = vst [vmem:[#allocation29_spill] sm:$0xff] %v3724_v56 }
 0x13f   :  { %v3709_v8 = vadd.f32 %v3701_v57, %v450_v60  ;;  %v3726_v60 = vld [vmem:[#allocation7 + $0x8] sm:$0xff] }
 0x140   :  { %4696 = vst [vmem:[#allocation30_spill] sm:$0xff] %v3726_v60 }
 0x141   :  { %v458_v16 = vsel %vm202_vm1, %v3709_v8, 0.0  ;;  %v465_v18 = vmul.f32 %v3706_v62, %v3709_v8 }
 0x142   :  { %459 = vadd.xlane.f32.xlu0 %v458_v16 }
 0x143   :  { %v466_v22 = vsel %vm202_vm1, %v465_v18, 0.0 }
 0x144   :  { %467 = vadd.xlane.f32.xlu1 %v466_v22 }
 0x1b5   :  { %v460_v26 = vpop.xlane.xlu0 %459 }
 0x1b6   :  { %v461_v30 = vmul.f32 0.012345679, %v460_v26 }
 0x1b7   :  { %v468_v38 = vpop.xlane.xlu1 %467 }
 0x1b8   :  { %v469_v41 = vmul.f32 0.012345679, %v468_v38  ;;  %490 = vmatpush.msra.mxu2 %v461_v30 }
 0x1b9   :  { %2733 = vmatmul.msk.f32.vlgmr.msra.gmra.mxu2 %vm302_vm2, %v3716_v34 }
 0x1ba   :  { %517 = vmatpush.msra.mxu3 %v469_v41 }
 0x1bb   :  { %2734 = vmatmul.msk.f32.vlgmr.msra.gmra.mxu3 %vm302_vm2, %v3718_v43 }
 0x23c   :  { %v492_v44 = vpop.f32.mrf.mxu2 }
 0x23d   :  { %v493_v16 = vadd.f32 %v492_v44, %v3724_v56 }
 0x23e   :  { %v519_v18 = vpop.f32.mrf.mxu3 }
 0x23f   :  { %v522_v22 = vsub.f32 0.0, %v493_v16  ;;  %v520_v26 = vadd.f32 %v519_v18, %v3726_v60 }
 0x241   :  { %v523_v30 = vmul.f32 1.442695, %v522_v22  ;;  %v541_v38 = vsub.f32 0.0, %v520_v26 }
 0x243   :  { %2854 = vpow2.f32 %v523_v30  ;;  %v542_v57 = vmul.f32 1.442695, %v541_v38 }
 0x245   :  { %2856 = vpow2.f32 %v542_v57 }
 0x249   :  { %v2855_v41 = vpop.eup %2854 }
 0x24a   :  { %v525_v34 = vadd.f32 1.0, %v2855_v41 }
 0x24b   :  { %v2857_v63 = vpop.eup %2856 }
 0x24c   :  { %2858 = vrcp.f32 %v525_v34  ;;  %v544_v43 = vadd.f32 1.0, %v2857_v63  ;;  %vm531_vm4 = vweird.f32 %v525_v34  ;;  %v537_v22 = vand.u32 2147483648, %v525_v34 }
 0x24d   :  { %v535_v30 = vand.u32 2147483647, %v525_v34 }
 0x24e   :  { %2860 = vrcp.f32 %v544_v43  ;;  %v556_v26 = vand.u32 2147483648, %v544_v43  ;;  %v554_v38 = vand.u32 2147483647, %v544_v43  ;;  %vm550_vm7 = vweird.f32 %v544_v43 }
 0x24f   :  { %v538_v60 = vor.u32 1.1754944e-38, %v537_v22  ;;  %vm536_vm9 = vcmp.eq.f32.partialorder %v535_v30, 8.507059e+37 }
 0x250   :  { %v557_v55 = vor.u32 1.1754944e-38, %v556_v26  ;;  %vm555_vm10 = vcmp.eq.f32.partialorder %v554_v38, 8.507059e+37 }
 0x252   :  { %v2859_v59 = vpop.eup %2858 }
 0x253   :  { %v527_v12 = vmul.f32 %v2859_v59, %v525_v34  ;;  %vm532_vm3 = vweird.f32 %v2859_v59 }
 0x254   :  { %v2861_v61 = vpop.eup %2860  ;;  %vm533_vm6 = vmor %vm531_vm4, %vm532_vm3 }
 0x255   :  { %v528_v58 = vsub.f32 1.0, %v527_v12  ;;  %v546_v44 = vmul.f32 %v2861_v61, %v544_v43  ;;  %vm551_vm5 = vweird.f32 %v2861_v61 }
 0x256   :  { %vm552_vm8 = vmor %vm550_vm7, %vm551_vm5 }
 0x257   :  { %v529_v56 = vmul.f32 %v2859_v59, %v528_v58  ;;  %v547_v16 = vsub.f32 1.0, %v546_v44 }
 0x259   :  { %v530_v18 = vadd.f32 %v2859_v59, %v529_v56  ;;  %v548_v57 = vmul.f32 %v2861_v61, %v547_v16 }
 0x25b   :  { %v534_v41 = vsel %vm533_vm6, %v2859_v59, %v530_v18  ;;  %v549_v63 = vadd.f32 %v2861_v61, %v548_v57 }
 0x25c   :  { %v539_v58 = vsel %vm536_vm9, %v538_v60, %v534_v41  ;;  %v3744_v41 = vld [vmem:[#allocation9 + $0x8] sm:$0xff] }
 0x25d   :  { %v553_v12 = vsel %vm552_vm8, %v2861_v61, %v549_v63  ;;  %v2746_v63 = vld [vmem:[%s4642_s0 + $0x8] sm:$0xff] }
 0x25e   :  { %v558_v44 = vsel %vm555_vm10, %v557_v55, %v553_v12  ;;  %2754 = vmatmul.msk.f32.vlgmr.msrb.gmra.mxu1 %vm202_vm1, %v2746_v63 }
 0x25f   :  { %v560_v56 = vmul.f32 %v558_v44, %v539_v58 }
 0x261   :  { %v2735_v54 = vadd.f32 -0.2, %v560_v56 }
 0x263   :  { %v562_v53 = vmul.f32 2.0, %v2735_v54 }
 0x265   :  { %v563_v52 = vsub.f32 0.0, %v562_v53  ;;  %v590_v53 = vld [vmem:[%s4652_s10] sm:$0xff] }
 0x267   :  { %v564_v34 = vmul.f32 1.442695, %v563_v52  ;;  %v591_v52 = vld [vmem:[%s4652_s10 + $0x8] sm:$0xff] }
 0x268   :  { %599 = vperm.xlu2 %2852, %v591_v52  }
 0x269   :  { %2862 = vpow2.f32 %v564_v34 }
 0x26f   :  { %v2863_v16 = vpop.eup %2862 }
 0x270   :  { %v566_v50 = vadd.f32 1.0, %v2863_v16  ;;  %594 = vperm.xlu2 %2852, %v590_v53  }
 0x272   :  { %2864 = vrcp.f32 %v566_v50  ;;  %v578_v22 = vand.u32 2147483648, %v566_v50  ;;  %v576_v26 = vand.u32 2147483647, %v566_v50  ;;  %vm572_vm12 = vweird.f32 %v566_v50 }
 0x274   :  { %v579_v55 = vor.u32 1.1754944e-38, %v578_v22  ;;  %vm577_vm14 = vcmp.eq.f32.partialorder %v576_v26, 8.507059e+37  ;;  %v3789_v22 = vld [vmem:[#allocation6 + $0x10] sm:$0xff] }
 0x278   :  { %v2865_v59 = vpop.eup %2864 }
 0x279   :  { %v568_v18 = vmul.f32 %v2865_v59, %v566_v50  ;;  %vm573_vm11 = vweird.f32 %v2865_v59  ;;  %v3737_v50 = vld [vmem:[#allocation9] sm:$0xff] }
 0x27a   :  { %vm574_vm13 = vmor %vm572_vm12, %vm573_vm11 }
 0x27b   :  { %v569_v43 = vsub.f32 1.0, %v568_v18 }
 0x27d   :  { %v570_v57 = vmul.f32 %v2865_v59, %v569_v43 }
 0x27f   :  { %v571_v61 = vadd.f32 %v2865_v59, %v570_v57  ;;  %v3792_v57 = vld [vmem:[#allocation6 + $0x8] sm:$0xff] }
 0x281   :  { %v575_v60 = vsel %vm574_vm13, %v2865_v59, %v571_v61  ;;  %v3782_v59 = vld [vmem:[#allocation6] sm:$0xff] }
 0x282   :  { %v580_v54 = vsel %vm577_vm14, %v579_v55, %v575_v60 }
 0x283   :  { %584 = vperm.xlu1 %2851, %v580_v54  }
 0x2f5   :  { %v585_v30 = vpop.permute.xlu1 %584 }
 0x2f6   :  { %v587_v38 = vmul.f32 %v585_v30, %v3709_v8 }
 0x2f8   :  { %623 = vmatpush.msrb.mxu0 %v587_v38 }
 0x2f9   :  { %2736 = vmatmul.msk.f32.vlgmr.msrb.gmra.mxu0 %vm302_vm2, %v3737_v50 }
 0x2fa   :  { %2747 = vmatpush.msk.msra.mxu0 %vm206_vm0, %v3361_v4  ;;  %v3757_v4 = vpop.permute.xlu2 %599 }
 0x2fc   :  { %861 = vmatpush.msra.mxu0 %v3378_v7 }
 0x2fe   :  { %862 = vmatpush.msra.mxu0 %v3403_v11 }
 0x300   :  { %863 = vmatpush.msra.mxu0 %v3415_v13 }
 0x301   :  { %2737 = vmatmul.msk.f32.gmra.mxu0 %vm302_vm2, %v3744_v41 }
 0x302   :  { %864 = vmatpush.msra.mxu0 %v3439_v17  ;;  %v3759_v7 = vpop.permute.xlu2 %594 }
 0x304   :  { %865 = vmatpush.msra.mxu0 %v3463_v21 }
 0x306   :  { %866 = vmatpush.msra.mxu0 %v3487_v25 }
 0x308   :  { %867 = vmatpush.msra.mxu0 %v3511_v29 }
 0x30a   :  { %868 = vmatpush.msra.mxu0 %v3535_v33 }
 0x30c   :  { %869 = vmatpush.msra.mxu0 %v3559_v37 }
 0x30e   :  { %870 = vmatpush.msra.mxu0 %v3588_v42 }
 0x30f   :  { %2748 = vmatmul.msk.f32.vlgmr.msra.gmra.mxu0 %vm202_vm1, %v2746_v63 }
 0x376   :  { %v625_v11 = vpop.f32.mrf.mxu0 }
 0x377   :  { %v3762_v13 = vadd.f32 %v625_v11, %v3759_v7 }
 0x379   :  { %v631_v17 = vsel %vm202_vm1, %v3762_v13, 0.0  ;;  %v639_v42 = vmul.f32 %v3706_v62, %v3762_v13 }
 0x37a   :  { %632 = vadd.xlane.f32.xlu1 %v631_v17 }
 0x37b   :  { %v641_v8 = vsel %vm202_vm1, %v639_v42, 0.0 }
 0x37e   :  { %v628_v21 = vpop.f32.mrf.mxu0 }
 0x37f   :  { %v3767_v25 = vadd.f32 %v628_v21, %v3757_v4 }
 0x381   :  { %v634_v29 = vsel %vm202_vm1, %v3767_v25, 0.0  ;;  %v640_v33 = vmul.f32 %v3706_v62, %v3767_v25 }
 0x382   :  { %635 = vadd.xlane.f32.xlu2 %v634_v29  ;;  %v4705_v29 = vld [vmem:[#allocation22_spill] sm:$0xff] }
 0x383   :  { %v644_v37 = vsel %vm202_vm1, %v640_v33, 0.0 }
 0x384   :  { %645 = vadd.xlane.f32.xlu0 %v644_v37 }
 0x38a   :  { %642 = vadd.xlane.f32.xlu2 %v641_v8 }
 0x3ed   :  { %v633_v12 = vpop.xlane.xlu1 %632 }
 0x3ee   :  { %v637_v34 = vmul.f32 0.012345679, %v633_v12 }
 0x3f5   :  { %v636_v58 = vpop.xlane.xlu2 %635 }
 0x3f6   :  { %v638_v44 = vmul.f32 0.012345679, %v636_v58 }
 0x3f7   :  { %v646_v56 = vpop.xlane.xlu0 %645 }
 0x3f8   :  { %v648_v16 = vmul.f32 0.012345679, %v646_v56  ;;  %674 = vmatpush.msrb.mxu2 %v638_v44  ;;  %v4706_v44 = vld [vmem:[#allocation24_spill] sm:$0xff] }
 0x3fa   :  { %675 = vmatpush.msrb.mxu2 %v637_v34  ;;  %709 = vmatpush.msrb.mxu3 %v648_v16 }
 0x3fb   :  { %2738 = vmatmul.msk.f32.vlgmr.msrb.gmra.mxu2 %vm653_vm15, %v3782_v59 }
 0x3fc   :  { %2749 = vmatpush.msk.msra.mxu2 %vm206_vm0, %v3342_v1  ;;  %v3805_v1 = vld [vmem:[#allocation6 + $0x18] sm:$0xff] }
 0x3fd   :  { %v643_v18 = vpop.xlane.xlu2 %642 }
 0x3fe   :  { %v647_v43 = vmul.f32 0.012345679, %v643_v18  ;;  %881 = vmatpush.msra.mxu2 %v3356_v3  ;;  %v4699_v3 = vld [vmem:[#allocation18_spill] sm:$0xff] }
 0x400   :  { %882 = vmatpush.msra.mxu2 %v3373_v6  ;;  %710 = vmatpush.msrb.mxu3 %v647_v43  ;;  %v4701_v6 = vld [vmem:[#allocation20_spill] sm:$0xff] }
 0x401   :  { %2742 = vmatmul.msk.f32.vlgmr.msrb.gmra.mxu3 %vm653_vm15, %v3789_v22 }
 0x402   :  { %883 = vmatpush.msra.mxu2 %v3396_v10  ;;  %2751 = vmatpush.msk.msra.mxu3 %vm206_vm0, %v3337_v0  ;;  %v4697_v0 = vld [vmem:[#allocation16_spill] sm:$0xff]  ;;  %v872_v10 = vpop.f32.mrf.mxu0 }
 0x403   :  { %2739 = vmatmul.msk.f32.gmra.mxu2 %vm653_vm15, %v3792_v57  ;;  %950 = vmatpush.msrb.mxu0 %v872_v10 }
 0x404   :  { %884 = vmatpush.msra.mxu2 %v3426_v15  ;;  %901 = vmatpush.msra.mxu3 %v3347_v2  ;;  %v4698_v2 = vld [vmem:[#allocation17_spill] sm:$0xff] }
 0x405   :  { %v3844_v15 = vld [vmem:[%s4649_s7] sm:$0xff] }
 0x406   :  { %885 = vmatpush.msra.mxu2 %v3455_v20  ;;  %902 = vmatpush.msra.mxu3 %v3366_v5  ;;  %v4700_v5 = vld [vmem:[#allocation19_spill] sm:$0xff]  ;;  %v932_v20 = vpop.f32.mrf.mxu1 }
 0x407   :  { %1032 = vmatpush.msra.mxu0 %v932_v20 }
 0x408   :  { %886 = vmatpush.msra.mxu2 %v3479_v24  ;;  %903 = vmatpush.msra.mxu3 %v3390_v9  ;;  %v4702_v9 = vld [vmem:[#allocation21_spill] sm:$0xff] }
 0x409   :  { %2743 = vmatmul.msk.f32.gmra.mxu3 %vm653_vm15, %v3805_v1  ;;  %v4704_v24 = vld [vmem:[#allocation25_spill] sm:$0xff] }
 0x40a   :  { %887 = vmatpush.msra.mxu2 %v3503_v28  ;;  %904 = vmatpush.msra.mxu3 %v3420_v14  ;;  %v4703_v14 = vld [vmem:[#allocation23_spill] sm:$0xff] }
 0x40b   :  { %2755 = vmatmul.msk.f32.vlgmr.msrb.gmra.mxu0 %vm302_vm2, %v4703_v14  ;;  %v3852_v28 = vld [vmem:[%s4649_s7 + $0x10] sm:$0xff] }
 0x40c   :  { %888 = vmatpush.msra.mxu2 %v3527_v32  ;;  %905 = vmatpush.msra.mxu3 %v3449_v19 }
 0x40e   :  { %889 = vmatpush.msra.mxu2 %v3551_v36  ;;  %906 = vmatpush.msra.mxu3 %v3473_v23 }
 0x410   :  { %890 = vmatpush.msra.mxu2 %v3575_v40  ;;  %907 = vmatpush.msra.mxu3 %v3497_v27 }
 0x411   :  { %2750 = vmatmul.msk.f32.vlgmr.msra.gmra.mxu2 %vm202_vm1, %v2746_v63 }
 0x412   :  { %908 = vmatpush.msra.mxu3 %v3521_v31  ;;  %970 = vmatpush.msrb.mxu2 %v2746_v63 }
 0x413   :  { %2759 = vmatmul.msk.f32.vlgmr.msra.gmra.mxu0 %vm302_vm2, %v4704_v24 }
 0x414   :  { %2760 = vmatpush.msk.msra.mxu2 %vm206_vm0, %v3603_v45  ;;  %909 = vmatpush.msra.mxu3 %v3545_v35  ;;  %v3857_v35 = vld [vmem:[%s4649_s7 + $0x8] sm:$0xff] }
 0x416   :  { %1044 = vmatpush.msra.mxu2 %v3610_v46  ;;  %910 = vmatpush.msra.mxu3 %v3569_v39 }
 0x417   :  { %2752 = vmatmul.msk.f32.vlgmr.msra.gmra.mxu3 %vm202_vm1, %v2746_v63 }
 0x418   :  { %1045 = vmatpush.msra.mxu2 %v3618_v47 }
 0x419   :  { %2756 = vmatmul.msk.f32.vlgmr.msrb.gmra.mxu2 %vm302_vm2, %v3640_v51 }
 0x41a   :  { %1046 = vmatpush.msra.mxu2 %v3625_v48  ;;  %v3864_v48 = vld [vmem:[%s4649_s7 + $0x18] sm:$0xff] }
 0x41c   :  { %1047 = vmatpush.msra.mxu2 %v3631_v49 }
 0x41e   :  { %1048 = vmatpush.msra.mxu2 %v4697_v0 }
 0x420   :  { %1049 = vmatpush.msra.mxu2 %v4698_v2 }
 0x422   :  { %1050 = vmatpush.msra.mxu2 %v4699_v3 }
 0x424   :  { %1051 = vmatpush.msra.mxu2 %v4700_v5 }
 0x426   :  { %1052 = vmatpush.msra.mxu2 %v4701_v6 }
 0x428   :  { %1053 = vmatpush.msra.mxu2 %v4702_v9 }
 0x429   :  { %2761 = vmatmul.msk.f32.vlgmr.msra.gmra.mxu2 %vm202_vm1, %v2746_v63 }
 0x47e   :  { %v677_v19 = vpop.f32.mrf.mxu2 }
 0x47f   :  { %v678_v23 = vadd.f32 %v677_v19, %v3844_v15 }
 0x481   :  { %v718_v27 = vsub.f32 0.0, %v678_v23 }
 0x483   :  { %v720_v31 = vmul.f32 1.442695, %v718_v27 }
 0x484   :  { %v712_v32 = vpop.f32.mrf.mxu3 }
 0x485   :  { %2866 = vpow2.f32 %v720_v31  ;;  %v713_v36 = vadd.f32 %v3852_v28, %v712_v32 }
 0x486   :  { %v680_v39 = vpop.f32.mrf.mxu2 }
 0x487   :  { %v756_v40 = vsub.f32 0.0, %v713_v36  ;;  %v681_v45 = vadd.f32 %v680_v39, %v3857_v35 }
 0x489   :  { %v758_v46 = vmul.f32 1.442695, %v756_v40  ;;  %v719_v47 = vsub.f32 0.0, %v681_v45 }
 0x48b   :  { %v2867_v49 = vpop.eup %2866  ;;  %2868 = vpow2.f32 %v758_v46  ;;  %v722_v51 = vmul.f32 1.442695, %v719_v47 }
 0x48c   :  { %v724_v26 = vadd.f32 1.0, %v2867_v49  ;;  %v715_v61 = vpop.f32.mrf.mxu3 }
 0x48d   :  { %2870 = vpow2.f32 %v722_v51  ;;  %v716_v55 = vadd.f32 %v3864_v48, %v715_v61 }
 0x48e   :  { %2872 = vrcp.f32 %v724_v26  ;;  %vm731_vm3 = vweird.f32 %v724_v26  ;;  %v735_v18 = vand.u32 2147483647, %v724_v26  ;;  %v737_v43 = vand.u32 2147483648, %v724_v26 }
 0x48f   :  { %v757_v60 = vsub.f32 0.0, %v716_v55 }
 0x490   :  { %v738_v19 = vor.u32 1.1754944e-38, %v737_v43  ;;  %vm736_vm9 = vcmp.eq.f32.partialorder %v735_v18, 8.507059e+37 }
 0x491   :  { %v2869_v54 = vpop.eup %2868  ;;  %v760_v52 = vmul.f32 1.442695, %v757_v60 }
 0x492   :  { %v762_v53 = vadd.f32 1.0, %v2869_v54 }
 0x493   :  { %v2871_v30 = vpop.eup %2870  ;;  %2874 = vpow2.f32 %v760_v52 }
 0x494   :  { %v2873_v38 = vpop.eup %2872  ;;  %2876 = vrcp.f32 %v762_v53  ;;  %v892_v11 = vpop.f32.mrf.mxu2  ;;  %v725_v21 = vadd.f32 1.0, %v2871_v30  ;;  %v775_v0 = vand.u32 2147483648, %v762_v53  ;;  %vm769_vm5 = vweird.f32 %v762_v53 }
 0x495   :  { %v727_v17 = vmul.f32 %v2873_v38, %v724_v26  ;;  %990 = vmatpush.msrb.mxu3 %v892_v11  ;;  %vm732_vm4 = vweird.f32 %v2873_v38  ;;  %v773_v5 = vand.u32 2147483647, %v762_v53 }
 0x496   :  { %2757 = vmatmul.msk.f32.vlgmr.msrb.gmra.mxu3 %vm302_vm2, %v4705_v29  ;;  %2878 = vrcp.f32 %v725_v21  ;;  %vm733_vm7 = vmor %vm731_vm3, %vm732_vm4  ;;  %v776_v20 = vor.u32 1.1754944e-38, %v775_v0  ;;  %vm746_vm12 = vweird.f32 %v725_v21  ;;  %v750_v45 = vand.u32 2147483647, %v725_v21 }
 0x497   :  { %v728_v33 = vsub.f32 1.0, %v727_v17  ;;  %vm774_vm10 = vcmp.eq.f32.partialorder %v773_v5, 8.507059e+37  ;;  %v752_v46 = vand.u32 2147483648, %v725_v21  ;;  %v4709_v5 = vld [vmem:[#allocation28_spill] sm:$0xff] }
 0x499   :  { %v2875_v37 = vpop.eup %2874  ;;  %v729_v42 = vmul.f32 %v2873_v38, %v728_v33  ;;  %v753_v55 = vor.u32 1.1754944e-38, %v752_v46 }
 0x49a   :  { %v2877_v8 = vpop.eup %2876  ;;  %v763_v63 = vadd.f32 1.0, %v2875_v37  ;;  %v912_v12 = vpop.f32.mrf.mxu3 }
 0x49b   :  { %v765_v58 = vmul.f32 %v2877_v8, %v762_v53  ;;  %1011 = vmatpush.msra.mxu1 %v912_v12  ;;  %v730_v34 = vadd.f32 %v2873_v38, %v729_v42  ;;  %vm770_vm6 = vweird.f32 %v2877_v8 }
 0x49c   :  { %2880 = vrcp.f32 %v763_v63  ;;  %2758 = vmatmul.msk.f32.vlgmr.msra.gmra.mxu1 %vm302_vm2, %v4706_v44  ;;  %v2879_v56 = vpop.eup %2878  ;;  %vm771_vm8 = vmor %vm769_vm5, %vm770_vm6  ;;  %v790_v47 = vand.u32 2147483648, %v763_v63  ;;  %vm784_vm13 = vweird.f32 %v763_v63  ;;  %v788_v51 = vand.u32 2147483647, %v763_v63  ;;  %v972_v11 = vpop.f32.mrf.mxu2 }
 0x49d   :  { %v766_v16 = vsub.f32 1.0, %v765_v58  ;;  %v742_v2 = vmul.f32 %v2879_v56, %v725_v21  ;;  %v734_v9 = vsel %vm733_vm7, %v2873_v38, %v730_v34  ;;  %vm747_vm11 = vweird.f32 %v2879_v56  ;;  %v952_v38 = vpop.f32.mrf.mxu0  ;;  %v4707_v58 = vld [vmem:[#allocation26_spill] sm:$0xff] }
 0x49e   :  { %v739_v31 = vsel %vm736_vm9, %v738_v19, %v734_v9  ;;  %vm748_vm3 = vmor %vm746_vm12, %vm747_vm11  ;;  %v791_v60 = vor.u32 1.1754944e-38, %v790_v47  ;;  %vm751_vm5 = vcmp.eq.f32.partialorder %v750_v45, 8.507059e+37  ;;  %vm789_vm6 = vcmp.eq.f32.partialorder %v788_v51, 8.507059e+37  ;;  %v4710_v9 = vld [vmem:[#allocation30_spill] sm:$0xff] }
 0x49f   :  { %v767_v3 = vmul.f32 %v2877_v8, %v766_v16  ;;  %v743_v6 = vsub.f32 1.0, %v742_v2  ;;  %v973_v17 = vadd.f32 %v972_v11, %v952_v38 }
 0x4a1   :  { %v768_v10 = vadd.f32 %v2877_v8, %v767_v3  ;;  %v744_v23 = vmul.f32 %v2879_v56, %v743_v6  ;;  %v4708_v3 = vld [vmem:[#allocation27_spill] sm:$0xff] }
 0x4a2   :  { %v2881_v14 = vpop.eup %2880 }
 0x4a3   :  { %v772_v24 = vsel %vm771_vm8, %v2877_v8, %v768_v10  ;;  %v780_v27 = vmul.f32 %v2881_v14, %v763_v63  ;;  %v745_v39 = vadd.f32 %v2879_v56, %v744_v23  ;;  %vm785_vm14 = vweird.f32 %v2881_v14  ;;  %v4711_v23 = vld [vmem:[#allocation29_spill] sm:$0xff] }
 0x4a4   :  { %v777_v32 = vsel %vm774_vm10, %v776_v20, %v772_v24  ;;  %vm786_vm4 = vmor %vm784_vm13, %vm785_vm14 }
 0x4a5   :  { %v3871_v36 = vmul.f32 %v777_v32, %v739_v31  ;;  %v781_v40 = vsub.f32 1.0, %v780_v27  ;;  %v749_v26 = vsel %vm748_vm3, %v2879_v56, %v745_v39  ;;  %v1034_v37 = vpop.f32.mrf.mxu0 }
 0x4a6   :  { %v754_v52 = vsel %vm751_vm5, %v753_v55, %v749_v26 }
 0x4a7   :  { %v782_v49 = vmul.f32 %v2881_v14, %v781_v40 }
 0x4a9   :  { %v783_v61 = vadd.f32 %v2881_v14, %v782_v49 }
 0x4ab   :  { %v787_v54 = vsel %vm786_vm4, %v2881_v14, %v783_v61 }
 0x4ac   :  { %v792_v53 = vsel %vm789_vm6, %v791_v60, %v787_v54  ;;  %v1055_v8 = vpop.f32.mrf.mxu2 }
 0x4ad   :  { %v795_v30 = vmul.f32 %v792_v53, %v754_v52 }
 0x4af   :  { %v2745_v47 = vadd.f32 -0.2, %v795_v30 }
 0x4b1   :  { %v799_v61 = vmul.f32 2.0, %v2745_v47 }
 0x4b3   :  { %v801_v11 = vsub.f32 0.0, %v799_v61 }
 0x519   :  { %v992_v21 = vpop.f32.mrf.mxu3  ;;  %v1013_v29 = vpop.f32.mrf.mxu1 }
 0x51a   :  { %v995_v33 = vadd.f32 %v992_v21, %v973_v17 }
 0x51c   :  { %v1016_v42 = vadd.f32 %v1013_v29, %v995_v33 }
 0x51e   :  { %v1037_v63 = vadd.f32 %v1034_v37, %v1016_v42 }
 0x520   :  { %v1058_v12 = vadd.f32 %v1055_v8, %v1037_v63  ;;  %v804_v63 = vmul.f32 1.442695, %v801_v11 }
 0x522   :  { %v3874_v44 = vadd.f32 %v1058_v12, %v4707_v58 }
 0x524   :  { %v1060_v56 = vsel %vm202_vm1, %v3874_v44, 0.0  ;;  %v1064_v34 = vmul.f32 %v3706_v62, %v3874_v44 }
 0x525   :  { %1061 = vadd.xlane.f32.xlu0 %v1060_v56 }
 0x526   :  { %v1065_v16 = vsel %vm202_vm1, %v1064_v34, 0.0 }
 0x527   :  { %1066 = vadd.xlane.f32.xlu2 %v1065_v16 }
 0x598   :  { %v1062_v18 = vpop.xlane.xlu0 %1061 }
 0x599   :  { %v1063_v43 = vmul.f32 0.012345679, %v1062_v18 }
 0x59a   :  { %v1067_v0 = vpop.xlane.xlu2 %1066 }
 0x59b   :  { %v1068_v2 = vmul.f32 0.012345679, %v1067_v0  ;;  %1084 = vmatpush.msra.mxu3 %v1063_v43 }
 0x59c   :  { %2762 = vmatmul.msk.f32.vlgmr.msra.gmra.mxu3 %vm302_vm2, %v4708_v3 }
 0x59d   :  { %1104 = vmatpush.msrb.mxu1 %v1068_v2 }
 0x59e   :  { %2763 = vmatmul.msk.f32.vlgmr.msrb.gmra.mxu1 %vm302_vm2, %v4709_v5 }
 0x61b   :  { %v1106_v6 = vpop.f32.mrf.mxu1 }
 0x61c   :  { %v1107_v10 = vadd.f32 %v1106_v6, %v4710_v9 }
 0x61e   :  { %v1128_v14 = vsub.f32 0.0, %v1107_v10 }
 0x61f   :  { %v1086_v19 = vpop.f32.mrf.mxu3 }
 0x620   :  { %v1129_v20 = vmul.f32 1.442695, %v1128_v14  ;;  %v1087_v24 = vadd.f32 %v1086_v19, %v4711_v23 }
 0x622   :  { %2882 = vpow2.f32 %v1129_v20  ;;  %v1109_v27 = vsub.f32 0.0, %v1087_v24 }
 0x624   :  { %v1110_v31 = vmul.f32 1.442695, %v1109_v27 }
 0x626   :  { %2884 = vpow2.f32 %v1110_v31 }
 0x628   :  { %v2883_v32 = vpop.eup %2882 }
 0x629   :  { %v1131_v39 = vadd.f32 1.0, %v2883_v32 }
 0x62b   :  { %2886 = vrcp.f32 %v1131_v39  ;;  %vm1137_vm8 = vweird.f32 %v1131_v39  ;;  %v1143_v53 = vand.u32 2147483648, %v1131_v39  ;;  %v1141_v17 = vand.u32 2147483647, %v1131_v39 }
 0x62c   :  { %v2885_v40 = vpop.eup %2884 }
 0x62d   :  { %v1112_v45 = vadd.f32 1.0, %v2885_v40  ;;  %v1144_v37 = vor.u32 1.1754944e-38, %v1143_v53  ;;  %vm1142_vm13 = vcmp.eq.f32.partialorder %v1141_v17, 8.507059e+37 }
 0x62f   :  { %2888 = vrcp.f32 %v1112_v45  ;;  %v1124_v38 = vand.u32 2147483648, %v1112_v45  ;;  %v1122_v29 = vand.u32 2147483647, %v1112_v45  ;;  %vm1118_vm11 = vweird.f32 %v1112_v45 }
 0x630   :  { %2890 = vpow2.f32 %v804_v63 }
 0x631   :  { %v2887_v46 = vpop.eup %2886  ;;  %v1125_v42 = vor.u32 1.1754944e-38, %v1124_v38  ;;  %vm1123_vm14 = vcmp.eq.f32.partialorder %v1122_v29, 8.507059e+37 }
 0x632   :  { %v1133_v49 = vmul.f32 %v2887_v46, %v1131_v39  ;;  %vm1138_vm7 = vweird.f32 %v2887_v46 }
 0x633   :  { %vm1139_vm10 = vmor %vm1137_vm8, %vm1138_vm7 }
 0x634   :  { %v1134_v51 = vsub.f32 1.0, %v1133_v49 }
 0x635   :  { %v2889_v26 = vpop.eup %2888 }
 0x636   :  { %v1135_v55 = vmul.f32 %v2887_v46, %v1134_v51  ;;  %v1114_v60 = vmul.f32 %v2889_v26, %v1112_v45  ;;  %vm1119_vm9 = vweird.f32 %v2889_v26  ;;  %v2891_v43 = vpop.eup %2890 }
 0x637   :  { %vm1120_vm12 = vmor %vm1118_vm11, %vm1119_vm9  ;;  %v807_v2 = vadd.f32 1.0, %v2891_v43 }
 0x638   :  { %v1136_v54 = vadd.f32 %v2887_v46, %v1135_v55  ;;  %v1115_v52 = vsub.f32 1.0, %v1114_v60 }
 0x639   :  { %v834_v47 = vand.u32 2147483648, %v807_v2  ;;  %vm828_vm8 = vweird.f32 %v807_v2  ;;  %v832_v49 = vand.u32 2147483647, %v807_v2 }
 0x63a   :  { %v1116_v21 = vmul.f32 %v2889_v26, %v1115_v52  ;;  %v1140_v33 = vsel %vm1139_vm10, %v2887_v46, %v1136_v54  ;;  %v2744_v54 = vadd.f32 -0.2, %v3871_v36 }
 0x63b   :  { %v1145_v12 = vsel %vm1142_vm13, %v1144_v37, %v1140_v33  ;;  %vm833_vm10 = vcmp.eq.f32.partialorder %v832_v49, 8.507059e+37 }
 0x63c   :  { %v1117_v30 = vadd.f32 %v2889_v26, %v1116_v21  ;;  %v798_v52 = vmul.f32 2.0, %v2744_v54 }
 0x63e   :  { %v1121_v8 = vsel %vm1120_vm12, %v2889_v26, %v1117_v30  ;;  %v835_v26 = vor.u32 1.1754944e-38, %v834_v47  ;;  %v800_v53 = vsub.f32 0.0, %v798_v52  ;;  %v3997_v47 = vld [vmem:[%s4644_s2 + $0x8] sm:$0xff] }
 0x63f   :  { %v1126_v58 = vsel %vm1123_vm14, %v1125_v42, %v1121_v8 }
 0x640   :  { %v1147_v56 = vmul.f32 %v1145_v12, %v1126_v58  ;;  %v802_v38 = vmul.f32 1.442695, %v800_v53 }
 0x642   :  { %v2764_v34 = vadd.f32 -0.2, %v1147_v56 }
 0x644   :  { %v1149_v16 = vmul.f32 2.0, %v2764_v34 }
 0x646   :  { %v1150_v18 = vsub.f32 0.0, %v1149_v16 }
 0x648   :  { %v1151_v0 = vmul.f32 1.442695, %v1150_v18 }
 0x64a   :  { %2892 = vpow2.f32 %v1151_v0 }
 0x64b   :  { %2894 = vrcp.f32 %v807_v2 }
 0x650   :  { %v2893_v3 = vpop.eup %2892 }
 0x651   :  { %v1153_v5 = vadd.f32 1.0, %v2893_v3  ;;  %v2895_v6 = vpop.eup %2894  ;;  %v3914_v3 = vld [vmem:[%s4644_s2 + $0x50] sm:$0x1] }
 0x652   :  { %v824_v9 = vmul.f32 %v2895_v6, %v807_v2  ;;  %vm829_vm7 = vweird.f32 %v2895_v6 }
 0x653   :  { %2896 = vrcp.f32 %v1153_v5  ;;  %v1165_v23 = vand.u32 2147483648, %v1153_v5  ;;  %v1163_v27 = vand.u32 2147483647, %v1153_v5  ;;  %vm1159_vm4 = vweird.f32 %v1153_v5  ;;  %vm830_vm9 = vmor %vm828_vm8, %vm829_vm7 }
 0x654   :  { %v825_v20 = vsub.f32 1.0, %v824_v9  ;;  %2898 = vpow2.f32 %v802_v38 }
 0x655   :  { %v1166_v39 = vor.u32 1.1754944e-38, %v1165_v23  ;;  %vm1164_vm6 = vcmp.eq.f32.partialorder %v1163_v27, 8.507059e+37  ;;  %v3947_v23 = vld [vmem:[%s4644_s2 + $0x30] sm:$0xff]  ;;  %v3965_v27 = vld [vmem:[%s4644_s2 + $0x20] sm:$0xff] }
 0x656   :  { %v826_v32 = vmul.f32 %v2895_v6, %v825_v20  ;;  %v3008_v20 = vld [vmem:[%s4644_s2 + $0xa8] sm:$0x1] }
 0x658   :  { %v827_v46 = vadd.f32 %v2895_v6, %v826_v32  ;;  %v3974_v32 = vld [vmem:[%s4644_s2 + $0x18] sm:$0xff] }
 0x659   :  { %v2897_v10 = vpop.eup %2896 }
 0x65a   :  { %v1155_v14 = vmul.f32 %v2897_v10, %v1153_v5  ;;  %vm1160_vm3 = vweird.f32 %v2897_v10  ;;  %v831_v51 = vsel %vm830_vm9, %v2895_v6, %v827_v46  ;;  %v2899_v17 = vpop.eup %2898 }
 0x65b   :  { %vm1161_vm5 = vmor %vm1159_vm4, %vm1160_vm3  ;;  %v836_v61 = vsel %vm833_vm10, %v835_v26, %v831_v51  ;;  %v806_v29 = vadd.f32 1.0, %v2899_v17  ;;  %v4008_v51 = vld [vmem:[%s4644_s2] sm:$0xff]  ;;  %v3022_v26 = vld [vmem:[%s4644_s2 + $0x70] sm:$0xff] }
 0x65c   :  { %v1156_v19 = vsub.f32 1.0, %v1155_v14 }
 0x65d   :  { %2900 = vrcp.f32 %v806_v29  ;;  %vm813_vm12 = vweird.f32 %v806_v29  ;;  %v817_v56 = vand.u32 2147483647, %v806_v29 }
 0x65e   :  { %v1157_v24 = vmul.f32 %v2897_v10, %v1156_v19  ;;  %v3933_v19 = vld [vmem:[%s4644_s2 + $0x38] sm:$0xff] }
 0x65f   :  { %vm818_vm14 = vcmp.eq.f32.partialorder %v817_v56, 8.507059e+37 }
 0x660   :  { %v1158_v31 = vadd.f32 %v2897_v10, %v1157_v24  ;;  %v3012_v24 = vld [vmem:[%s4644_s2 + $0x98] sm:$0xff] }
 0x662   :  { %v1162_v40 = vsel %vm1161_vm5, %v2897_v10, %v1158_v31  ;;  %v3921_v10 = vld [vmem:[%s4644_s2 + $0x48] sm:$0xff]  ;;  %v3014_v31 = vld [vmem:[%s4644_s2 + $0x90] sm:$0xff] }
 0x663   :  { %v1167_v45 = vsel %vm1164_vm6, %v1166_v39, %v1162_v40  ;;  %v3016_v39 = vld [vmem:[%s4644_s2 + $0x88] sm:$0xff]  ;;  %v3985_v40 = vld [vmem:[%s4644_s2 + $0x10] sm:$0xff] }
 0x664   :  { %1171 = vperm.xlu0 %2850, %v1167_v45  }
 0x66c   :  { %845 = vperm.xlu0 %2850, %v836_v61   ;;  %v3023_v61 = vld [vmem:[%s4644_s2 + $0x68] sm:$0xff] }
 0x6d6   :  { %v1172_v55 = vpop.permute.xlu0 %1171 }
 0x6d7   :  { %v1174_v60 = vmul.f32 %v1172_v55, %v3874_v44  ;;  %v3024_v55 = vld [vmem:[%s4644_s2 + $0x60] sm:$0xff] }
 0x6d9   :  { %1190 = vmatpush.msrb.mxu0 %v1174_v60  ;;  %v3025_v60 = vld [vmem:[%s4644_s2 + $0x58] sm:$0xff] }
 0x6da   :  { %2765 = vmatmul.msk.f32.vlgmr.msrb.gmra.mxu0 %vm302_vm2, %v3737_v50 }
 0x6e2   :  { %2766 = vmatmul.msk.f32.gmra.mxu0 %vm302_vm2, %v3744_v41 }
 0x757   :  { %v1192_v11 = vpop.f32.mrf.mxu0 }
 0x758   :  { %v3894_v21 = vadd.f32 %v1192_v11, %v3759_v7  ;;  %v2901_v7 = vpop.eup %2900 }
 0x759   :  { %v809_v42 = vmul.f32 %v2901_v7, %v806_v29  ;;  %vm814_vm11 = vweird.f32 %v2901_v7 }
 0x75a   :  { %v1198_v44 = vsel %vm202_vm1, %v3894_v21, 0.0  ;;  %v1206_v50 = vmul.f32 %v3706_v62, %v3894_v21  ;;  %vm815_vm13 = vmor %vm813_vm12, %vm814_vm11 }
 0x75b   :  { %1199 = vadd.xlane.f32.xlu1 %v1198_v44  ;;  %v810_v63 = vsub.f32 1.0, %v809_v42 }
 0x75c   :  { %v1208_v30 = vsel %vm202_vm1, %v1206_v50, 0.0 }
 0x75d   :  { %v811_v12 = vmul.f32 %v2901_v7, %v810_v63 }
 0x75f   :  { %v1195_v41 = vpop.f32.mrf.mxu0  ;;  %v812_v58 = vadd.f32 %v2901_v7, %v811_v12 }
 0x760   :  { %v3901_v36 = vadd.f32 %v1195_v41, %v3757_v4  ;;  %v819_v4 = vand.u32 2147483648, %v806_v29 }
 0x761   :  { %v816_v34 = vsel %vm815_vm13, %v2901_v7, %v812_v58 }
 0x762   :  { %v1201_v33 = vsel %vm202_vm1, %v3901_v36, 0.0  ;;  %v1207_v37 = vmul.f32 %v3706_v62, %v3901_v36  ;;  %v820_v16 = vor.u32 1.1754944e-38, %v819_v4 }
 0x763   :  { %1202 = vadd.xlane.f32.xlu2 %v1201_v33  ;;  %1209 = vadd.xlane.f32.xlu1 %v1208_v30 }
 0x764   :  { %v1211_v8 = vsel %vm202_vm1, %v1207_v37, 0.0  ;;  %v821_v18 = vsel %vm818_vm14, %v820_v16, %v816_v34 }
 0x76b   :  { %1212 = vadd.xlane.f32.xlu2 %v1211_v8 }
 0x77c   :  { %840 = vperm.xlu1 %2851, %v821_v18  }
 0x7ce   :  { %v1200_v43 = vpop.xlane.xlu1 %1199 }
 0x7cf   :  { %v1204_v2 = vmul.f32 0.012345679, %v1200_v43 }
 0x7d6   :  { %v1203_v0 = vpop.xlane.xlu2 %1202  ;;  %v1210_v5 = vpop.xlane.xlu1 %1209 }
 0x7d7   :  { %v1205_v62 = vmul.f32 0.012345679, %v1203_v0  ;;  %v1214_v14 = vmul.f32 0.012345679, %v1210_v5 }
 0x7d9   :  { %1230 = vmatpush.msrb.mxu3 %v1205_v62 }
 0x7db   :  { %1231 = vmatpush.msrb.mxu3 %v1204_v2 }
 0x7dc   :  { %2767 = vmatmul.msk.f32.vlgmr.msrb.gmra.mxu3 %vm653_vm15, %v3782_v59  ;;  %v3927_v59 = vld [vmem:[%s4644_s2 + $0x40] sm:$0xff] }
 0x7dd   :  { %2781 = vmatpush.msk.msra.mxu3 %vm206_vm0, %v3914_v3 }
 0x7de   :  { %v1213_v6 = vpop.xlane.xlu2 %1212 }
 0x7df   :  { %v1215_v9 = vmul.f32 0.012345679, %v1213_v6  ;;  %1574 = vmatpush.msra.mxu3 %v3921_v10 }
 0x7e1   :  { %1253 = vmatpush.msra.mxu1 %v1215_v9  ;;  %1575 = vmatpush.msra.mxu3 %v3927_v59 }
 0x7e3   :  { %1254 = vmatpush.msra.mxu1 %v1214_v14  ;;  %1576 = vmatpush.msra.mxu3 %v3933_v19 }
 0x7e4   :  { %2769 = vmatmul.msk.f32.vlgmr.msra.gmra.mxu1 %vm653_vm15, %v3789_v22  ;;  %2768 = vmatmul.msk.f32.gmra.mxu3 %vm653_vm15, %v3792_v57  ;;  %v3010_v22 = vld [vmem:[%s4644_s2 + $0xa0] sm:$0xff]  ;;  %v3956_v57 = vld [vmem:[%s4644_s2 + $0x28] sm:$0xff] }
 0x7e5   :  { %2784 = vmatpush.msk.msrb.mxu1 %vm206_vm0, %v3008_v20  ;;  %1577 = vmatpush.msra.mxu3 %v3947_v23 }
 0x7e7   :  { %1597 = vmatpush.msrb.mxu1 %v3010_v22  ;;  %1578 = vmatpush.msra.mxu3 %v3956_v57 }
 0x7e9   :  { %1598 = vmatpush.msrb.mxu1 %v3012_v24  ;;  %1579 = vmatpush.msra.mxu3 %v3965_v27 }
 0x7eb   :  { %1599 = vmatpush.msrb.mxu1 %v3014_v31  ;;  %1580 = vmatpush.msra.mxu3 %v3974_v32 }
 0x7ec   :  { %2770 = vmatmul.msk.f32.gmra.mxu1 %vm653_vm15, %v3805_v1  ;;  %v3018_v1 = vld [vmem:[%s4644_s2 + $0x80] sm:$0xff] }
 0x7ed   :  { %1600 = vmatpush.msrb.mxu1 %v3016_v39  ;;  %1581 = vmatpush.msra.mxu3 %v3985_v40 }
 0x7ee   :  { %v841_v45 = vpop.permute.xlu1 %840 }
 0x7ef   :  { %v3989_v46 = vmul.f32 %v841_v45, %v3762_v13  ;;  %1601 = vmatpush.msrb.mxu1 %v3018_v1  ;;  %1582 = vmatpush.msra.mxu3 %v3997_v47  ;;  %v3020_v13 = vld [vmem:[%s4644_s2 + $0x78] sm:$0xff] }
 0x7f1   :  { %v1394_v49 = vsel %vm202_vm1, %v3989_v46, 0.0  ;;  %1602 = vmatpush.msrb.mxu1 %v3020_v13  ;;  %1583 = vmatpush.msra.mxu3 %v4008_v51 }
 0x7f2   :  { %1395 = vadd.xlane.f32.xlu1 %v1394_v49 }
 0x7f3   :  { %1603 = vmatpush.msrb.mxu1 %v3022_v26 }
 0x7f5   :  { %1604 = vmatpush.msrb.mxu1 %v3023_v61 }
 0x7f7   :  { %1605 = vmatpush.msrb.mxu1 %v3024_v55 }
 0x7f9   :  { %1606 = vmatpush.msrb.mxu1 %v3025_v60 }
 0x85f   :  { %v1233_v54 = vpop.f32.mrf.mxu3 }
 0x860   :  { %v1234_v52 = vadd.f32 %v1233_v54, %v3844_v15 }
 0x861   :  { %v1256_v53 = vpop.f32.mrf.mxu1 }
 0x862   :  { %v1262_v38 = vsub.f32 0.0, %v1234_v52  ;;  %v1257_v11 = vadd.f32 %v3852_v28, %v1256_v53 }
 0x864   :  { %v1264_v17 = vmul.f32 1.442695, %v1262_v38  ;;  %v1300_v44 = vsub.f32 0.0, %v1257_v11 }
 0x866   :  { %2902 = vpow2.f32 %v1264_v17  ;;  %v1302_v29 = vmul.f32 1.442695, %v1300_v44 }
 0x867   :  { %v1236_v50 = vpop.f32.mrf.mxu3 }
 0x868   :  { %2904 = vpow2.f32 %v1302_v29  ;;  %v1237_v41 = vadd.f32 %v1236_v50, %v3857_v35 }
 0x869   :  { %v1259_v33 = vpop.f32.mrf.mxu1 }
 0x86a   :  { %v1263_v30 = vsub.f32 0.0, %v1237_v41  ;;  %v1260_v7 = vadd.f32 %v3864_v48, %v1259_v33 }
 0x86c   :  { %v2903_v37 = vpop.eup %2902  ;;  %v1266_v42 = vmul.f32 1.442695, %v1263_v30  ;;  %v1301_v8 = vsub.f32 0.0, %v1260_v7 }
 0x86d   :  { %v1268_v15 = vadd.f32 1.0, %v2903_v37 }
 0x86e   :  { %v2905_v63 = vpop.eup %2904  ;;  %2906 = vpow2.f32 %v1266_v42  ;;  %v1304_v12 = vmul.f32 1.442695, %v1301_v8 }
 0x86f   :  { %2908 = vrcp.f32 %v1268_v15  ;;  %v1306_v28 = vadd.f32 1.0, %v2905_v63  ;;  %v1279_v62 = vand.u32 2147483647, %v1268_v15  ;;  %v1281_v2 = vand.u32 2147483648, %v1268_v15 }
 0x870   :  { %2910 = vpow2.f32 %v1304_v12  ;;  %vm1275_vm4 = vweird.f32 %v1268_v15 }
 0x871   :  { %2912 = vrcp.f32 %v1306_v28  ;;  %v1317_v6 = vand.u32 2147483647, %v1306_v28  ;;  %v1319_v9 = vand.u32 2147483648, %v1306_v28  ;;  %vm4031_vm7 = vcmp.eq.f32.partialorder %v1279_v62, 8.507059e+37 }
 0x872   :  { %v1282_v39 = vor.u32 1.1754944e-38, %v1281_v2  ;;  %vm1313_vm8 = vweird.f32 %v1306_v28 }
 0x873   :  { %vm1318_vm9 = vcmp.eq.f32.partialorder %v1317_v6, 8.507059e+37  ;;  %v1320_v13 = vor.u32 1.1754944e-38, %v1319_v9 }
 0x874   :  { %v2907_v58 = vpop.eup %2906 }
 0x875   :  { %v2909_v4 = vpop.eup %2908  ;;  %v1269_v56 = vadd.f32 1.0, %v2907_v58 }
 0x876   :  { %v2911_v34 = vpop.eup %2910  ;;  %v1271_v35 = vmul.f32 %v2909_v4, %v1268_v15  ;;  %vm1276_vm3 = vweird.f32 %v2909_v4 }
 0x877   :  { %2914 = vrcp.f32 %v1269_v56  ;;  %v2913_v16 = vpop.eup %2912  ;;  %v1307_v48 = vadd.f32 1.0, %v2911_v34  ;;  %vm4027_vm6 = vmor %vm1275_vm4, %vm1276_vm3  ;;  %vm1290_vm11 = vweird.f32 %v1269_v56  ;;  %v1296_v55 = vand.u32 2147483648, %v1269_v56 }
 0x878   :  { %v1272_v18 = vsub.f32 1.0, %v1271_v35  ;;  %v1309_v43 = vmul.f32 %v2913_v16, %v1306_v28  ;;  %vm1314_vm5 = vweird.f32 %v2913_v16  ;;  %v1294_v54 = vand.u32 2147483647, %v1269_v56 }
 0x879   :  { %2916 = vrcp.f32 %v1307_v48  ;;  %vm1315_vm10 = vmor %vm1313_vm8, %vm1314_vm5  ;;  %vm1328_vm13 = vweird.f32 %v1307_v48  ;;  %v1334_v17 = vand.u32 2147483648, %v1307_v48  ;;  %v1332_v41 = vand.u32 2147483647, %v1307_v48 }
 0x87a   :  { %v1273_v0 = vmul.f32 %v2909_v4, %v1272_v18  ;;  %v1310_v5 = vsub.f32 1.0, %v1309_v43  ;;  %v1297_v30 = vor.u32 1.1754944e-38, %v1296_v55  ;;  %vm1295_vm4 = vcmp.eq.f32.partialorder %v1294_v54, 8.507059e+37 }
 0x87b   :  { %v1335_v8 = vor.u32 1.1754944e-38, %v1334_v17 }
 0x87c   :  { %v1274_v14 = vadd.f32 %v2909_v4, %v1273_v0  ;;  %v1311_v22 = vmul.f32 %v2913_v16, %v1310_v5 }
 0x87d   :  { %v2915_v20 = vpop.eup %2914 }
 0x87e   :  { %v1286_v45 = vmul.f32 %v2915_v20, %v1269_v56  ;;  %v1278_v1 = vsel %vm4027_vm6, %v2909_v4, %v1274_v14  ;;  %v1312_v49 = vadd.f32 %v2913_v16, %v1311_v22  ;;  %vm1291_vm12 = vweird.f32 %v2915_v20 }
 0x87f   :  { %v2917_v26 = vpop.eup %2916  ;;  %v1283_v53 = vsel %vm4031_vm7, %v1282_v39, %v1278_v1  ;;  %vm4039_vm14 = vmor %vm1290_vm11, %vm1291_vm12  ;;  %vm1333_vm6 = vcmp.eq.f32.partialorder %v1332_v41, 8.507059e+37 }
 0x880   :  { %v1287_v61 = vsub.f32 1.0, %v1286_v45  ;;  %v1316_v60 = vsel %vm1315_vm10, %v2913_v16, %v1312_v49  ;;  %v1324_v52 = vmul.f32 %v2917_v26, %v1307_v48  ;;  %vm1329_vm3 = vweird.f32 %v2917_v26 }
 0x881   :  { %v1321_v38 = vsel %vm1318_vm9, %v1320_v13, %v1316_v60  ;;  %vm1330_vm5 = vmor %vm1328_vm13, %vm1329_vm3 }
 0x882   :  { %v1288_v11 = vmul.f32 %v2915_v20, %v1287_v61  ;;  %v1338_v44 = vmul.f32 %v1321_v38, %v1283_v53  ;;  %v1325_v50 = vsub.f32 1.0, %v1324_v52  ;;  %v846_v38 = vpop.permute.xlu0 %845 }
 0x884   :  { %v1289_v33 = vadd.f32 %v2915_v20, %v1288_v11  ;;  %v2771_v7 = vadd.f32 -0.2, %v1338_v44  ;;  %v1326_v37 = vmul.f32 %v2917_v26, %v1325_v50  ;;  %v849_v11 = vmul.f32 %v846_v38, %v3767_v25  ;;  %v1396_v25 = vpop.xlane.xlu1 %1395  ;;  %v2801_v38 = vld [vmem:[%s4652_s10 + $0x10] sm:$0xff] }
 0x886   :  { %v1293_v42 = vsel %vm4039_vm14, %v2915_v20, %v1289_v33  ;;  %v1327_v15 = vadd.f32 %v2917_v26, %v1326_v37  ;;  %v1342_v63 = vmul.f32 2.0, %v2771_v7  ;;  %v1397_v17 = vsel %vm202_vm1, %v849_v11, 0.0 }
 0x887   :  { %v1298_v12 = vsel %vm1295_vm4, %v1297_v30, %v1293_v42 }
 0x888   :  { %v1331_v28 = vsel %vm1330_vm5, %v2917_v26, %v1327_v15  ;;  %v1344_v58 = vsub.f32 0.0, %v1342_v63  ;;  %v4069_v63 = vld [vmem:[%s4644_s2 + $0xf8] sm:$0xff] }
 0x889   :  { %v1336_v4 = vsel %vm1333_vm6, %v1335_v8, %v1331_v28  ;;  %v4080_v28 = vld [vmem:[%s4644_s2 + $0xf0] sm:$0xff] }
 0x88a   :  { %v1339_v56 = vmul.f32 %v1336_v4, %v1298_v12  ;;  %v1346_v34 = vmul.f32 1.442695, %v1344_v58  ;;  %v4075_v12 = vld [vmem:[%s4655_s13 + $0x8] sm:$0xff]  ;;  %v4094_v4 = vld [vmem:[%s4644_s2 + $0xe0] sm:$0xff] }
 0x88b   :  { %v4086_v58 = vld [vmem:[%s4644_s2 + $0xe8] sm:$0xff] }
 0x88c   :  { %v2772_v35 = vadd.f32 -0.2, %v1339_v56  ;;  %2918 = vpow2.f32 %v1346_v34  ;;  %v4100_v56 = vld [vmem:[%s4644_s2 + $0xd8] sm:$0xff]  ;;  %v4106_v34 = vld [vmem:[%s4644_s2 + $0xd0] sm:$0xff] }
 0x88e   :  { %v1343_v16 = vmul.f32 2.0, %v2772_v35  ;;  %v4112_v35 = vld [vmem:[%s4644_s2 + $0xc8] sm:$0xff] }
 0x890   :  { %v1345_v18 = vsub.f32 0.0, %v1343_v16  ;;  %v4118_v16 = vld [vmem:[%s4644_s2 + $0xc0] sm:$0xff] }
 0x892   :  { %v2919_v43 = vpop.eup %2918  ;;  %v1348_v0 = vmul.f32 1.442695, %v1345_v18  ;;  %v4124_v18 = vld [vmem:[%s4644_s2 + $0xb8] sm:$0xff] }
 0x893   :  { %v1350_v62 = vadd.f32 1.0, %v2919_v43  ;;  %v4130_v43 = vld [vmem:[%s4644_s2 + $0xb0] sm:$0xff] }
 0x894   :  { %2920 = vpow2.f32 %v1348_v0 }
 0x895   :  { %2922 = vrcp.f32 %v1350_v62  ;;  %v1363_v14 = vand.u32 2147483648, %v1350_v62  ;;  %v1361_v22 = vand.u32 2147483647, %v1350_v62  ;;  %vm1357_vm8 = vweird.f32 %v1350_v62 }
 0x897   :  { %v1364_v39 = vor.u32 1.1754944e-38, %v1363_v14  ;;  %vm1362_vm10 = vcmp.eq.f32.partialorder %v1361_v22, 8.507059e+37  ;;  %v2799_v22 = vld [vmem:[%s4653_s11 + $0x40] sm:$0xff] }
 0x89a   :  { %v2921_v48 = vpop.eup %2920 }
 0x89b   :  { %v2923_v2 = vpop.eup %2922  ;;  %v1351_v5 = vadd.f32 1.0, %v2921_v48 }
 0x89c   :  { %v1353_v6 = vmul.f32 %v2923_v2, %v1350_v62  ;;  %vm1358_vm7 = vweird.f32 %v2923_v2 }
 0x89d   :  { %2924 = vrcp.f32 %v1351_v5  ;;  %vm1359_vm9 = vmor %vm1357_vm8, %vm1358_vm7  ;;  %v1378_v26 = vand.u32 2147483648, %v1351_v5  ;;  %v1376_v55 = vand.u32 2147483647, %v1351_v5  ;;  %vm1372_vm12 = vweird.f32 %v1351_v5 }
 0x89e   :  { %v1354_v9 = vsub.f32 1.0, %v1353_v6 }
 0x89f   :  { %v1379_v54 = vor.u32 1.1754944e-38, %v1378_v26  ;;  %vm1377_vm14 = vcmp.eq.f32.partialorder %v1376_v55, 8.507059e+37  ;;  %v2779_v55 = vld [vmem:[%s4652_s10 + $0x30] sm:$0xff] }
 0x8a0   :  { %v1355_v20 = vmul.f32 %v2923_v2, %v1354_v9 }
 0x8a2   :  { %v1356_v24 = vadd.f32 %v2923_v2, %v1355_v20  ;;  %v2793_v20 = vld [vmem:[%s4653_s11 + $0x10] sm:$0xff] }
 0x8a3   :  { %v2925_v31 = vpop.eup %2924 }
 0x8a4   :  { %v1360_v45 = vsel %vm1359_vm9, %v2923_v2, %v1356_v24  ;;  %v1368_v1 = vmul.f32 %v2925_v31, %v1351_v5  ;;  %vm1373_vm11 = vweird.f32 %v2925_v31 }
 0x8a5   :  { %v1365_v49 = vsel %vm1362_vm10, %v1364_v39, %v1360_v45  ;;  %vm1374_vm13 = vmor %vm1372_vm12, %vm1373_vm11 }
 0x8a6   :  { %1384 = vperm.xlu0 %2850, %v1365_v49   ;;  %v1369_v13 = vsub.f32 1.0, %v1368_v1 }
 0x8a8   :  { %v1370_v61 = vmul.f32 %v2925_v31, %v1369_v13 }
 0x8aa   :  { %v1371_v60 = vadd.f32 %v2925_v31, %v1370_v61 }
 0x8ac   :  { %v1375_v52 = vsel %vm1374_vm13, %v2925_v31, %v1371_v60  ;;  %v2794_v60 = vld [vmem:[%s4653_s11 + $0x18] sm:$0xff] }
 0x8ad   :  { %v1380_v53 = vsel %vm1377_vm14, %v1379_v54, %v1375_v52  ;;  %v2796_v54 = vld [vmem:[%s4653_s11 + $0x28] sm:$0xff]  ;;  %v2798_v52 = vld [vmem:[%s4653_s11 + $0x38] sm:$0xff] }
 0x8ae   :  { %1389 = vperm.xlu2 %2852, %v1380_v53   ;;  %v2800_v53 = vld [vmem:[%s4653_s11 + $0x48] sm:$0xff] }
 0x8d0   :  { %1398 = vadd.xlane.f32.xlu0 %v1397_v17 }
 0x908   :  { %v1390_v44 = vpop.permute.xlu2 %1389 }
 0x909   :  { %v1393_v29 = vmul.f32 %v1390_v44, %v3901_v36  ;;  %v4055_v36 = vld [vmem:[%s4655_s13] sm:$0xff] }
 0x90b   :  { %v1403_v50 = vsel %vm202_vm1, %v1393_v29, 0.0 }
 0x90c   :  { %1404 = vadd.xlane.f32.xlu2 %v1403_v50 }
 0x918   :  { %v1385_v41 = vpop.permute.xlu0 %1384 }
 0x919   :  { %v1392_v33 = vmul.f32 %v1385_v41, %v3894_v21  ;;  %v4062_v21 = vld [vmem:[%s4644_s2 + $0x100] sm:$0x1] }
 0x91b   :  { %v1400_v30 = vsel %vm202_vm1, %v1392_v33, 0.0 }
 0x91c   :  { %1401 = vadd.xlane.f32.xlu0 %v1400_v30  ;;  %v4190_v30 = vld [vmem:[%s4644_s2 + $0x150] sm:$0xff] }
 0x943   :  { %v1399_v7 = vpop.xlane.xlu0 %1398 }
 0x97f   :  { %v1405_v37 = vpop.xlane.xlu2 %1404 }
 0x980   :  { %v1407_v42 = vadd.f32 %v1405_v37, %v1399_v7  ;;  %v4196_v7 = vld [vmem:[%s4644_s2 + $0x148] sm:$0xff]  ;;  %v4202_v37 = vld [vmem:[%s4644_s2 + $0x140] sm:$0xff] }
 0x982   :  { %1430 = vmatpush.msrb.mxu2 %v1407_v42  ;;  %v4210_v42 = vld [vmem:[%s4644_s2 + $0x138] sm:$0xff] }
 0x98f   :  { %v1402_v8 = vpop.xlane.xlu0 %1401 }
 0x990   :  { %v1406_v15 = vadd.f32 %v1402_v8, %v1396_v25  ;;  %v4216_v25 = vld [vmem:[%s4644_s2 + $0x130] sm:$0xff]  ;;  %v4222_v8 = vld [vmem:[%s4644_s2 + $0x128] sm:$0xff] }
 0x992   :  { %1431 = vmatpush.msrb.mxu2 %v1406_v15  ;;  %v4228_v15 = vld [vmem:[%s4644_s2 + $0x120] sm:$0xff] }
 0x993   :  { %2773 = vmatmul.msk.f32.vlgmr.msrb.gmra.mxu2 %vm653_vm15, %v4055_v36 }
 0x994   :  { %2787 = vmatpush.msk.msra.mxu2 %vm206_vm0, %v4062_v21 }
 0x996   :  { %1620 = vmatpush.msra.mxu2 %v4069_v63 }
 0x998   :  { %1621 = vmatpush.msra.mxu2 %v4080_v28 }
 0x99a   :  { %1622 = vmatpush.msra.mxu2 %v4086_v58 }
 0x99b   :  { %2774 = vmatmul.msk.f32.gmra.mxu2 %vm653_vm15, %v4075_v12 }
 0x99c   :  { %1623 = vmatpush.msra.mxu2 %v4094_v4 }
 0x99e   :  { %1624 = vmatpush.msra.mxu2 %v4100_v56 }
 0x9a0   :  { %1625 = vmatpush.msra.mxu2 %v4106_v34 }
 0x9a2   :  { %1626 = vmatpush.msra.mxu2 %v4112_v35 }
 0x9a4   :  { %1627 = vmatpush.msra.mxu2 %v4118_v16 }
 0x9a6   :  { %1628 = vmatpush.msra.mxu2 %v4124_v18 }
 0x9a8   :  { %1629 = vmatpush.msra.mxu2 %v4130_v43 }
 0xa16   :  { %v1433_v0 = vpop.f32.mrf.mxu2 }
 0xa17   :  { %v1439_v62 = vmul.f32 0.0061728396, %v1433_v0  ;;  %v4246_v0 = vld [vmem:[%s4644_s2 + $0x108] sm:$0xff] }
 0xa19   :  { %1443 = vperm.xlu2 %2852, %v1439_v62  }
 0xa1e   :  { %v1436_v48 = vpop.f32.mrf.mxu2 }
 0xa1f   :  { %v1440_v2 = vmul.f32 0.0061728396, %v1436_v48 }
 0xa21   :  { %1448 = vperm.xlu0 %2850, %v1440_v2  }
 0xa73   :  { %v1444_v5 = vpop.permute.xlu2 %1443 }
 0xa74   :  { %v4134_v6 = vsub.f32 %v3989_v46, %v1444_v5  ;;  %v4154_v49 = vsub.f32 %v1392_v33, %v1444_v5  ;;  %v4183_v33 = vld [vmem:[%s4644_s2 + $0x158] sm:$0x1] }
 0xa76   :  { %v1453_v9 = vmul.f32 %v4134_v6, %v4134_v6  ;;  %v1463_v26 = vmul.f32 %v4154_v49, %v4154_v49 }
 0xa78   :  { %v1455_v14 = vsel %vm202_vm1, %v1453_v9, 0.0  ;;  %v1465_v61 = vsel %vm202_vm1, %v1463_v26, 0.0  ;;  %v2777_v26 = vld [vmem:[%s4652_s10 + $0x20] sm:$0xff] }
 0xa79   :  { %1456 = vadd.xlane.f32.xlu0 %v1455_v14 }
 0xa8d   :  { %1679 = vperm.xlu0 %2850, %v2793_v20  }
 0xa93   :  { %v1449_v24 = vpop.permute.xlu0 %1448 }
 0xa94   :  { %v4145_v31 = vsub.f32 %v849_v11, %v1449_v24  ;;  %v4149_v39 = vsub.f32 %v1393_v29, %v1449_v24 }
 0xa95   :  { %1730 = vperm.xlu0 %2850, %v2799_v22  }
 0xa96   :  { %v1454_v46 = vmul.f32 %v4145_v31, %v4145_v31  ;;  %v1464_v1 = vmul.f32 %v4149_v39, %v4149_v39 }
 0xa98   :  { %v1458_v45 = vsel %vm202_vm1, %v1454_v46, 0.0  ;;  %v1468_v13 = vsel %vm202_vm1, %v1464_v1, 0.0 }
 0xa99   :  { %1459 = vadd.xlane.f32.xlu1 %v1458_v45 }
 0xaa1   :  { %1469 = vadd.xlane.f32.xlu1 %v1468_v13 }
 0xaa9   :  { %1466 = vadd.xlane.f32.xlu1 %v1465_v61 }
 0xac2   :  { %1542 = vperm.xlu1 %2851, %v2779_v55  }
 0xaca   :  { %1684 = vperm.xlu1 %2851, %v2794_v60  }
 0xad2   :  { %1701 = vperm.xlu1 %2851, %v2796_v54  }
 0xada   :  { %1718 = vperm.xlu1 %2851, %v2798_v52  }
 0xae2   :  { %1735 = vperm.xlu1 %2851, %v2800_v53  }
 0xaea   :  { %1747 = vperm.xlu1 %2851, %v2801_v38   ;;  %v2778_v38 = vld [vmem:[%s4652_s10 + $0x28] sm:$0xff] }
 0xaec   :  { %v1457_v29 = vpop.xlane.xlu0 %1456 }
 0xb0c   :  { %v1460_v11 = vpop.xlane.xlu1 %1459 }
 0xb14   :  { %v1470_v17 = vpop.xlane.xlu1 %1469 }
 0xb15   :  { %v1472_v44 = vadd.f32 %v1470_v17, %v1460_v11 }
 0xb17   :  { %1487 = vmatpush.msra.mxu0 %v1472_v44 }
 0xb1c   :  { %v1467_v50 = vpop.xlane.xlu1 %1466 }
 0xb1d   :  { %v1471_v41 = vadd.f32 %v1467_v50, %v1457_v29  ;;  %v2780_v29 = vld [vmem:[%s4652_s10 + $0x38] sm:$0xff]  ;;  %v1661_v50 = vld [vmem:[%s4653_s11 + $0x8] sm:$0xff] }
 0xb1f   :  { %1488 = vmatpush.msra.mxu0 %v1471_v41  ;;  %v1660_v41 = vld [vmem:[%s4653_s11] sm:$0xff] }
 0xb20   :  { %2775 = vmatmul.msk.f32.vlgmr.msra.gmra.mxu0 %vm653_vm15, %v4055_v36  ;;  %v4234_v36 = vld [vmem:[%s4644_s2 + $0x118] sm:$0xff] }
 0xb21   :  { %2790 = vmatpush.msk.msrb.mxu0 %vm206_vm0, %v4183_v33 }
 0xb23   :  { %1643 = vmatpush.msrb.mxu0 %v4190_v30 }
 0xb25   :  { %1644 = vmatpush.msrb.mxu0 %v4196_v7 }
 0xb27   :  { %1645 = vmatpush.msrb.mxu0 %v4202_v37 }
 0xb28   :  { %2776 = vmatmul.msk.f32.gmra.mxu0 %vm653_vm15, %v4075_v12  ;;  %v4240_v12 = vld [vmem:[%s4644_s2 + $0x110] sm:$0xff] }
 0xb29   :  { %1646 = vmatpush.msrb.mxu0 %v4210_v42 }
 0xb2b   :  { %1647 = vmatpush.msrb.mxu0 %v4216_v25 }
 0xb2d   :  { %1648 = vmatpush.msrb.mxu0 %v4222_v8 }
 0xb2f   :  { %1649 = vmatpush.msrb.mxu0 %v4228_v15 }
 0xb31   :  { %1650 = vmatpush.msrb.mxu0 %v4234_v36 }
 0xb33   :  { %1651 = vmatpush.msrb.mxu0 %v4240_v12 }
 0xb35   :  { %1652 = vmatpush.msrb.mxu0 %v4246_v0 }
 0xb9d   :  { %v1490_v62 = vpop.f32.mrf.mxu0 }
 0xb9e   :  { %v1496_v48 = vmul.f32 0.0061728396, %v1490_v62  ;;  %v2795_v62 = vld [vmem:[%s4653_s11 + $0x20] sm:$0xff] }
 0xba0   :  { %v1501_v2 = vadd.f32 1e-05, %v1496_v48  ;;  %v2797_v48 = vld [vmem:[%s4653_s11 + $0x30] sm:$0xff] }
 0xba2   :  { %2926 = vrsqrt.f32 %v1501_v2  ;;  %vm1509_vm4 = vweird.f32 %v1501_v2 }
 0xba5   :  { %v1493_v5 = vpop.f32.mrf.mxu0 }
 0xba6   :  { %v1497_v9 = vmul.f32 0.0061728396, %v1493_v5 }
 0xba8   :  { %v2927_v14 = vpop.eup %2926  ;;  %v1502_v20 = vadd.f32 1e-05, %v1497_v9 }
 0xba9   :  { %v1504_v22 = vmul.f32 %v2927_v14, %v1501_v2  ;;  %vm1510_vm3 = vweird.f32 %v2927_v14  ;;  %v2802_v2 = vld [vmem:[%s4652_s10 + $0x18] sm:$0xff] }
 0xbaa   :  { %2928 = vrsqrt.f32 %v1502_v20  ;;  %vm1511_vm5 = vmor %vm1509_vm4, %vm1510_vm3  ;;  %vm1519_vm7 = vweird.f32 %v1502_v20 }
 0xbab   :  { %v1505_v24 = vmul.f32 %v2927_v14, %v1504_v22 }
 0xbad   :  { %v1506_v46 = vmul.f32 0.5, %v1505_v24 }
 0xbaf   :  { %v1507_v45 = vsub.f32 1.5, %v1506_v46 }
 0xbb0   :  { %v2929_v1 = vpop.eup %2928 }
 0xbb1   :  { %v1514_v13 = vmul.f32 %v2929_v1, %v1502_v20  ;;  %v1508_v61 = vmul.f32 %v2927_v14, %v1507_v45  ;;  %vm1520_vm6 = vweird.f32 %v2929_v1 }
 0xbb2   :  { %vm1521_vm8 = vmor %vm1519_vm7, %vm1520_vm6 }
 0xbb3   :  { %v1515_v55 = vmul.f32 %v2929_v1, %v1514_v13  ;;  %v1512_v60 = vsel %vm1511_vm5, %v2927_v14, %v1508_v61  ;;  %v4277_v14 = vpop.permute.xlu1 %1542 }
 0xbb4   :  { %v1523_v54 = vmul.f32 %v2777_v26, %v1512_v60 }
 0xbb5   :  { %v1516_v52 = vmul.f32 0.5, %v1515_v55 }
 0xbb6   :  { %1530 = vperm.xlu2 %2852, %v1523_v54  }
 0xbb7   :  { %v1517_v53 = vsub.f32 1.5, %v1516_v52 }
 0xbb9   :  { %v1518_v11 = vmul.f32 %v2929_v1, %v1517_v53 }
 0xbbb   :  { %v1522_v17 = vsel %vm1521_vm8, %v2929_v1, %v1518_v11 }
 0xbbc   :  { %v1524_v44 = vmul.f32 %v2778_v38, %v1522_v17 }
 0xbbe   :  { %1535 = vperm.xlu2 %2852, %v1524_v44  }
 0xbc6   :  { %1547 = vperm.xlu2 %2852, %v2780_v29  }
 0xbce   :  { %1669 = vperm.xlu2 %2852, %v1661_v50  }
 0xbd6   :  { %1664 = vperm.xlu2 %2852, %v1660_v41   ;;  %v4304_v41 = vpop.permute.xlu0 %1679 }
 0xbde   :  { %1696 = vperm.xlu2 %2852, %v2795_v62  }
 0xbe6   :  { %1713 = vperm.xlu2 %2852, %v2797_v48  }
 0xbee   :  { %1752 = vperm.xlu2 %2852, %v2802_v2  }
 0xc10   :  { %v4273_v5 = vpop.permute.xlu2 %1530 }
 0xc11   :  { %v1538_v9 = vmul.f32 %v4273_v5, %v4134_v6 }
 0xc13   :  { %v1550_v20 = vadd.f32 %v4277_v14, %v1538_v9 }
 0xc15   :  { %v1552_v22 = vadd.f32 3.0, %v1550_v20 }
 0xc17   :  { %v1554_v24 = vmax.f32 %v1552_v22, 0.0 }
 0xc18   :  { %v1536_v46 = vpop.permute.xlu2 %1535 }
 0xc19   :  { %v1556_v45 = vmin.f32 %v1554_v24, 6.0  ;;  %v1539_v26 = vmul.f32 %v1536_v46, %v4145_v31  ;;  %v2138_v61 = vmul.f32 %v1536_v46, %v4149_v39  ;;  %v4292_v31 = vpop.permute.xlu1 %1684 }
 0xc1b   :  { %v1558_v1 = vmul.f32 %v1556_v45, %v1550_v20 }
 0xc1d   :  { %v1560_v13 = vmul.f32 0.16666667, %v1558_v1 }
 0xc1f   :  { %2782 = vmatmul.msk.f32.vlgmr.msra.gmra.mxu3 %vm202_vm1, %v1560_v13  ;;  %2785 = vmatmul.msk.f32.vlgmr.msrb.gmra.mxu1 %vm202_vm1, %v1560_v13  ;;  %v1687_v20 = vmul.f32 %v4304_v41, %v1560_v13 }
 0xc20   :  { %2788 = vmatmul.msk.f32.vlgmr.msra.gmra.mxu2 %vm202_vm1, %v1560_v13  ;;  %2791 = vmatmul.msk.f32.vlgmr.msrb.gmra.mxu0 %vm202_vm1, %v1560_v13  ;;  %v1548_v6 = vpop.permute.xlu2 %1547 }
 0xc21   :  { %v1551_v55 = vadd.f32 %v1548_v6, %v1539_v26  ;;  %v4286_v60 = vadd.f32 %v2138_v61, %v1548_v6  ;;  %v4296_v17 = vpop.permute.xlu1 %1701  ;;  %v4314_v6 = vpop.permute.xlu0 %1730 }
 0xc23   :  { %v1553_v54 = vadd.f32 3.0, %v1551_v55 }
 0xc25   :  { %v1555_v52 = vmax.f32 %v1553_v54, 0.0 }
 0xc27   :  { %v1557_v53 = vmin.f32 %v1555_v52, 6.0 }
 0xc28   :  { %v4294_v39 = vpop.permute.xlu2 %1669 }
 0xc29   :  { %v1559_v38 = vmul.f32 %v1557_v53, %v1551_v55  ;;  %v4300_v29 = vpop.permute.xlu1 %1718 }
 0xc2b   :  { %v1561_v11 = vmul.f32 0.16666667, %v1559_v38 }
 0xc2d   :  { %2783 = vmatmul.msk.f32.gmra.mxu3 %vm202_vm1, %v1561_v11  ;;  %2786 = vmatmul.msk.f32.gmra.mxu1 %vm202_vm1, %v1561_v11 }
 0xc2e   :  { %2789 = vmatmul.msk.f32.gmra.mxu2 %vm202_vm1, %v1561_v11  ;;  %2792 = vmatmul.msk.f32.gmra.mxu0 %vm202_vm1, %v1561_v11 }
 0xc30   :  { %v4298_v44 = vpop.permute.xlu2 %1664 }
 0xc31   :  { %v4306_v62 = vpop.permute.xlu1 %1735 }
 0xc38   :  { %v4302_v50 = vpop.permute.xlu2 %1696 }
 0xc39   :  { %v4317_v53 = vpop.permute.xlu1 %1747 }
 0xc3a   :  { %4718 = vst [vmem:[#allocation16_spill] sm:$0xff] %v4317_v53 }
 0xc40   :  { %v4311_v45 = vpop.permute.xlu2 %1713 }
 0xc9c   :  { %v1608_v1 = vpop.f32.mrf.mxu1 }
 0xc9d   :  { %v1654_v48 = vpop.f32.mrf.mxu0  ;;  %v1738_v55 = vmul.f32 %v4314_v6, %v1608_v1  ;;  %v4330_v1 = vld [vmem:[%s4643_s1] ss:$0 sm:$0xff] }
 0xc9e   :  { %v1704_v24 = vmul.f32 %v4302_v50, %v1654_v48 }
 0xca2   :  { %v1585_v22 = vpop.f32.mrf.mxu3 }
 0xca3   :  { %v1631_v2 = vpop.f32.mrf.mxu2  ;;  %v1721_v26 = vmul.f32 %v4311_v45, %v1585_v22 }
 0xca4   :  { %v1672_v9 = vmul.f32 %v4298_v44, %v1631_v2 }
 0xca6   :  { %v1689_v46 = vadd.f32 %v1687_v20, %v1672_v9  ;;  %v1688_v20 = vmul.f32 %v4292_v31, %v1561_v11 }
 0xca8   :  { %v1706_v61 = vadd.f32 %v1704_v24, %v1689_v46 }
 0xcaa   :  { %v1723_v54 = vadd.f32 %v1721_v26, %v1706_v61  ;;  %v1611_v61 = vpop.f32.mrf.mxu1 }
 0xcab   :  { %v1657_v48 = vpop.f32.mrf.mxu0 }
 0xcac   :  { %v1740_v52 = vadd.f32 %v1738_v55, %v1723_v54  ;;  %v1705_v24 = vmul.f32 %v4296_v17, %v1657_v48 }
 0xcae   :  { %v4320_v13 = vadd.f32 %v4317_v53, %v1740_v52  ;;  %v1739_v52 = vmul.f32 %v4306_v62, %v1611_v61 }
 0xcb0   :  { %v1757_v38 = vsel %vm202_vm1, %v4320_v13, 0.0  ;;  %v1588_v22 = vpop.f32.mrf.mxu3  ;;  %v1765_v26 = vmul.f32 %v4330_v1, %v4320_v13 }
 0xcb1   :  { %v1634_v2 = vpop.f32.mrf.mxu2  ;;  %1758 = vadd.xlane.f32.xlu2 %v1757_v38  ;;  %v1722_v55 = vmul.f32 %v4300_v29, %v1588_v22 }
 0xcb2   :  { %v1673_v9 = vmul.f32 %v4294_v39, %v1634_v2  ;;  %v1767_v11 = vsel %vm202_vm1, %v1765_v26, 0.0  ;;  %v4337_v2 = vpop.permute.xlu2 %1752 }
 0xcb3   :  { %4719 = vst [vmem:[#allocation17_spill] sm:$0xff] %v4337_v2 }
 0xcb4   :  { %v1690_v46 = vadd.f32 %v1688_v20, %v1673_v9 }
 0xcb6   :  { %v1707_v54 = vadd.f32 %v1705_v24, %v1690_v46  ;;  %v1979_v24 = vld [vmem:[#allocation10 + $0x8] sm:$0xff] }
 0xcb8   :  { %v1724_v38 = vadd.f32 %v1722_v55, %v1707_v54 }
 0xcb9   :  { %1768 = vadd.xlane.f32.xlu2 %v1767_v11  ;;  %v4347_v11 = vld [vmem:[#allocation6 + $0x20] sm:$0xff] }
 0xcba   :  { %v1741_v48 = vadd.f32 %v1739_v52, %v1724_v38  ;;  %4720 = vst [vmem:[#allocation18_spill] sm:$0xff] %v4347_v11 }
 0xcbc   :  { %v4340_v9 = vadd.f32 %v4337_v2, %v1741_v48  ;;  %v2137_v48 = vmul.f32 %v4273_v5, %v4154_v49  ;;  %v4361_v49 = vld [vmem:[#allocation6 + $0x28] sm:$0xff] }
 0xcbd   :  { %4722 = vst [vmem:[#allocation20_spill] sm:$0xff] %v4361_v49 }
 0xcbe   :  { %v1760_v20 = vsel %vm202_vm1, %v4340_v9, 0.0  ;;  %v1766_v53 = vmul.f32 %v4330_v1, %v4340_v9 }
 0xcbf   :  { %1761 = vadd.xlane.f32.xlu0 %v1760_v20  ;;  %v2139_v20 = vadd.f32 %v2137_v48, %v4277_v14  ;;  %v4409_v48 = vld [vmem:[%s4649_s7 + $0x28] sm:$0xff] }
 0xcc0   :  { %v1770_v22 = vsel %vm202_vm1, %v1766_v53, 0.0  ;;  %v4351_v53 = vld [vmem:[#allocation6 + $0x30] sm:$0xff]  ;;  %4727 = vst [vmem:[#allocation24_spill] sm:$0xff] %v4409_v48 }
 0xcc1   :  { %1771 = vadd.xlane.f32.xlu1 %v1770_v22  ;;  %4721 = vst [vmem:[#allocation19_spill] sm:$0xff] %v4351_v53  ;;  %v2141_v5 = vadd.f32 3.0, %v2139_v20  ;;  %v4364_v22 = vld [vmem:[#allocation6 + $0x38] sm:$0xff] }
 0xcc2   :  { %4723 = vst [vmem:[#allocation21_spill] sm:$0xff] %v4364_v22 }
 0xcc3   :  { %v2143_v14 = vmax.f32 %v2141_v5, 0.0 }
 0xcd1   :  { %1982 = vperm.xlu2 %2852, %v1979_v24  }
 0xd24   :  { %v1759_v46 = vpop.xlane.xlu2 %1758 }
 0xd25   :  { %v1763_v52 = vmul.f32 0.012345679, %v1759_v46 }
 0xd2c   :  { %v1769_v55 = vpop.xlane.xlu2 %1768 }
 0xd2d   :  { %v1773_v2 = vmul.f32 0.012345679, %v1769_v55 }
 0xd32   :  { %v1762_v26 = vpop.xlane.xlu0 %1761 }
 0xd33   :  { %v1764_v61 = vmul.f32 0.012345679, %v1762_v26 }
 0xd34   :  { %v1772_v54 = vpop.xlane.xlu1 %1771 }
 0xd35   :  { %v1774_v38 = vmul.f32 0.012345679, %v1772_v54  ;;  %1801 = vmatpush.msrb.mxu3 %v1764_v61  ;;  %v4403_v61 = vld [vmem:[%s4649_s7 + $0x38] sm:$0xff] }
 0xd36   :  { %4726 = vst [vmem:[#allocation22_spill] sm:$0xff] %v4403_v61 }
 0xd37   :  { %1802 = vmatpush.msrb.mxu3 %v1763_v52  ;;  %1836 = vmatpush.msra.mxu1 %v1774_v38 }
 0xd38   :  { %2805 = vmatmul.msk.f32.vlgmr.msrb.gmra.mxu3 %vm653_vm15, %v4347_v11 }
 0xd39   :  { %1837 = vmatpush.msra.mxu1 %v1773_v2 }
 0xd3a   :  { %2809 = vmatmul.msk.f32.vlgmr.msra.gmra.mxu1 %vm653_vm15, %v4351_v53 }
 0xd3b   :  { %2817 = vmatpush.msk.msrb.mxu1 %vm206_vm0, %v3914_v3  ;;  %v2145_v3 = vmin.f32 %v2143_v14, 6.0 }
 0xd3d   :  { %2163 = vmatpush.msrb.mxu1 %v3921_v10  ;;  %v2142_v10 = vadd.f32 3.0, %v4286_v60 }
 0xd3f   :  { %2164 = vmatpush.msrb.mxu1 %v3927_v59  ;;  %v2147_v59 = vmul.f32 %v2145_v3, %v2139_v20  ;;  %v2144_v2 = vmax.f32 %v2142_v10, 0.0 }
 0xd40   :  { %2806 = vmatmul.msk.f32.gmra.mxu3 %vm653_vm15, %v4361_v49 }
 0xd41   :  { %2165 = vmatpush.msrb.mxu1 %v3933_v19  ;;  %v4378_v19 = vmul.f32 0.16666667, %v2147_v59  ;;  %v2146_v24 = vmin.f32 %v2144_v2, 6.0 }
 0xd42   :  { %2810 = vmatmul.msk.f32.gmra.mxu1 %vm653_vm15, %v4364_v22 }
 0xd43   :  { %2166 = vmatpush.msrb.mxu1 %v3947_v23  ;;  %v2148_v23 = vmul.f32 %v2146_v24, %v4286_v60 }
 0xd45   :  { %2167 = vmatpush.msrb.mxu1 %v3956_v57  ;;  %v4384_v57 = vmul.f32 0.16666667, %v2148_v23 }
 0xd47   :  { %2168 = vmatpush.msrb.mxu1 %v3965_v27  ;;  %v4391_v27 = vld [vmem:[%s4649_s7 + $0x30] sm:$0xff] }
 0xd48   :  { %4724 = vst [vmem:[#allocation23_spill] sm:$0xff] %v4391_v27 }
 0xd49   :  { %2169 = vmatpush.msrb.mxu1 %v3974_v32 }
 0xd4b   :  { %2170 = vmatpush.msrb.mxu1 %v3985_v40 }
 0xd4d   :  { %2171 = vmatpush.msrb.mxu1 %v3997_v47  ;;  %v4397_v47 = vld [vmem:[%s4649_s7 + $0x20] sm:$0xff] }
 0xd4e   :  { %4725 = vst [vmem:[#allocation25_spill] sm:$0xff] %v4397_v47 }
 0xd4f   :  { %2172 = vmatpush.msrb.mxu1 %v4008_v51 }
 0xd50   :  { %2818 = vmatmul.msk.f32.vlgmr.msrb.gmra.mxu1 %vm202_vm1, %v4378_v19 }
 0xd58   :  { %2819 = vmatmul.msk.f32.gmra.mxu1 %vm202_vm1, %v4384_v57 }
 0xdb7   :  { %v1839_v32 = vpop.f32.mrf.mxu1 }
 0xdb8   :  { %v1840_v40 = vadd.f32 %v4391_v27, %v1839_v32 }
 0xdba   :  { %v1883_v51 = vsub.f32 0.0, %v1840_v40 }
 0xdbb   :  { %v1804_v60 = vpop.f32.mrf.mxu3 }
 0xdbc   :  { %v1885_v46 = vmul.f32 1.442695, %v1883_v51  ;;  %v1805_v26 = vadd.f32 %v4397_v47, %v1804_v60 }
 0xdbe   :  { %2930 = vpow2.f32 %v1885_v46  ;;  %v1845_v55 = vsub.f32 0.0, %v1805_v26 }
 0xdbf   :  { %v1842_v54 = vpop.f32.mrf.mxu1 }
 0xdc0   :  { %v1847_v52 = vmul.f32 1.442695, %v1845_v55  ;;  %v1843_v38 = vadd.f32 %v4403_v61, %v1842_v54 }
 0xdc2   :  { %2932 = vpow2.f32 %v1847_v52  ;;  %v1884_v20 = vsub.f32 0.0, %v1843_v38 }
 0xdc3   :  { %v1807_v5 = vpop.f32.mrf.mxu3 }
 0xdc4   :  { %v2931_v14 = vpop.eup %2930  ;;  %v1887_v3 = vmul.f32 1.442695, %v1884_v20  ;;  %v1808_v10 = vadd.f32 %v4409_v48, %v1807_v5 }
 0xdc5   :  { %v1889_v59 = vadd.f32 1.0, %v2931_v14 }
 0xdc6   :  { %2934 = vpow2.f32 %v1887_v3  ;;  %v1846_v2 = vsub.f32 0.0, %v1808_v10 }
 0xdc7   :  { %2936 = vrcp.f32 %v1889_v59  ;;  %vm1896_vm10 = vweird.f32 %v1889_v59  ;;  %v1900_v10 = vand.u32 2147483647, %v1889_v59 }
 0xdc8   :  { %v2933_v24 = vpop.eup %2932  ;;  %v1849_v23 = vmul.f32 1.442695, %v1846_v2  ;;  %v1902_v2 = vand.u32 2147483648, %v1889_v59 }
 0xdc9   :  { %v1851_v32 = vadd.f32 1.0, %v2933_v24  ;;  %vm1901_vm14 = vcmp.eq.f32.partialorder %v1900_v10, 8.507059e+37 }
 0xdca   :  { %2938 = vpow2.f32 %v1849_v23  ;;  %v1903_v27 = vor.u32 1.1754944e-38, %v1902_v2 }
 0xdcb   :  { %2940 = vrcp.f32 %v1851_v32  ;;  %v1864_v24 = vand.u32 2147483648, %v1851_v32  ;;  %vm1858_vm13 = vweird.f32 %v1851_v32 }
 0xdcc   :  { %v2935_v40 = vpop.eup %2934 }
 0xdcd   :  { %v2937_v51 = vpop.eup %2936  ;;  %v1890_v60 = vadd.f32 1.0, %v2935_v40  ;;  %v1862_v40 = vand.u32 2147483647, %v1851_v32 }
 0xdce   :  { %v1892_v46 = vmul.f32 %v2937_v51, %v1889_v59  ;;  %vm1897_vm9 = vweird.f32 %v2937_v51 }
 0xdcf   :  { %2942 = vrcp.f32 %v1890_v60  ;;  %vm1898_vm12 = vmor %vm1896_vm10, %vm1897_vm9  ;;  %vm1863_vm4 = vcmp.eq.f32.partialorder %v1862_v40, 8.507059e+37  ;;  %vm1911_vm6 = vweird.f32 %v1890_v60 }
 0xdd0   :  { %v2939_v26 = vpop.eup %2938  ;;  %v1893_v55 = vsub.f32 1.0, %v1892_v46 }
 0xdd1   :  { %v2941_v54 = vpop.eup %2940  ;;  %v1852_v52 = vadd.f32 1.0, %v2939_v26 }
 0xdd2   :  { %v1894_v38 = vmul.f32 %v2937_v51, %v1893_v55  ;;  %v1854_v20 = vmul.f32 %v2941_v54, %v1851_v32  ;;  %vm1859_vm11 = vweird.f32 %v2941_v54 }
 0xdd3   :  { %2944 = vrcp.f32 %v1852_v52  ;;  %vm1860_vm3 = vmor %vm1858_vm13, %vm1859_vm11  ;;  %v1879_v32 = vand.u32 2147483648, %v1852_v52  ;;  %v1877_v10 = vand.u32 2147483647, %v1852_v52  ;;  %vm1873_vm9 = vweird.f32 %v1852_v52 }
 0xdd4   :  { %v1895_v5 = vadd.f32 %v2937_v51, %v1894_v38  ;;  %v1855_v14 = vsub.f32 1.0, %v1854_v20  ;;  %v1865_v38 = vor.u32 1.1754944e-38, %v1864_v24 }
 0xdd5   :  { %v2943_v3 = vpop.eup %2942 }
 0xdd6   :  { %v1856_v23 = vmul.f32 %v2941_v54, %v1855_v14  ;;  %v1907_v61 = vmul.f32 %v2943_v3, %v1890_v60  ;;  %v1899_v48 = vsel %vm1898_vm12, %v2937_v51, %v1895_v5  ;;  %vm1912_vm5 = vweird.f32 %v2943_v3 }
 0xdd7   :  { %v1904_v59 = vsel %vm1901_vm14, %v1903_v27, %v1899_v48  ;;  %v1915_v51 = vand.u32 2147483647, %v1890_v60  ;;  %v1917_v5 = vand.u32 2147483648, %v1890_v60  ;;  %vm1913_vm8 = vmor %vm1911_vm6, %vm1912_vm5  ;;  %v1880_v27 = vor.u32 1.1754944e-38, %v1879_v32 }
 0xdd8   :  { %v1857_v46 = vadd.f32 %v2941_v54, %v1856_v23  ;;  %v1908_v26 = vsub.f32 1.0, %v1907_v61  ;;  %vm1878_vm12 = vcmp.eq.f32.partialorder %v1877_v10, 8.507059e+37 }
 0xdd9   :  { %v2945_v55 = vpop.eup %2944  ;;  %v1918_v40 = vor.u32 1.1754944e-38, %v1917_v5  ;;  %vm1916_vm11 = vcmp.eq.f32.partialorder %v1915_v51, 8.507059e+37 }
 0xdda   :  { %v1861_v20 = vsel %vm1860_vm3, %v2941_v54, %v1857_v46  ;;  %v1909_v47 = vmul.f32 %v2943_v3, %v1908_v26  ;;  %v1869_v49 = vmul.f32 %v2945_v55, %v1852_v52  ;;  %vm1874_vm7 = vweird.f32 %v2945_v55 }
 0xddb   :  { %v1866_v22 = vsel %vm1863_vm4, %v1865_v38, %v1861_v20  ;;  %vm1875_vm10 = vmor %vm1873_vm9, %vm1874_vm7 }
 0xddc   :  { %v1921_v14 = vmul.f32 %v1904_v59, %v1866_v22  ;;  %v1910_v53 = vadd.f32 %v2943_v3, %v1909_v47  ;;  %v1870_v11 = vsub.f32 1.0, %v1869_v49 }
 0xdde   :  { %v2811_v61 = vadd.f32 -0.2, %v1921_v14  ;;  %v1871_v23 = vmul.f32 %v2945_v55, %v1870_v11  ;;  %v1914_v2 = vsel %vm1913_vm8, %v2943_v3, %v1910_v53 }
 0xddf   :  { %v1919_v47 = vsel %vm1916_vm11, %v1918_v40, %v1914_v2 }
 0xde0   :  { %v1872_v54 = vadd.f32 %v2945_v55, %v1871_v23  ;;  %v1925_v24 = vmul.f32 2.0, %v2811_v61 }
 0xde2   :  { %v1876_v22 = vsel %vm1875_vm10, %v2945_v55, %v1872_v54  ;;  %v1927_v49 = vsub.f32 0.0, %v1925_v24 }
 0xde3   :  { %v1881_v48 = vsel %vm1878_vm12, %v1880_v27, %v1876_v22 }
 0xde4   :  { %v1922_v60 = vmul.f32 %v1919_v47, %v1881_v48  ;;  %v1929_v46 = vmul.f32 1.442695, %v1927_v49 }
 0xde6   :  { %v2812_v26 = vadd.f32 -0.2, %v1922_v60  ;;  %2946 = vpow2.f32 %v1929_v46 }
 0xde8   :  { %v1926_v11 = vmul.f32 2.0, %v2812_v26 }
 0xdea   :  { %v1928_v38 = vsub.f32 0.0, %v1926_v11 }
 0xdec   :  { %v2947_v20 = vpop.eup %2946  ;;  %v1931_v53 = vmul.f32 1.442695, %v1928_v38 }
 0xded   :  { %v1933_v3 = vadd.f32 1.0, %v2947_v20 }
 0xdee   :  { %2948 = vpow2.f32 %v1931_v53 }
 0xdef   :  { %2950 = vrcp.f32 %v1933_v3  ;;  %v1946_v5 = vand.u32 2147483648, %v1933_v3  ;;  %v1944_v61 = vand.u32 2147483647, %v1933_v3  ;;  %vm1940_vm14 = vweird.f32 %v1933_v3 }
 0xdf1   :  { %v1947_v2 = vor.u32 1.1754944e-38, %v1946_v5  ;;  %vm1945_vm4 = vcmp.eq.f32.partialorder %v1944_v61, 8.507059e+37  ;;  %v3056_v5 = vld [vmem:[%s4644_s2 + $0x70] sm:$0xff]  ;;  %v3058_v61 = vld [vmem:[%s4644_s2 + $0x60] sm:$0xff] }
 0xdf4   :  { %v2949_v52 = vpop.eup %2948 }
 0xdf5   :  { %v2951_v59 = vpop.eup %2950  ;;  %v1934_v14 = vadd.f32 1.0, %v2949_v52  ;;  %v3049_v52 = vld [vmem:[%s4644_s2 + $0xa8] sm:$0x1] }
 0xdf6   :  { %v1936_v51 = vmul.f32 %v2951_v59, %v1933_v3  ;;  %vm1941_vm13 = vweird.f32 %v2951_v59  ;;  %v4417_v3 = vld [vmem:[%s4651_s9] sm:$0xff] }
 0xdf7   :  { %2952 = vrcp.f32 %v1934_v14  ;;  %vm1942_vm3 = vmor %vm1940_vm14, %vm1941_vm13  ;;  %v1961_v22 = vand.u32 2147483648, %v1934_v14  ;;  %v1959_v47 = vand.u32 2147483647, %v1934_v14  ;;  %vm1955_vm6 = vweird.f32 %v1934_v14 }
 0xdf8   :  { %v1937_v55 = vsub.f32 1.0, %v1936_v51  ;;  %v3054_v51 = vld [vmem:[%s4644_s2 + $0x80] sm:$0xff] }
 0xdf9   :  { %v1962_v60 = vor.u32 1.1754944e-38, %v1961_v22  ;;  %vm1960_vm8 = vcmp.eq.f32.partialorder %v1959_v47, 8.507059e+37 }
 0xdfa   :  { %v1938_v32 = vmul.f32 %v2951_v59, %v1937_v55  ;;  %v3055_v55 = vld [vmem:[%s4644_s2 + $0x78] sm:$0xff] }
 0xdfc   :  { %v1939_v23 = vadd.f32 %v2951_v59, %v1938_v32  ;;  %v3057_v32 = vld [vmem:[%s4644_s2 + $0x68] sm:$0xff] }
 0xdfd   :  { %v2953_v10 = vpop.eup %2952 }
 0xdfe   :  { %v1943_v54 = vsel %vm1942_vm3, %v2951_v59, %v1939_v23  ;;  %v1951_v24 = vmul.f32 %v2953_v10, %v1934_v14  ;;  %vm1956_vm5 = vweird.f32 %v2953_v10  ;;  %v3052_v59 = vld [vmem:[%s4644_s2 + $0x90] sm:$0xff]  ;;  %v3053_v14 = vld [vmem:[%s4644_s2 + $0x88] sm:$0xff]  ;;  %v3059_v23 = vld [vmem:[%s4644_s2 + $0x58] sm:$0xff] }
 0xdff   :  { %v1948_v40 = vsel %vm1945_vm4, %v1947_v2, %v1943_v54  ;;  %vm1957_vm7 = vmor %vm1955_vm6, %vm1956_vm5 }
 0xe00   :  { %1967 = vperm.xlu1 %2851, %v1948_v40   ;;  %v1952_v27 = vsub.f32 1.0, %v1951_v24 }
 0xe02   :  { %v1953_v49 = vmul.f32 %v2953_v10, %v1952_v27 }
 0xe04   :  { %v1954_v48 = vadd.f32 %v2953_v10, %v1953_v49 }
 0xe06   :  { %v1958_v46 = vsel %vm1957_vm7, %v2953_v10, %v1954_v48  ;;  %v4459_v10 = vpop.permute.xlu2 %1982  ;;  %v4469_v48 = vld [vmem:[#allocation4 + $0x10] sm:$0xff] }
 0xe07   :  { %v1963_v26 = vsel %vm1960_vm8, %v1962_v60, %v1958_v46  ;;  %v4471_v46 = vld [vmem:[#allocation4 + $0x18] sm:$0xff] }
 0xe08   :  { %1972 = vperm.xlu0 %2850, %v1963_v26  }
 0xe72   :  { %v1968_v11 = vpop.permute.xlu1 %1967 }
 0xe73   :  { %v1975_v53 = vmul.f32 %v1968_v11, %v4320_v13  ;;  %v3050_v13 = vld [vmem:[%s4644_s2 + $0xa0] sm:$0xff] }
 0xe7a   :  { %v1973_v38 = vpop.permute.xlu0 %1972 }
 0xe7b   :  { %v1976_v20 = vmul.f32 %v1973_v38, %v4340_v9  ;;  %v3051_v9 = vld [vmem:[%s4644_s2 + $0x98] sm:$0xff] }
 0xe7d   :  { %2002 = vmatpush.msrb.mxu2 %v1976_v20 }
 0xe7f   :  { %2003 = vmatpush.msrb.mxu2 %v1975_v53 }
 0xe80   :  { %2813 = vmatmul.msk.f32.vlgmr.msrb.gmra.mxu2 %vm653_vm15, %v4417_v3 }
 0xe81   :  { %2820 = vmatpush.msk.msra.mxu2 %vm206_vm0, %v3049_v52 }
 0xe83   :  { %2186 = vmatpush.msra.mxu2 %v3050_v13 }
 0xe85   :  { %2187 = vmatpush.msra.mxu2 %v3051_v9 }
 0xe87   :  { %2188 = vmatpush.msra.mxu2 %v3052_v59 }
 0xe89   :  { %2189 = vmatpush.msra.mxu2 %v3053_v14 }
 0xe8b   :  { %2190 = vmatpush.msra.mxu2 %v3054_v51 }
 0xe8d   :  { %2191 = vmatpush.msra.mxu2 %v3055_v55 }
 0xe8f   :  { %2192 = vmatpush.msra.mxu2 %v3056_v5 }
 0xe91   :  { %2193 = vmatpush.msra.mxu2 %v3057_v32 }
 0xe93   :  { %2194 = vmatpush.msra.mxu2 %v3058_v61 }
 0xe95   :  { %2195 = vmatpush.msra.mxu2 %v3059_v23 }
 0xe96   :  { %2821 = vmatmul.msk.f32.vlgmr.msra.gmra.mxu2 %vm202_vm1, %v4378_v19 }
 0xe9e   :  { %2822 = vmatmul.msk.f32.gmra.mxu2 %vm202_vm1, %v4384_v57 }
 0xf03   :  { %v2005_v2 = vpop.f32.mrf.mxu2 }
 0xf04   :  { %v4462_v54 = vadd.f32 %v2005_v2, %v4459_v10 }
 0xf06   :  { %v2008_v24 = vsel %vm202_vm1, %v4462_v54, 0.0  ;;  %v2012_v40 = vmul.f32 %v4330_v1, %v4462_v54 }
 0xf07   :  { %2009 = vadd.xlane.f32.xlu1 %v2008_v24 }
 0xf08   :  { %v2013_v27 = vsel %vm202_vm1, %v2012_v40, 0.0 }
 0xf09   :  { %2014 = vadd.xlane.f32.xlu0 %v2013_v27  ;;  %v2252_v27 = vmul.f32 %v4384_v57, %v4292_v31 }
 0xf19   :  { %v2197_v38 = vpop.f32.mrf.mxu2 }
 0xf21   :  { %v2200_v31 = vpop.f32.mrf.mxu2 }
 0xf7a   :  { %v2010_v22 = vpop.xlane.xlu1 %2009 }
 0xf7b   :  { %v2011_v49 = vmul.f32 0.012345679, %v2010_v22 }
 0xf7c   :  { %v2015_v47 = vpop.xlane.xlu0 %2014 }
 0xf7d   :  { %v2016_v60 = vmul.f32 0.012345679, %v2015_v47  ;;  %2039 = vmatpush.msra.mxu0 %v2011_v49 }
 0xf7e   :  { %2814 = vmatmul.msk.f32.vlgmr.msra.gmra.mxu0 %vm302_vm2, %v4469_v48 }
 0xf7f   :  { %2823 = vmatpush.msk.msrb.mxu0 %vm206_vm0, %v4062_v21  ;;  %2066 = vmatpush.msra.mxu3 %v2016_v60  ;;  %v4509_v21 = vld [vmem:[#allocation7 + $0x10] sm:$0xff] }
 0xf80   :  { %2815 = vmatmul.msk.f32.vlgmr.msra.gmra.mxu3 %vm302_vm2, %v4471_v46 }
 0xf81   :  { %2209 = vmatpush.msrb.mxu0 %v4069_v63  ;;  %2826 = vmatpush.msk.msrb.mxu3 %vm206_vm0, %v4183_v33 }
 0xf83   :  { %2210 = vmatpush.msrb.mxu0 %v4080_v28  ;;  %2232 = vmatpush.msrb.mxu3 %v4190_v30 }
 0xf85   :  { %2211 = vmatpush.msrb.mxu0 %v4086_v58  ;;  %2233 = vmatpush.msrb.mxu3 %v4196_v7 }
 0xf87   :  { %2212 = vmatpush.msrb.mxu0 %v4094_v4  ;;  %2234 = vmatpush.msrb.mxu3 %v4202_v37 }
 0xf89   :  { %2213 = vmatpush.msrb.mxu0 %v4100_v56  ;;  %2235 = vmatpush.msrb.mxu3 %v4210_v42  ;;  %v4512_v56 = vld [vmem:[#allocation7 + $0x18] sm:$0xff] }
 0xf8b   :  { %2214 = vmatpush.msrb.mxu0 %v4106_v34  ;;  %2236 = vmatpush.msrb.mxu3 %v4216_v25 }
 0xf8d   :  { %2215 = vmatpush.msrb.mxu0 %v4112_v35  ;;  %2237 = vmatpush.msrb.mxu3 %v4222_v8 }
 0xf8f   :  { %2216 = vmatpush.msrb.mxu0 %v4118_v16  ;;  %2238 = vmatpush.msrb.mxu3 %v4228_v15  ;;  %v2174_v15 = vpop.f32.mrf.mxu1 }
 0xf90   :  { %v2259_v11 = vmul.f32 %v2174_v15, %v4311_v45 }
 0xf91   :  { %2217 = vmatpush.msrb.mxu0 %v4124_v18  ;;  %2239 = vmatpush.msrb.mxu3 %v4234_v36 }
 0xf93   :  { %2218 = vmatpush.msrb.mxu0 %v4130_v43  ;;  %2240 = vmatpush.msrb.mxu3 %v4240_v12 }
 0xf94   :  { %2824 = vmatmul.msk.f32.vlgmr.msrb.gmra.mxu0 %vm202_vm1, %v4378_v19 }
 0xf95   :  { %2241 = vmatpush.msrb.mxu3 %v4246_v0  ;;  %v2251_v0 = vmul.f32 %v4378_v19, %v4304_v41 }
 0xf96   :  { %2827 = vmatmul.msk.f32.vlgmr.msrb.gmra.mxu3 %vm202_vm1, %v4378_v19  ;;  %v2263_v19 = vmul.f32 %v2197_v38, %v4314_v6 }
 0xf97   :  { %v2177_v22 = vpop.f32.mrf.mxu1 }
 0xf9c   :  { %2825 = vmatmul.msk.f32.gmra.mxu0 %vm202_vm1, %v4384_v57 }
 0xf9e   :  { %2828 = vmatmul.msk.f32.gmra.mxu3 %vm202_vm1, %v4384_v57 }
 0xffb   :  { %v2041_v63 = vpop.f32.mrf.mxu0 }
 0xffc   :  { %v2042_v28 = vadd.f32 %v2041_v63, %v4509_v21 }
 0xffe   :  { %v2071_v58 = vsub.f32 0.0, %v2042_v28 }
0x1000   :  { %v2072_v4 = vmul.f32 1.442695, %v2071_v58  ;;  %v4734_v58 = vld [vmem:[#allocation16_spill] sm:$0xff] }
0x1002   :  { %2954 = vpow2.f32 %v2072_v4 }
0x1003   :  { %v2068_v34 = vpop.f32.mrf.mxu3 }
0x1004   :  { %v2069_v35 = vadd.f32 %v2068_v34, %v4512_v56  ;;  %v2260_v34 = vmul.f32 %v2177_v22, %v4300_v29  ;;  %v4743_v22 = vld [vmem:[#allocation22_spill] sm:$0xff] }
0x1006   :  { %v2090_v16 = vsub.f32 0.0, %v2069_v35 }
0x1008   :  { %v2091_v18 = vmul.f32 1.442695, %v2090_v16  ;;  %v2955_v43 = vpop.eup %2954 }
0x1009   :  { %v2074_v33 = vadd.f32 1.0, %v2955_v43 }
0x100a   :  { %2956 = vpow2.f32 %v2091_v18 }
0x100b   :  { %2958 = vrcp.f32 %v2074_v33  ;;  %vm2080_vm0 = vweird.f32 %v2074_v33  ;;  %v2084_v20 = vand.u32 2147483647, %v2074_v33  ;;  %v2086_v59 = vand.u32 2147483648, %v2074_v33 }
0x100d   :  { %vm4527_vm13 = vcmp.eq.f32.partialorder %v2084_v20, 8.507059e+37  ;;  %v2087_v2 = vor.u32 1.1754944e-38, %v2086_v59  ;;  %v4740_v59 = vld [vmem:[#allocation25_spill] sm:$0xff] }
0x1010   :  { %v2957_v30 = vpop.eup %2956 }
0x1011   :  { %v2093_v7 = vadd.f32 1.0, %v2957_v30  ;;  %v2220_v37 = vpop.f32.mrf.mxu0  ;;  %v2959_v42 = vpop.eup %2958 }
0x1012   :  { %v2076_v25 = vmul.f32 %v2959_v42, %v2074_v33  ;;  %v2249_v36 = vmul.f32 %v2220_v37, %v4298_v44  ;;  %vm2081_vm9 = vweird.f32 %v2959_v42  ;;  %v4735_v37 = vld [vmem:[#allocation17_spill] sm:$0xff] }
0x1013   :  { %2960 = vrcp.f32 %v2093_v7  ;;  %vm2099_vm10 = vweird.f32 %v2093_v7  ;;  %v2103_v14 = vand.u32 2147483647, %v2093_v7  ;;  %v2105_v44 = vand.u32 2147483648, %v2093_v7  ;;  %vm4521_vm12 = vmor %vm2080_vm0, %vm2081_vm9 }
0x1014   :  { %v2077_v8 = vsub.f32 1.0, %v2076_v25  ;;  %v2253_v13 = vadd.f32 %v2251_v0, %v2249_v36 }
0x1015   :  { %v2106_v40 = vor.u32 1.1754944e-38, %v2105_v44  ;;  %vm2104_vm3 = vcmp.eq.f32.partialorder %v2103_v14, 8.507059e+37 }
0x1016   :  { %v2078_v12 = vmul.f32 %v2959_v42, %v2077_v8 }
0x1018   :  { %v2079_v55 = vadd.f32 %v2959_v42, %v2078_v12 }
0x1019   :  { %v2961_v26 = vpop.eup %2960  ;;  %v2243_v53 = vpop.f32.mrf.mxu3 }
0x101a   :  { %v2095_v52 = vmul.f32 %v2961_v26, %v2093_v7  ;;  %v2255_v9 = vmul.f32 %v2243_v53, %v4302_v50  ;;  %v2223_v51 = vpop.f32.mrf.mxu0  ;;  %vm2100_vm11 = vweird.f32 %v2961_v26  ;;  %v2083_v6 = vsel %vm4521_vm12, %v2959_v42, %v2079_v55  ;;  %v4737_v53 = vld [vmem:[#allocation19_spill] sm:$0xff] }
0x101b   :  { %v2250_v61 = vmul.f32 %v2223_v51, %v4294_v39  ;;  %vm4532_vm14 = vmor %vm2099_vm10, %vm2100_vm11  ;;  %v2088_v57 = vsel %vm4527_vm13, %v2087_v2, %v2083_v6 }
0x101c   :  { %v2096_v5 = vsub.f32 1.0, %v2095_v52  ;;  %v2257_v41 = vadd.f32 %v2255_v9, %v2253_v13  ;;  %v4738_v52 = vld [vmem:[#allocation21_spill] sm:$0xff]  ;;  %v4739_v13 = vld [vmem:[#allocation20_spill] sm:$0xff] }
0x101d   :  { %v2254_v63 = vadd.f32 %v2252_v27, %v2250_v61 }
0x101e   :  { %v2097_v32 = vmul.f32 %v2961_v26, %v2096_v5  ;;  %v2261_v50 = vadd.f32 %v2259_v11, %v2257_v41  ;;  %v4741_v5 = vld [vmem:[#allocation23_spill] sm:$0xff] }
0x1020   :  { %v2098_v39 = vadd.f32 %v2961_v26, %v2097_v32  ;;  %v2265_v49 = vadd.f32 %v2263_v19, %v2261_v50  ;;  %v4742_v32 = vld [vmem:[#allocation24_spill] sm:$0xff] }
0x1021   :  { %v2246_v47 = vpop.f32.mrf.mxu3 }
0x1022   :  { %v2102_v60 = vsel %vm4532_vm14, %v2961_v26, %v2098_v39  ;;  %v2256_v28 = vmul.f32 %v2246_v47, %v4296_v17  ;;  %v4544_v4 = vadd.f32 %v2265_v49, %v4734_v58  ;;  %v2264_v17 = vmul.f32 %v2200_v31, %v4306_v62 }
0x1023   :  { %v2107_v35 = vsel %vm2104_vm3, %v2106_v40, %v2102_v60 }
0x1024   :  { %v4549_v16 = vmul.f32 %v2107_v35, %v2088_v57  ;;  %v2258_v18 = vadd.f32 %v2256_v28, %v2254_v63  ;;  %v2269_v43 = vsel %vm202_vm1, %v4544_v4, 0.0  ;;  %v2277_v33 = vmul.f32 %v4330_v1, %v4544_v4 }
0x1025   :  { %2270 = vadd.xlane.f32.xlu1 %v2269_v43 }
0x1026   :  { %v2262_v30 = vadd.f32 %v2260_v34, %v2258_v18  ;;  %v2279_v29 = vsel %vm202_vm1, %v2277_v33, 0.0 }
0x1027   :  { %2280 = vadd.xlane.f32.xlu0 %v2279_v29 }
0x1028   :  { %v2266_v7 = vadd.f32 %v2264_v17, %v2262_v30 }
0x102a   :  { %v4558_v42 = vadd.f32 %v2266_v7, %v4735_v37 }
0x102c   :  { %v2278_v25 = vmul.f32 %v4330_v1, %v4558_v42  ;;  %v2272_v15 = vsel %vm202_vm1, %v4558_v42, 0.0  ;;  %v4736_v1 = vld [vmem:[#allocation18_spill] sm:$0xff] }
0x102e   :  { %v2282_v8 = vsel %vm202_vm1, %v2278_v25, 0.0 }
0x102f   :  { %2283 = vadd.xlane.f32.xlu2 %v2282_v8  ;;  %2273 = vadd.xlane.f32.xlu0 %v2272_v15 }
0x1098   :  { %v2271_v62 = vpop.xlane.xlu1 %2270 }
0x1099   :  { %v2275_v38 = vmul.f32 0.012345679, %v2271_v62 }
0x109a   :  { %v2281_v36 = vpop.xlane.xlu0 %2280 }
0x109b   :  { %v2285_v20 = vmul.f32 0.012345679, %v2281_v36 }
0x10a2   :  { %v2284_v12 = vpop.xlane.xlu2 %2283  ;;  %v2274_v0 = vpop.xlane.xlu0 %2273 }
0x10a3   :  { %v2286_v26 = vmul.f32 0.012345679, %v2284_v12  ;;  %v2276_v11 = vmul.f32 0.012345679, %v2274_v0 }
0x10a5   :  { %2301 = vmatpush.msra.mxu1 %v2276_v11  ;;  %2324 = vmatpush.msrb.mxu2 %v2286_v26 }
0x10a7   :  { %2302 = vmatpush.msra.mxu1 %v2275_v38  ;;  %2325 = vmatpush.msrb.mxu2 %v2285_v20 }
0x10a8   :  { %2829 = vmatmul.msk.f32.vlgmr.msra.gmra.mxu1 %vm653_vm15, %v4736_v1  ;;  %2831 = vmatmul.msk.f32.vlgmr.msrb.gmra.mxu2 %vm653_vm15, %v4737_v53 }
0x10b0   :  { %2832 = vmatmul.msk.f32.gmra.mxu2 %vm653_vm15, %v4738_v52  ;;  %2830 = vmatmul.msk.f32.gmra.mxu1 %vm653_vm15, %v4739_v13 }
0x1125   :  { %v2304_v9 = vpop.f32.mrf.mxu1 }
0x1126   :  { %v2305_v14 = vadd.f32 %v4740_v59, %v2304_v9 }
0x1128   :  { %v2333_v44 = vsub.f32 0.0, %v2305_v14 }
0x112a   :  { %v2335_v51 = vmul.f32 1.442695, %v2333_v44 }
0x112b   :  { %v2327_v55 = vpop.f32.mrf.mxu2 }
0x112c   :  { %2962 = vpow2.f32 %v2335_v51  ;;  %v2328_v41 = vadd.f32 %v4741_v5, %v2327_v55 }
0x112d   :  { %v2307_v45 = vpop.f32.mrf.mxu1 }
0x112e   :  { %v2371_v19 = vsub.f32 0.0, %v2328_v41  ;;  %v2308_v61 = vadd.f32 %v4742_v32, %v2307_v45 }
0x1130   :  { %v2373_v50 = vmul.f32 1.442695, %v2371_v19  ;;  %v2334_v23 = vsub.f32 0.0, %v2308_v61 }
0x1132   :  { %v2963_v2 = vpop.eup %2962  ;;  %2964 = vpow2.f32 %v2373_v50  ;;  %v2337_v24 = vmul.f32 1.442695, %v2334_v23 }
0x1133   :  { %v2339_v40 = vadd.f32 1.0, %v2963_v2  ;;  %v2330_v27 = vpop.f32.mrf.mxu2 }
0x1134   :  { %2966 = vpow2.f32 %v2337_v24  ;;  %v2331_v6 = vadd.f32 %v4743_v22, %v2330_v27 }
0x1135   :  { %2968 = vrcp.f32 %v2339_v40  ;;  %v2350_v17 = vand.u32 2147483647, %v2339_v40  ;;  %v2352_v30 = vand.u32 2147483648, %v2339_v40  ;;  %vm2346_vm4 = vweird.f32 %v2339_v40 }
0x1136   :  { %v2372_v39 = vsub.f32 0.0, %v2331_v6 }
0x1137   :  { %vm4581_vm8 = vcmp.eq.f32.partialorder %v2350_v17, 8.507059e+37  ;;  %v2353_v0 = vor.u32 1.1754944e-38, %v2352_v30 }
0x1138   :  { %v2965_v49 = vpop.eup %2964  ;;  %v2375_v47 = vmul.f32 1.442695, %v2372_v39 }
0x1139   :  { %v2377_v60 = vadd.f32 1.0, %v2965_v49 }
0x113a   :  { %v2967_v63 = vpop.eup %2966  ;;  %2970 = vpow2.f32 %v2375_v47 }
0x113b   :  { %v2969_v28 = vpop.eup %2968  ;;  %2972 = vrcp.f32 %v2377_v60  ;;  %v2340_v34 = vadd.f32 1.0, %v2967_v63  ;;  %v2388_v25 = vand.u32 2147483647, %v2377_v60  ;;  %v2390_v8 = vand.u32 2147483648, %v2377_v60 }
0x113c   :  { %v2342_v58 = vmul.f32 %v2969_v28, %v2339_v40  ;;  %vm2347_vm5 = vweird.f32 %v2969_v28  ;;  %vm2384_vm0 = vweird.f32 %v2377_v60 }
0x113d   :  { %2974 = vrcp.f32 %v2340_v34  ;;  %vm4577_vm7 = vmor %vm2346_vm4, %vm2347_vm5  ;;  %vm2361_vm9 = vweird.f32 %v2340_v34  ;;  %vm2389_vm12 = vcmp.eq.f32.partialorder %v2388_v25, 8.507059e+37  ;;  %v2391_v1 = vor.u32 1.1754944e-38, %v2390_v8 }
0x113e   :  { %v2343_v31 = vsub.f32 1.0, %v2342_v58  ;;  %v2367_v52 = vand.u32 2147483648, %v2340_v34  ;;  %v2365_v9 = vand.u32 2147483647, %v2340_v34 }
0x1140   :  { %v2971_v57 = vpop.eup %2970  ;;  %v2344_v35 = vmul.f32 %v2969_v28, %v2343_v31  ;;  %v2368_v32 = vor.u32 1.1754944e-38, %v2367_v52  ;;  %vm2366_vm4 = vcmp.eq.f32.partialorder %v2365_v9, 8.507059e+37 }
0x1141   :  { %v2973_v18 = vpop.eup %2972  ;;  %v2378_v43 = vadd.f32 1.0, %v2971_v57 }
0x1142   :  { %v2380_v33 = vmul.f32 %v2973_v18, %v2377_v60  ;;  %v2345_v7 = vadd.f32 %v2969_v28, %v2344_v35  ;;  %vm2385_vm6 = vweird.f32 %v2973_v18 }
0x1143   :  { %2976 = vrcp.f32 %v2378_v43  ;;  %v2975_v29 = vpop.eup %2974  ;;  %vm2386_vm11 = vmor %vm2384_vm0, %vm2385_vm6  ;;  %vm2399_vm13 = vweird.f32 %v2378_v43  ;;  %v2405_v5 = vand.u32 2147483648, %v2378_v43  ;;  %v2403_v19 = vand.u32 2147483647, %v2378_v43 }
0x1144   :  { %v2381_v37 = vsub.f32 1.0, %v2380_v33  ;;  %v2357_v15 = vmul.f32 %v2975_v29, %v2340_v34  ;;  %v2349_v11 = vsel %vm4577_vm7, %v2969_v28, %v2345_v7  ;;  %vm2362_vm10 = vweird.f32 %v2975_v29 }
0x1145   :  { %v2354_v14 = vsel %vm4581_vm8, %v2353_v0, %v2349_v11  ;;  %vm4590_vm14 = vmor %vm2361_vm9, %vm2362_vm10  ;;  %v2406_v2 = vor.u32 1.1754944e-38, %v2405_v5  ;;  %vm2404_vm6 = vcmp.eq.f32.partialorder %v2403_v19, 8.507059e+37 }
0x1146   :  { %v2382_v36 = vmul.f32 %v2973_v18, %v2381_v37  ;;  %v2358_v26 = vsub.f32 1.0, %v2357_v15 }
0x1148   :  { %v2383_v38 = vadd.f32 %v2973_v18, %v2382_v36  ;;  %v2359_v53 = vmul.f32 %v2975_v29, %v2358_v26 }
0x1149   :  { %v2977_v20 = vpop.eup %2976 }
0x114a   :  { %v2387_v13 = vsel %vm2386_vm11, %v2973_v18, %v2383_v38  ;;  %v2395_v59 = vmul.f32 %v2977_v20, %v2378_v43  ;;  %v2360_v51 = vadd.f32 %v2975_v29, %v2359_v53  ;;  %vm2400_vm3 = vweird.f32 %v2977_v20 }
0x114b   :  { %v2392_v44 = vsel %vm2389_vm12, %v2391_v1, %v2387_v13  ;;  %vm2401_vm5 = vmor %vm2399_vm13, %vm2400_vm3 }
0x114c   :  { %v2409_v41 = vmul.f32 %v2392_v44, %v2354_v14  ;;  %v2396_v45 = vsub.f32 1.0, %v2395_v59  ;;  %v2364_v50 = vsel %vm4590_vm14, %v2975_v29, %v2360_v51  ;;  %v2816_v59 = vadd.f32 -0.2, %v4549_v16 }
0x114d   :  { %v2369_v27 = vsel %vm2366_vm4, %v2368_v32, %v2364_v50 }
0x114e   :  { %v2833_v61 = vadd.f32 -0.2, %v2409_v41  ;;  %v2397_v23 = vmul.f32 %v2977_v20, %v2396_v45  ;;  %v2111_v14 = vmul.f32 2.0, %v2816_v59 }
0x1150   :  { %v2398_v24 = vadd.f32 %v2977_v20, %v2397_v23  ;;  %v2413_v40 = vmul.f32 2.0, %v2833_v61  ;;  %v2112_v44 = vsub.f32 0.0, %v2111_v14 }
0x1152   :  { %v2402_v22 = vsel %vm2401_vm5, %v2977_v20, %v2398_v24  ;;  %v2415_v6 = vsub.f32 0.0, %v2413_v40  ;;  %v2113_v51 = vmul.f32 1.442695, %v2112_v44 }
0x1153   :  { %v2407_v39 = vsel %vm2404_vm6, %v2406_v2, %v2402_v22 }
0x1154   :  { %v2410_v49 = vmul.f32 %v2407_v39, %v2369_v27  ;;  %v2417_v47 = vmul.f32 1.442695, %v2415_v6 }
0x1156   :  { %v2834_v60 = vadd.f32 -0.2, %v2410_v49  ;;  %2978 = vpow2.f32 %v2417_v47 }
0x1158   :  { %v2414_v63 = vmul.f32 2.0, %v2834_v60 }
0x115a   :  { %v2416_v28 = vsub.f32 0.0, %v2414_v63 }
0x115c   :  { %v2979_v58 = vpop.eup %2978  ;;  %v2419_v34 = vmul.f32 1.442695, %v2416_v28 }
0x115d   :  { %v2421_v31 = vadd.f32 1.0, %v2979_v58 }
0x115e   :  { %2980 = vpow2.f32 %v2419_v34 }
0x115f   :  { %2982 = vrcp.f32 %v2421_v31  ;;  %v2434_v17 = vand.u32 2147483648, %v2421_v31  ;;  %v2432_v29 = vand.u32 2147483647, %v2421_v31  ;;  %vm2428_vm8 = vweird.f32 %v2421_v31 }
0x1161   :  { %v2435_v25 = vor.u32 1.1754944e-38, %v2434_v17  ;;  %vm2433_vm9 = vcmp.eq.f32.partialorder %v2432_v29, 8.507059e+37 }
0x1164   :  { %v2981_v57 = vpop.eup %2980 }
0x1165   :  { %v2983_v35 = vpop.eup %2982  ;;  %v2422_v18 = vadd.f32 1.0, %v2981_v57 }
0x1166   :  { %v2424_v43 = vmul.f32 %v2983_v35, %v2421_v31  ;;  %vm2429_vm7 = vweird.f32 %v2983_v35 }
0x1167   :  { %2984 = vrcp.f32 %v2422_v18  ;;  %vm2430_vm0 = vmor %vm2428_vm8, %vm2429_vm7  ;;  %v2449_v12 = vand.u32 2147483648, %v2422_v18  ;;  %v2447_v26 = vand.u32 2147483647, %v2422_v18  ;;  %vm2443_vm11 = vweird.f32 %v2422_v18 }
0x1168   :  { %v2425_v33 = vsub.f32 1.0, %v2424_v43  ;;  %2986 = vpow2.f32 %v2113_v51 }
0x1169   :  { %v2450_v38 = vor.u32 1.1754944e-38, %v2449_v12  ;;  %vm2448_vm13 = vcmp.eq.f32.partialorder %v2447_v26, 8.507059e+37 }
0x116a   :  { %v2426_v30 = vmul.f32 %v2983_v35, %v2425_v33 }
0x116c   :  { %v2427_v7 = vadd.f32 %v2983_v35, %v2426_v30 }
0x116d   :  { %v2985_v37 = vpop.eup %2984 }
0x116e   :  { %v2431_v8 = vsel %vm2430_vm0, %v2983_v35, %v2427_v7  ;;  %v2439_v15 = vmul.f32 %v2985_v37, %v2422_v18  ;;  %vm2444_vm10 = vweird.f32 %v2985_v37  ;;  %v2987_v5 = vpop.eup %2986 }
0x116f   :  { %v2436_v36 = vsel %vm2433_vm9, %v2435_v25, %v2431_v8  ;;  %vm2445_vm12 = vmor %vm2443_vm11, %vm2444_vm10 }
0x1170   :  { %2455 = vperm.xlu0 %2850, %v2436_v36   ;;  %v2440_v62 = vsub.f32 1.0, %v2439_v15 }
0x1172   :  { %v2441_v0 = vmul.f32 %v2985_v37, %v2440_v62 }
0x1174   :  { %v2442_v11 = vadd.f32 %v2985_v37, %v2441_v0 }
0x1176   :  { %v2446_v20 = vsel %vm2445_vm12, %v2985_v37, %v2442_v11 }
0x1177   :  { %v2451_v1 = vsel %vm2448_vm13, %v2450_v38, %v2446_v20 }
0x1178   :  { %2460 = vperm.xlu2 %2852, %v2451_v1  }
0x11d2   :  { %v2461_v53 = vpop.permute.xlu2 %2460 }
0x11d3   :  { %v2464_v52 = vmul.f32 %v2461_v53, %v4558_v42 }
0x11d5   :  { %2479 = vmatpush.msra.mxu0 %v2464_v52 }
0x11e2   :  { %v2456_v13 = vpop.permute.xlu0 %2455 }
0x11e3   :  { %v2463_v9 = vmul.f32 %v2456_v13, %v4544_v4  ;;  %v2115_v4 = vadd.f32 1.0, %v2987_v5 }
0x11e5   :  { %2480 = vmatpush.msra.mxu0 %v2463_v9  ;;  %2988 = vrcp.f32 %v2115_v4  ;;  %v2127_v23 = vand.u32 2147483648, %v2115_v4  ;;  %vm2121_vm14 = vweird.f32 %v2115_v4  ;;  %v2125_v2 = vand.u32 2147483647, %v2115_v4 }
0x11e6   :  { %2835 = vmatmul.msk.f32.vlgmr.msra.gmra.mxu0 %vm653_vm15, %v4417_v3  ;;  %v3060_v3 = vld [vmem:[%s4643_s1] ss:$0 sm:$0xff] }
0x11e7   :  { %v2128_v40 = vor.u32 1.1754944e-38, %v2127_v23  ;;  %vm2126_vm4 = vcmp.eq.f32.partialorder %v2125_v2, 8.507059e+37 }
0x11eb   :  { %v2989_v19 = vpop.eup %2988 }
0x11ec   :  { %v2117_v32 = vmul.f32 %v2989_v19, %v2115_v4  ;;  %vm2122_vm15 = vweird.f32 %v2989_v19 }
0x11ed   :  { %vm2123_vm3 = vmor %vm2121_vm14, %vm2122_vm15 }
0x11ee   :  { %v2118_v61 = vsub.f32 1.0, %v2117_v32 }
0x1263   :  { %v2482_v55 = vpop.f32.mrf.mxu0 }
0x1264   :  { %v4603_v41 = vadd.f32 %v2482_v55, %v4459_v10  ;;  %v2119_v10 = vmul.f32 %v2989_v19, %v2118_v61 }
0x1266   :  { %v2485_v42 = vsel %vm202_vm1, %v4603_v41, 0.0  ;;  %v2489_v16 = vmul.f32 %v3060_v3, %v4603_v41  ;;  %v2120_v50 = vadd.f32 %v2989_v19, %v2119_v10 }
0x1267   :  { %2486 = vadd.xlane.f32.xlu1 %v2485_v42 }
0x1268   :  { %v2490_v45 = vsel %vm202_vm1, %v2489_v16, 0.0  ;;  %v2124_v24 = vsel %vm2123_vm3, %v2989_v19, %v2120_v50 }
0x1269   :  { %v2129_v27 = vsel %vm2126_vm4, %v2128_v40, %v2124_v24 }
0x126f   :  { %2491 = vadd.xlane.f32.xlu1 %v2490_v45 }
0x1288   :  { %2133 = vperm.xlu1 %2851, %v2129_v27  }
0x12da   :  { %v2487_v22 = vpop.xlane.xlu1 %2486 }
0x12db   :  { %v2488_v6 = vmul.f32 0.012345679, %v2487_v22 }
0x12dd   :  { %2509 = vmatpush.msra.mxu3 %v2488_v6 }
0x12de   :  { %2836 = vmatmul.msk.f32.vlgmr.msra.gmra.mxu3 %vm302_vm2, %v4469_v48 }
0x12e2   :  { %v2492_v39 = vpop.xlane.xlu1 %2491 }
0x12e3   :  { %v2493_v49 = vmul.f32 0.012345679, %v2492_v39 }
0x12e5   :  { %2529 = vmatpush.msrb.mxu1 %v2493_v49 }
0x12e6   :  { %2837 = vmatmul.msk.f32.vlgmr.msrb.gmra.mxu1 %vm302_vm2, %v4471_v46 }
0x12fa   :  { %v2134_v47 = vpop.permute.xlu1 %2133 }
0x12fb   :  { %v4617_v60 = vmul.f32 %v2134_v47, %v4462_v54 }
0x12fd   :  { %v2600_v63 = vsel %vm202_vm1, %v4617_v60, 0.0 }
0x12fe   :  { %2601 = vadd.xlane.f32.xlu0 %v2600_v63 }
0x1361   :  { %v2511_v28 = vpop.f32.mrf.mxu3 }
0x1362   :  { %v2512_v58 = vadd.f32 %v2511_v28, %v4509_v21  ;;  %v2635_v28 = vld [vmem:[#allocation10 + $0x18] sm:$0xff] }
0x1363   :  { %v2531_v34 = vpop.f32.mrf.mxu1 }
0x1364   :  { %v2534_v31 = vsub.f32 0.0, %v2512_v58  ;;  %v2532_v48 = vadd.f32 %v2531_v34, %v4512_v56 }
0x1366   :  { %v2535_v57 = vmul.f32 1.442695, %v2534_v31  ;;  %v2553_v35 = vsub.f32 0.0, %v2532_v48 }
0x1368   :  { %2990 = vpow2.f32 %v2535_v57  ;;  %v2554_v18 = vmul.f32 1.442695, %v2553_v35 }
0x136a   :  { %2992 = vpow2.f32 %v2554_v18 }
0x136e   :  { %v2991_v46 = vpop.eup %2990 }
0x136f   :  { %v2537_v43 = vadd.f32 1.0, %v2991_v46 }
0x1370   :  { %v2993_v54 = vpop.eup %2992 }
0x1371   :  { %2994 = vrcp.f32 %v2537_v43  ;;  %v2556_v33 = vadd.f32 1.0, %v2993_v54  ;;  %vm2543_vm5 = vweird.f32 %v2537_v43  ;;  %v2549_v8 = vand.u32 2147483648, %v2537_v43  ;;  %v2602_v2 = vpop.xlane.xlu0 %2601 }
0x1372   :  { %v2547_v36 = vand.u32 2147483647, %v2537_v43 }
0x1373   :  { %2996 = vrcp.f32 %v2556_v33  ;;  %v2568_v15 = vand.u32 2147483648, %v2556_v33  ;;  %v2566_v12 = vand.u32 2147483647, %v2556_v33  ;;  %vm2562_vm8 = vweird.f32 %v2556_v33 }
0x1374   :  { %v2550_v11 = vor.u32 1.1754944e-38, %v2549_v8  ;;  %vm2548_vm9 = vcmp.eq.f32.partialorder %v2547_v36, 8.507059e+37 }
0x1375   :  { %v2569_v38 = vor.u32 1.1754944e-38, %v2568_v15  ;;  %vm2567_vm10 = vcmp.eq.f32.partialorder %v2566_v12, 8.507059e+37 }
0x1377   :  { %v2995_v17 = vpop.eup %2994 }
0x1378   :  { %v2539_v30 = vmul.f32 %v2995_v17, %v2537_v43  ;;  %vm2544_vm2 = vweird.f32 %v2995_v17  ;;  %v2621_v43 = vld [vmem:[#allocation10 + $0x10] sm:$0xff] }
0x1379   :  { %v2997_v29 = vpop.eup %2996  ;;  %vm2545_vm7 = vmor %vm2543_vm5, %vm2544_vm2 }
0x137a   :  { %v2540_v7 = vsub.f32 1.0, %v2539_v30  ;;  %v2558_v21 = vmul.f32 %v2997_v29, %v2556_v33  ;;  %vm2563_vm6 = vweird.f32 %v2997_v29 }
0x137b   :  { %vm2564_vm0 = vmor %vm2562_vm8, %vm2563_vm6 }
0x137c   :  { %v2541_v37 = vmul.f32 %v2995_v17, %v2540_v7  ;;  %v2559_v25 = vsub.f32 1.0, %v2558_v21 }
0x137e   :  { %v2542_v56 = vadd.f32 %v2995_v17, %v2541_v37  ;;  %v2560_v62 = vmul.f32 %v2997_v29, %v2559_v25 }
0x1380   :  { %v2546_v0 = vsel %vm2545_vm7, %v2995_v17, %v2542_v56  ;;  %v2561_v26 = vadd.f32 %v2997_v29, %v2560_v62 }
0x1381   :  { %v2551_v1 = vsel %vm2548_vm9, %v2550_v11, %v2546_v0  ;;  %v2839_v11 = vld [vmem:[%s4642_s0 + $0x8] sm:$0xff] }
0x1382   :  { %v2565_v20 = vsel %vm2564_vm0, %v2997_v29, %v2561_v26 }
0x1383   :  { %v2570_v53 = vsel %vm2567_vm10, %v2569_v38, %v2565_v20 }
0x1384   :  { %v2572_v52 = vmul.f32 %v2570_v53, %v2551_v1  ;;  %v3061_v1 = vld [vmem:[%s4642_s0] sm:$0xff] }
0x1386   :  { %v2838_v13 = vadd.f32 -0.2, %v2572_v52 }
0x1388   :  { %v2574_v9 = vmul.f32 2.0, %v2838_v13 }
0x138a   :  { %v2575_v59 = vsub.f32 0.0, %v2574_v9 }
0x138c   :  { %v2576_v14 = vmul.f32 1.442695, %v2575_v59 }
0x138e   :  { %2998 = vpow2.f32 %v2576_v14 }
0x1394   :  { %v2999_v44 = vpop.eup %2998 }
0x1395   :  { %v2578_v51 = vadd.f32 1.0, %v2999_v44 }
0x1397   :  { %3000 = vrcp.f32 %v2578_v51  ;;  %v2590_v4 = vand.u32 2147483648, %v2578_v51  ;;  %v2588_v16 = vand.u32 2147483647, %v2578_v51  ;;  %vm2584_vm12 = vweird.f32 %v2578_v51 }
0x1399   :  { %v2591_v19 = vor.u32 1.1754944e-38, %v2590_v4  ;;  %vm2589_vm15 = vcmp.eq.f32.partialorder %v2588_v16, 8.507059e+37 }
0x139d   :  { %v3001_v55 = vpop.eup %3000 }
0x139e   :  { %v2580_v5 = vmul.f32 %v3001_v55, %v2578_v51  ;;  %vm2585_vm11 = vweird.f32 %v3001_v55 }
0x139f   :  { %vm2586_vm13 = vmor %vm2584_vm12, %vm2585_vm11 }
0x13a0   :  { %v2581_v42 = vsub.f32 1.0, %v2580_v5 }
0x13a2   :  { %v2582_v3 = vmul.f32 %v3001_v55, %v2581_v42 }
0x13a4   :  { %v2583_v45 = vadd.f32 %v3001_v55, %v2582_v3 }
0x13a6   :  { %v2587_v32 = vsel %vm2586_vm13, %v3001_v55, %v2583_v45 }
0x13a7   :  { %v2592_v61 = vsel %vm2589_vm15, %v2591_v19, %v2587_v32 }
0x13a8   :  { %2596 = vperm.xlu2 %2852, %v2592_v61  }
0x1402   :  { %v2597_v10 = vpop.permute.xlu2 %2596 }
0x1403   :  { %v2599_v50 = vmul.f32 %v2597_v10, %v4603_v41 }
0x1405   :  { %v2603_v23 = vsel %vm202_vm1, %v2599_v50, 0.0 }
0x1406   :  { %2604 = vadd.xlane.f32.xlu2 %v2603_v23 }
0x1479   :  { %v2605_v24 = vpop.xlane.xlu2 %2604 }
0x147a   :  { %v2606_v40 = vadd.f32 %v2605_v24, %v2602_v2 }
0x147c   :  { %v2607_v27 = vmul.f32 0.0061728396, %v2606_v40 }
0x147e   :  { %v2608_v22 = vsub.f32 %v4617_v60, %v2607_v27  ;;  %v2613_v6 = vsub.f32 %v2599_v50, %v2607_v27 }
0x1480   :  { %v2614_v39 = vmul.f32 %v2613_v6, %v2613_v6  ;;  %v2609_v49 = vmul.f32 %v2608_v22, %v2608_v22 }
0x1482   :  { %v2615_v47 = vsel %vm202_vm1, %v2614_v39, 0.0  ;;  %v2610_v63 = vsel %vm202_vm1, %v2609_v49, 0.0 }
0x1483   :  { %2616 = vadd.xlane.f32.xlu0 %v2615_v47  ;;  %2611 = vadd.xlane.f32.xlu1 %v2610_v63 }
0x1497   :  { %2644 = vperm.xlu0 %2850, %v2635_v28  }
0x14f6   :  { %v2617_v41 = vpop.xlane.xlu0 %2616  ;;  %v2612_v58 = vpop.xlane.xlu1 %2611 }
0x14f7   :  { %v2618_v34 = vadd.f32 %v2617_v41, %v2612_v58 }
0x14f9   :  { %v2619_v31 = vmul.f32 0.0061728396, %v2618_v34 }
0x14fb   :  { %v2622_v48 = vadd.f32 1e-05, %v2619_v31 }
0x14fd   :  { %3002 = vrsqrt.f32 %v2622_v48  ;;  %vm2629_vm3 = vweird.f32 %v2622_v48 }
0x1503   :  { %v3003_v57 = vpop.eup %3002 }
0x1504   :  { %v2624_v35 = vmul.f32 %v3003_v57, %v2622_v48  ;;  %vm2630_vm14 = vweird.f32 %v3003_v57 }
0x1505   :  { %vm2631_vm4 = vmor %vm2629_vm3, %vm2630_vm14 }
0x1506   :  { %v2625_v60 = vmul.f32 %v3003_v57, %v2624_v35 }
0x1508   :  { %v2626_v18 = vmul.f32 0.5, %v2625_v60 }
0x1509   :  { %v2645_v21 = vpop.permute.xlu0 %2644 }
0x150a   :  { %v2627_v46 = vsub.f32 1.5, %v2626_v18 }
0x150c   :  { %v2628_v54 = vmul.f32 %v3003_v57, %v2627_v46 }
0x150e   :  { %v2632_v33 = vsel %vm2631_vm4, %v3003_v57, %v2628_v54 }
0x150f   :  { %v2633_v17 = vmul.f32 %v2632_v33, %v2621_v43 }
0x1511   :  { %2638 = vperm.xlu2 %2852, %v2633_v17  }
0x156b   :  { %v2639_v30 = vpop.permute.xlu2 %2638 }
0x156c   :  { %v2641_v29 = vmul.f32 %v2639_v30, %v2608_v22  ;;  %v2655_v7 = vmul.f32 %v2639_v30, %v2613_v6 }
0x156e   :  { %v2647_v37 = vadd.f32 %v2645_v21, %v2641_v29  ;;  %v2656_v25 = vadd.f32 %v2655_v7, %v2645_v21 }
0x1570   :  { %v2648_v56 = vadd.f32 3.0, %v2647_v37  ;;  %v2657_v8 = vadd.f32 3.0, %v2656_v25 }
0x1572   :  { %v2649_v15 = vmax.f32 %v2648_v56, 0.0  ;;  %v2658_v36 = vmax.f32 %v2657_v8, 0.0 }
0x1574   :  { %v2650_v62 = vmin.f32 %v2649_v15, 6.0  ;;  %v2659_v12 = vmin.f32 %v2658_v36, 6.0 }
0x1576   :  { %v2651_v0 = vmul.f32 %v2650_v62, %v2647_v37  ;;  %v2660_v26 = vmul.f32 %v2659_v12, %v2656_v25 }
0x1578   :  { %v2652_v38 = vmul.f32 0.16666667, %v2651_v0  ;;  %v2661_v20 = vmul.f32 0.16666667, %v2660_v26 }
0x157a   :  { %v2653_v53 = vadd.f32 %v3061_v1, %v2652_v38  ;;  %v2663_v52 = vadd.f32 %v2839_v11, %v2661_v20 }
0x157c   :  { %2654 = vst.msk [vmem:[%s4656_s14] sm:$0xff] %vm202_vm1, %v2653_v53 }
0x157d   :  { %2840 = vst.msk [vmem:[%s4656_s14 + $0x8] sm:$0xff] %vm202_vm1, %v2663_v52 }
0x157e   :  { %2670 = vsyncpa [#allocation3], 1 }
0x157f   :  { %2671 = vsyncpa [#allocation5], 1 }
0x1580   :  { %2672 = vsyncpa [#allocation8], 1 }
0x1581   :  { %2673 = vsyncpa [#allocation11], 1 }

</bundles_post_ra>
